<compile_context>
chip_gen: v5e
topology: v5e:2x2
jax: 0.10.0
libtpu: 0.0.40
codegen_flags: <defaults>
</compile_context>

<pallas_src>
import functools
import math

import jax
import jax.numpy as jnp
from jax.experimental import pallas as pl
from jax.experimental.pallas import tpu as pltpu

EPS = 1e-5                 # nn.LayerNorm default eps
MASK_FILL = -32767.0       # -2**15 + 1, the masked_fill value used by the module
_GELU_C = math.sqrt(2.0 / math.pi)


# ----------------------------------------------------------------------- helpers
def _layer_norm_f32(h, gamma, beta):
    """LayerNorm over the last axis; h/gamma/beta already f32."""
    mu = jnp.mean(h, axis=-1, keepdims=True)
    var = jnp.mean((h - mu) * (h - mu), axis=-1, keepdims=True)
    return (h - mu) * jax.lax.rsqrt(var + EPS) * gamma + beta


def _gelu(x):
    # TODO(synk): PyTorch nn.GELU() defaults to the exact erf formulation; the tanh
    # approximation is used here for guaranteed TPU lowering (max dev ~3e-4).
    return 0.5 * x * (1.0 + jnp.tanh(_GELU_C * (x + 0.044715 * x * x * x)))


def _approx_reciprocal(x):
    """EUP reciprocal (free slot alongside MXU/VPU work) + one Newton refinement."""
    r = pl.reciprocal(x, approx=True)
    return r * (2.0 - x * r)


def _nbytes(*arrays):
    return sum(int(a.size) * a.dtype.itemsize for a in arrays)


# --------------------------------------------------------------- attention cores
def _mha_core_batched(q, k, v, mask2d, *, nheads, dk, compute_dtype):
    """Head-batched multi-head attention for one batch element.

    q: (Lq, H*dk) f32; k, v: (Lk, H*dk) f32; mask2d: (Lq, Lk) int (0 == masked).
    One batched MXU op for the scores and one for the context instead of H tiny
    per-head matmuls.  Returns the concatenated per-head context, (Lq, H*dk) f32.
    """
    Lq, Lk = q.shape[0], k.shape[0]
    scale = 1.0 / math.sqrt(dk)
    # 1/sqrt(dk) folded into Q (Lq x D elementwise multiply instead of H x Lq x Lk).
    qh = pltpu.einshape("qhd->hqd", (q * scale).reshape(Lq, nheads, dk))
    kh = pltpu.einshape("khd->hkd", k.reshape(Lk, nheads, dk))
    vh = pltpu.einshape("khd->hkd", v.reshape(Lk, nheads, dk))
    s = jnp.einsum("hqd,hkd->hqk", qh.astype(compute_dtype), kh.astype(compute_dtype),
                   preferred_element_type=jnp.float32)
    s = jnp.where((mask2d == 0)[None, :, :], MASK_FILL, s)
    m = jnp.max(s, axis=-1, keepdims=True)
    p = jnp.exp(s - m)
    alpha = p * _approx_reciprocal(jnp.sum(p, axis=-1, keepdims=True))
    # TODO(synk): nn.Dropout(alpha) is identity in eval mode; training-time
    # stochastic dropout is not implemented.
    ctx = jnp.einsum("hqk,hkd->hqd", alpha.astype(compute_dtype),
                     vh.astype(compute_dtype), preferred_element_type=jnp.float32)
    return pltpu.einshape("hqd->qhd", ctx).reshape(Lq, nheads * dk)


def _mha_core_looped(q, k, v, mask2d, *, nheads, dk, compute_dtype):
    """Per-head fallback (always lowers); used only if the batched core does not."""
    scale = 1.0 / math.sqrt(dk)
    masked = mask2d == 0
    q = q * scale
    ctx = []
    for h in range(nheads):                      # static unroll; nheads is small
        sl = slice(h * dk, (h + 1) * dk)
        qh = q[:, sl].astype(compute_dtype)
        kh = k[:, sl].astype(compute_dtype)
        vh = v[:, sl].astype(compute_dtype)
        s = jnp.einsum("qd,kd->qk", qh, kh, preferred_element_type=jnp.float32)
        s = jnp.where(masked, MASK_FILL, s)
        p = jnp.exp(s - jnp.max(s, axis=-1, keepdims=True))
        alpha = p * _approx_reciprocal(jnp.sum(p, axis=-1, keepdims=True))
        ctx.append(jnp.dot(alpha.astype(compute_dtype), vh,
                           preferred_element_type=jnp.float32))
    return jnp.concatenate(ctx, axis=-1)


# -------------------------------------------------------- capability probes (1x)
@functools.lru_cache(maxsize=None)
def _mha_core(nheads, dk):
    """Use the head-batched MHA core if it lowers and matches a jnp reference on
    this backend; otherwise fall back to the per-head loop."""
    Lq, Lk = 16, 24
    D = nheads * dk

    def probe_kernel(q_ref, k_ref, v_ref, m_ref, o_ref):
        o_ref[...] = _mha_core_batched(q_ref[...], k_ref[...], v_ref[...], m_ref[...],
                                       nheads=nheads, dk=dk, compute_dtype=jnp.float32)

    try:
        with jax.ensure_compile_time_eval():
            kq, kk, kv = jax.random.split(jax.random.PRNGKey(1), 3)
            q = jax.random.normal(kq, (Lq, D), jnp.float32)
            k = jax.random.normal(kk, (Lk, D), jnp.float32)
            v = jax.random.normal(kv, (Lk, D), jnp.float32)
            m = jnp.ones((Lq, Lk), jnp.int32).at[:, Lk - 3:].set(0)
            out = pl.pallas_call(
                probe_kernel,
                out_shape=jax.ShapeDtypeStruct((Lq, D), jnp.float32),
            )(q, k, v, m)
            out = jax.block_until_ready(out)
            # Tiny pure-jnp reference to catch both lowering failures and miscompiles.
            qh = (q / math.sqrt(dk)).reshape(Lq, nheads, dk).transpose(1, 0, 2)
            kh = k.reshape(Lk, nheads, dk).transpose(1, 0, 2)
            vh = v.reshape(Lk, nheads, dk).transpose(1, 0, 2)
            s = jnp.where((m == 0)[None], MASK_FILL,
                          jnp.einsum("hqd,hkd->hqk", qh, kh))
            ref = jnp.einsum("hqk,hkd->hqd", jax.nn.softmax(s, axis=-1), vh)
            ref = ref.transpose(1, 0, 2).reshape(Lq, D)
            if bool(jnp.max(jnp.abs(out - ref)) < 1e-3):
                return _mha_core_batched
    except Exception:
        pass
    return _mha_core_looped


@functools.lru_cache(maxsize=None)
def _const_operand_kwargs():
    """BlockSpec kwargs single-buffering grid-invariant operands (weights, biases,
    LN affines); falls back to default double-buffering if unsupported."""
    try:
        with jax.ensure_compile_time_eval():
            kw = {"pipeline_mode": pl.Buffered(1)}

            def probe_kernel(w_ref, x_ref, o_ref):
                o_ref[...] = x_ref[...] + w_ref[...]

            x = jnp.ones((16, 128), jnp.float32)
            w = jnp.full((8, 128), 2.0, jnp.float32)
            out = pl.pallas_call(
                probe_kernel,
                out_shape=jax.ShapeDtypeStruct((16, 128), jnp.float32),
                grid=(2,),
                in_specs=[pl.BlockSpec((8, 128), lambda i: (0, 0), **kw),
                          pl.BlockSpec((8, 128), lambda i: (i, 0))],
                out_specs=pl.BlockSpec((8, 128), lambda i: (i, 0)),
            )(w, x)
            out = jax.block_until_ready(out)
            if bool(jnp.all(out == 3.0)):
                return kw
    except Exception:
        pass
    return {}


@functools.lru_cache(maxsize=None)
def _vmem_cap_bytes():
    try:
        info = pltpu.get_tpu_info()
        cap = int(getattr(info, "vmem_capacity_bytes", 0))
        if cap > 0:
            return cap
    except Exception:
        pass
    return 64 * 2**20            # conservative default: v7x per-core VMEM


def _compiler_params(est_vmem_bytes, semantics):
    cap = _vmem_cap_bytes()
    # Never request the full physical VMEM: leave headroom for compiler-internal
    # scratch (v7x: 64 MiB/core -> ~56 MiB budget; v5e/v6e: 128 MiB -> ~112 MiB).
    budget = max(min(cap - (8 << 20), (cap * 7) // 8), 16 << 20)
    limit = int(min(max(int(est_vmem_bytes * 1.5), 32 << 20), budget))
    return pltpu.CompilerParams(dimension_semantics=semantics,
                                vmem_limit_bytes=limit)


# ---------------------------------------------------------------------- kernels
def _self_attn_postln_kernel(mask_ref, x_ref,
                             wqkv_ref, bqkv_ref, wo_ref, bo_ref,
                             g_ref, b_ref, out_ref, *, nheads, dk, mha):
    """out = LayerNorm(x + SelfAttn(x, x, x, mask)) for one batch element."""
    cd = wqkv_ref.dtype                          # matmul compute dtype (f32 / bf16)
    D = nheads * dk
    x_in = x_ref[0]                              # (L, F)
    x32 = x_in.astype(jnp.float32)

    # Fused QKV projection: one (L, F) @ (F, 3D) MXU matmul, f32 accumulation.
    qkv = jnp.dot(x_in.astype(cd), wqkv_ref[...],
                  preferred_element_type=jnp.float32) + bqkv_ref[...]
    q, k, v = qkv[:, :D], qkv[:, D:2 * D], qkv[:, 2 * D:]

    ctx = mha(q, k, v, mask_ref[0], nheads=nheads, dk=dk, compute_dtype=cd)
    attn = jnp.dot(ctx.astype(cd), wo_ref[...],
                   preferred_element_type=jnp.float32) + bo_ref[...]

    gamma = g_ref[...].astype(jnp.float32)       # hoisted affine params (f32)
    beta = b_ref[...].astype(jnp.float32)
    out_ref[0] = _layer_norm_f32(x32 + attn, gamma, beta).astype(out_ref.dtype)


def _cross_attn_ffn_kernel(mask_ref, qx_ref, kx_ref, vx_ref,
                           wq_ref, bq_ref, wk_ref, bk_ref, wv_ref, bv_ref,
                           wo_ref, bo_ref,
                           g1_ref, b1_ref, g2_ref, b2_ref,
                           w1_ref, bb1_ref, w2_ref, bb2_ref,
                           out_ref, *, nheads, dk, mha):
    """Fused: zq = SelfAttn2(qx', kx, vx, mask); out = FFN_PostLN(qx', zq).
    zq and the second read of qx' never touch HBM."""
    cd = wq_ref.dtype
    qx = qx_ref[0]                               # (Lq, F)
    qx32 = qx.astype(jnp.float32)

    # Cross-attention projections (f32 accumulation, weights in storage dtype).
    q = jnp.dot(qx.astype(cd), wq_ref[...],
                preferred_element_type=jnp.float32) + bq_ref[...]
    k = jnp.dot(kx_ref[0].astype(cd), wk_ref[...],
                preferred_element_type=jnp.float32) + bk_ref[...]
    v = jnp.dot(vx_ref[0].astype(cd), wv_ref[...],
                preferred_element_type=jnp.float32) + bv_ref[...]
    ctx = mha(q, k, v, mask_ref[0], nheads=nheads, dk=dk, compute_dtype=cd)
    zq = jnp.dot(ctx.astype(cd), wo_ref[...],
                 preferred_element_type=jnp.float32) + bo_ref[...]

    # FFN_PostLN fused on the same block (nn.Dropout == identity in eval mode).
    g1 = g1_ref[...].astype(jnp.float32)
    b1 = b1_ref[...].astype(jnp.float32)
    g2 = g2_ref[...].astype(jnp.float32)
    b2 = b2_ref[...].astype(jnp.float32)
    z1 = _layer_norm_f32(qx32 + zq, g1, b1)
    u = _gelu(jnp.dot(z1.astype(cd), w1_ref[...],
                      preferred_element_type=jnp.float32) + bb1_ref[...])
    ffn = jnp.dot(u.astype(cd), w2_ref[...],
                  preferred_element_type=jnp.float32) + bb2_ref[...]
    out_ref[0] = _layer_norm_f32(z1 + ffn, g2, b2).astype(out_ref.dtype)


# --------------------------------------------------------------------- wrappers
def self_attention_postln(x, mask, p, *, nheads, dk):
    """LayerNorm(x + SelfAttention_PostLN(x, x, x, mask)); x: (B, L, F)."""
    B, L, F = x.shape
    D = nheads * dk
    wkw = _const_operand_kwargs()
    batch3 = lambda shape: pl.BlockSpec(shape, lambda b: (b, 0, 0))
    const = lambda shape: pl.BlockSpec(shape, lambda b: (0, 0), **wkw)
    w_mult = 1 if wkw else 2
    w_bytes = _nbytes(p["wqkv"], p["bqkv"], p["wo"], p["bo"], p["g"], p["b"]) * w_mult
    act_bytes = 2 * (L * L * 4 + 2 * L * F * x.dtype.itemsize)
    interm = (L * 3 * D + 2 * nheads * L * L + L * D + 2 * L * F) * 4
    kernel = functools.partial(_self_attn_postln_kernel, nheads=nheads, dk=dk,
                               mha=_mha_core(nheads, dk))
    # NOTE: grid=(B,) ("parallel") shards batch across TensorCores; for production
    # B*L one would add an Lq tile axis (flash-style) for more pipeline steps.
    return pl.pallas_call(
        kernel,
        out_shape=jax.ShapeDtypeStruct((B, L, F), x.dtype),
        grid_spec=pltpu.PrefetchScalarGridSpec(
            num_scalar_prefetch=0,
            grid=(B,),
            in_specs=[
                batch3((1, L, L)),                 # maskPAD1
                batch3((1, L, F)),                 # x (qx == kx == vx)
                const((F, 3 * D)), const((1, 3 * D)),   # fused [WQ|WK|WV], bias
                const((D, F)), const((1, F)),      # WO, bO
                const((1, F)), const((1, F)),      # LayerNorm gamma, beta
            ],
            out_specs=batch3((1, L, F)),
        ),
        compiler_params=_compiler_params(w_bytes + act_bytes + interm, ("parallel",)),
    )(mask, x, p["wqkv"], p["bqkv"], p["wo"], p["bo"], p["g"], p["b"])


def cross_attention_ffn(qx, kx, vx, mask, pa, pf, *, nheads, dk):
    """Fused SelfAttention_PostLN(qx, kx, vx, mask) + FFN_PostLN(qx, zq)."""
    B, Lq, F = qx.shape
    Lk = kx.shape[1]
    D = nheads * dk
    Hid = pf["w1"].shape[1]
    wkw = _const_operand_kwargs()
    batch3 = lambda shape: pl.BlockSpec(shape, lambda b: (b, 0, 0))
    const = lambda shape: pl.BlockSpec(shape, lambda b: (0, 0), **wkw)
    w_mult = 1 if wkw else 2
    w_bytes = _nbytes(pa["wq"], pa["bq"], pa["wk"], pa["bk"], pa["wv"], pa["bv"],
                      pa["wo"], pa["bo"], pf["g1"], pf["b1"], pf["g2"], pf["b2"],
                      pf["w1"], pf["bb1"], pf["w2"], pf["bb2"]) * w_mult
    act_bytes = 2 * (Lq * Lk * 4 + (2 * Lq * F + 2 * Lk * F) * qx.dtype.itemsize)
    interm = ((Lq + 2 * Lk) * D + 2 * nheads * Lq * Lk + Lq * D
              + 4 * Lq * F + Lq * Hid) * 4
    kernel = functools.partial(_cross_attn_ffn_kernel, nheads=nheads, dk=dk,
                               mha=_mha_core(nheads, dk))
    return pl.pallas_call(
        kernel,
        out_shape=jax.ShapeDtypeStruct((B, Lq, F), qx.dtype),
        grid_spec=pltpu.PrefetchScalarGridSpec(
            num_scalar_prefetch=0,
            grid=(B,),
            in_specs=[
                batch3((1, Lq, Lk)),               # maskPAD2
                batch3((1, Lq, F)),                # qx' (read once)
                batch3((1, Lk, F)),                # kx
                batch3((1, Lk, F)),                # vx
                const((F, D)), const((1, D)),      # WQ, bQ
                const((F, D)), const((1, D)),      # WK, bK
                const((F, D)), const((1, D)),      # WV, bV
                const((D, F)), const((1, F)),      # WO, bO
                const((1, F)), const((1, F)),      # LN1 gamma, beta
                const((1, F)), const((1, F)),      # LN2 gamma, beta
                const((F, Hid)), const((1, Hid)),  # W1, b1
                const((Hid, F)), const((1, F)),    # W2, b2
            ],
            out_specs=batch3((1, Lq, F)),
        ),
        compiler_params=_compiler_params(w_bytes + act_bytes + interm, ("parallel",)),
    )(mask, qx, kx, vx,
      pa["wq"], pa["bq"], pa["wk"], pa["bk"], pa["wv"], pa["bv"], pa["wo"], pa["bo"],
      pf["g1"], pf["b1"], pf["g2"], pf["b2"],
      pf["w1"], pf["bb1"], pf["w2"], pf["bb2"])


@functools.partial(jax.jit, static_argnames=("nheads", "dk"))
def transformer_decoder_block(qx, kx, vx, mask1, mask2, params, *, nheads, dk):
    """TransformerDecoderBlock.forward (eval mode). Returns the updated x; the
    remaining tuple elements (kx, vx, preScores, masks, addLoss) pass through."""
    qx1 = self_attention_postln(qx, mask1, params["attn1"], nheads=nheads, dk=dk)
    return cross_attention_ffn(qx1, kx, vx, mask2, params["attn2"], params["ffn"],
                               nheads=nheads, dk=dk)


# --------------------------------------------------------------- params / reference
def init_params(key, fea_size, nheads, dk, *, w_dtype=jnp.float32):
    """Synthetic parameters. Linear weights use (in_features, out_features) layout
    (transpose of nn.Linear's weight). Weights mimic truncated_normal_(std=0.02);
    biases / LayerNorm affines get small non-zero values to exercise those paths."""
    D = nheads * dk
    hidden = 4 * fea_size
    keys = iter(jax.random.split(key, 24))

    def w(shape):
        return (jax.random.normal(next(keys), shape, jnp.float32) * 0.02).astype(w_dtype)

    def f32(shape, scale):
        return jax.random.normal(next(keys), shape, jnp.float32) * scale

    attn1 = {   # selfAttn1 (+ the decoder block's standalone LayerNorm)
        "wqkv": w((fea_size, 3 * D)),       # [WQ | WK | WV] fused along the out dim
        "bqkv": f32((1, 3 * D), 0.02),
        "wo": w((D, fea_size)), "bo": f32((1, fea_size), 0.02),
        "g": 1.0 + f32((1, fea_size), 0.1), "b": f32((1, fea_size), 0.05),
    }
    attn2 = {   # selfAttn2 (attention over kx / vx)
        "wq": w((fea_size, D)), "bq": f32((1, D), 0.02),
        "wk": w((fea_size, D)), "bk": f32((1, D), 0.02),
        "wv": w((fea_size, D)), "bv": f32((1, D), 0.02),
        "wo": w((D, fea_size)), "bo": f32((1, fea_size), 0.02),
    }
    ffn = {     # FFN_PostLN
        "g1": 1.0 + f32((1, fea_size), 0.1), "b1": f32((1, fea_size), 0.05),
        "g2": 1.0 + f32((1, fea_size), 0.1), "b2": f32((1, fea_size), 0.05),
        "w1": w((fea_size, hidden)), "bb1": f32((1, hidden), 0.02),
        "w2": w((hidden, fea_size)), "bb2": f32((1, fea_size), 0.02),
    }
    return {"attn1": attn1, "attn2": attn2, "ffn": ffn}


_MATMUL_WEIGHTS = frozenset({"wqkv", "wq", "wk", "wv", "wo", "w1", "w2"})


def cast_matmul_weights(params, dtype):
    """Cast only the big matmul weights (production default: bf16); LayerNorm
    parameters and biases stay f32."""
    return {blk: {k: (v.astype(dtype) if k in _MATMUL_WEIGHTS else v)
                  for k, v in sub.items()}
            for blk, sub in params.items()}


def _reference(qx, kx, vx, mask1, mask2, params, *, nheads, dk):
    """Pure-JAX (f32 math) mirror of the PyTorch TransformerDecoderBlock forward."""
    def ln(h, g, b):
        mu = jnp.mean(h, axis=-1, keepdims=True)
        var = jnp.mean((h - mu) ** 2, axis=-1, keepdims=True)
        return (h - mu) * jax.lax.rsqrt(var + EPS) * g + b

    def mha(q_in, k_in, v_in, mask, wq, bq, wk, bk, wv, bv, wo, bo):
        B, Lq, _ = q_in.shape
        Lk = k_in.shape[1]
        q = (q_in @ wq.astype(jnp.float32) + bq).reshape(B, Lq, nheads, dk).transpose(0, 2, 1, 3)
        k = (k_in @ wk.astype(jnp.float32) + bk).reshape(B, Lk, nheads, dk).transpose(0, 2, 1, 3)
        v = (v_in @ wv.astype(jnp.float32) + bv).reshape(B, Lk, nheads, dk).transpose(0, 2, 1, 3)
        s = q @ k.transpose(0, 1, 3, 2) / math.sqrt(dk)
        s = jnp.where(mask[:, None, :, :] == 0, MASK_FILL, s)
        alpha = jax.nn.softmax(s, axis=-1)
        z = (alpha @ v).transpose(0, 2, 1, 3).reshape(B, Lq, nheads * dk)
        return z @ wo.astype(jnp.float32) + bo

    D = nheads * dk
    a1, a2, f = params["attn1"], params["attn2"], params["ffn"]
    attn1 = mha(qx, qx, qx, mask1,
                a1["wqkv"][:, :D], a1["bqkv"][:, :D],
                a1["wqkv"][:, D:2 * D], a1["bqkv"][:, D:2 * D],
                a1["wqkv"][:, 2 * D:], a1["bqkv"][:, 2 * D:],
                a1["wo"], a1["bo"])
    qx1 = ln(qx + attn1, a1["g"], a1["b"])
    zq = mha(qx1, kx, vx, mask2,
             a2["wq"], a2["bq"], a2["wk"], a2["bk"], a2["wv"], a2["bv"],
             a2["wo"], a2["bo"])
    z1 = ln(qx1 + zq, f["g1"], f["b1"])
    u = _gelu(z1 @ f["w1"].astype(jnp.float32) + f["bb1"])
    ffn = u @ f["w2"].astype(jnp.float32) + f["bb2"]
    return ln(z1 + ffn, f["g2"], f["b2"])


if __name__ == "__main__":
    # Small shapes consistent with the module, lane-dense (F, 4F, dk*H multiples of 128).
    B, Lq, Lkv = 2, 16, 24      # batch, decoder length, encoder (kv) length
    F = 128                     # feaSize
    NHEADS, DK = 4, 32          # multiNum, dk  (dk * multiNum == feaSize)

    key = jax.random.PRNGKey(0)
    k_q, k_k, k_v, k_p = jax.random.split(key, 4)
    qx = jax.random.normal(k_q, (B, Lq, F), jnp.float32)
    kx = jax.random.normal(k_k, (B, Lkv, F), jnp.float32)
    vx = jax.random.normal(k_v, (B, Lkv, F), jnp.float32)
    # maskPAD1: causal self-attention mask; maskPAD2: padding mask on the kv side.
    mask1 = jnp.tile(jnp.tril(jnp.ones((Lq, Lq), jnp.int32))[None], (B, 1, 1))
    mask2 = jnp.ones((B, Lq, Lkv), jnp.int32).at[1, :, Lkv - 3:].set(0)

    params = init_params(k_p, F, NHEADS, DK)

    # Resolve backend-capability probes eagerly (outside any jit trace).
    _const_operand_kwargs()
    _mha_core(NHEADS, DK)

    # --- f32 weights: tight correctness check against the pure-JAX reference ---
    out = transformer_decoder_block(qx, kx, vx, mask1, mask2, params,
                                    nheads=NHEADS, dk=DK)
    out = jax.block_until_ready(out)
    ref = _reference(qx, kx, vx, mask1, mask2, params, nheads=NHEADS, dk=DK)
    assert out.shape == (B, Lq, F)
    err = float(jnp.max(jnp.abs(out - ref)))
    assert err < 1e-3, f"f32 max abs err {err}"

    # --- bf16 matmul weights straight to the MXU (production default): loose check ---
    params_bf16 = cast_matmul_weights(params, jnp.bfloat16)
    out_bf = transformer_decoder_block(qx, kx, vx, mask1, mask2, params_bf16,
                                       nheads=NHEADS, dk=DK)
    out_bf = jax.block_until_ready(out_bf)
    ref_bf = _reference(qx, kx, vx, mask1, mask2, params_bf16, nheads=NHEADS, dk=DK)
    err_bf = float(jnp.max(jnp.abs(out_bf - ref_bf)))
    assert err_bf < 5e-2, f"bf16 max abs err {err_bf}"

    print("KERNEL_OK")
</pallas_src>

<mosaic_0001>
module attributes {stable_mosaic.version = 11 : i64} {
  func.func @probe_kernel(%arg0: i32, %arg1: memref<8x128xf32, #tpu.memory_space<vmem>>, %arg2: memref<8x128xf32, #tpu.memory_space<vmem>>, %arg3: memref<8x128xf32, #tpu.memory_space<vmem>>) attributes {dimension_semantics = [#tpu.dimension_semantics<arbitrary>], iteration_bounds = array<i64: 2>, scalar_prefetch = 0 : i64, scratch_operands = 0 : i64, tpu.core_type = #tpu.core_type<tc>, window_params = [{pipeline_mode = #tpu.pipeline_mode<synchronous>, transform_indices = @transform_0, window_bounds = array<i64: 8, 128>}, {transform_indices = @transform_1, window_bounds = array<i64: 8, 128>}, {transform_indices = @transform_2, window_bounds = array<i64: 8, 128>}]} {
    %c0 = arith.constant 0 : index
    %c0_0 = arith.constant 0 : index
    %0 = vector.load %arg2[%c0, %c0_0] : memref<8x128xf32, #tpu.memory_space<vmem>>, vector<8x128xf32>
    %c0_1 = arith.constant 0 : index
    %c0_2 = arith.constant 0 : index
    %1 = vector.load %arg1[%c0_1, %c0_2] : memref<8x128xf32, #tpu.memory_space<vmem>>, vector<8x128xf32>
    %2 = arith.addf %0, %1 : vector<8x128xf32>
    %c0_3 = arith.constant 0 : index
    %c0_4 = arith.constant 0 : index
    %3 = vector.load %arg3[%c0_3, %c0_4] : memref<8x128xf32, #tpu.memory_space<vmem>>, vector<8x128xf32>
    tpu.vector_store %arg3[%c0_3, %c0_4], %2 {strides = array<i32>} : memref<8x128xf32, #tpu.memory_space<vmem>>, vector<8x128xf32>,
    return
  }
  func.func @transform_0(%arg0: i32) -> (i32, i32) {
    %c0_i32 = arith.constant 0 : i32
    %c0_i32_0 = arith.constant 0 : i32
    %c0_i32_1 = arith.constant 0 : i32
    return %c0_i32, %c0_i32_0 : i32, i32
  }
  func.func @transform_1(%arg0: i32) -> (i32, i32) {
    %c0_i32 = arith.constant 0 : i32
    %c0_i32_0 = arith.constant 0 : i32
    return %arg0, %c0_i32 : i32, i32
  }
  func.func @transform_2(%arg0: i32) -> (i32, i32) {
    %c0_i32 = arith.constant 0 : i32
    %c0_i32_0 = arith.constant 0 : i32
    return %arg0, %c0_i32 : i32, i32
  }
}

module attributes {stable_mosaic.version = 11 : i64} {
  func.func @probe_kernel(%arg0: memref<16x128xf32, #tpu.memory_space<vmem>>, %arg1: memref<24x128xf32, #tpu.memory_space<vmem>>, %arg2: memref<24x128xf32, #tpu.memory_space<vmem>>, %arg3: memref<16x24xi32, #tpu.memory_space<vmem>>, %arg4: memref<16x128xf32, #tpu.memory_space<vmem>>) attributes {dimension_semantics = [], scalar_prefetch = 0 : i64, scratch_operands = 0 : i64, tpu.core_type = #tpu.core_type<tc>} {
    %c0 = arith.constant 0 : index
    %c0_0 = arith.constant 0 : index
    %0 = vector.load %arg0[%c0, %c0_0] : memref<16x128xf32, #tpu.memory_space<vmem>>, vector<16x128xf32>
    %c0_1 = arith.constant 0 : index
    %c0_2 = arith.constant 0 : index
    %1 = vector.load %arg1[%c0_1, %c0_2] : memref<24x128xf32, #tpu.memory_space<vmem>>, vector<24x128xf32>
    %c0_3 = arith.constant 0 : index
    %c0_4 = arith.constant 0 : index
    %2 = vector.load %arg2[%c0_3, %c0_4] : memref<24x128xf32, #tpu.memory_space<vmem>>, vector<24x128xf32>
    %c0_5 = arith.constant 0 : index
    %c0_6 = arith.constant 0 : index
    %3 = vector.load %arg3[%c0_5, %c0_6] : memref<16x24xi32, #tpu.memory_space<vmem>>, vector<16x24xi32>
    %cst = arith.constant 0.176776692 : f32
    %4 = vector.broadcast %cst : f32 to vector<16x128xf32>
    %5 = arith.mulf %0, %4 : vector<16x128xf32>
    %6 = vector.shape_cast %5 : vector<16x128xf32> to vector<16x4x32xf32>
    %7 = tpu.transpose %6, [1, 0, 2] : vector<16x4x32xf32> -> vector<4x16x32xf32>
    %8 = vector.shape_cast %1 : vector<24x128xf32> to vector<24x4x32xf32>
    %9 = tpu.transpose %8, [1, 0, 2] : vector<24x4x32xf32> -> vector<4x24x32xf32>
    %10 = vector.shape_cast %2 : vector<24x128xf32> to vector<24x4x32xf32>
    %11 = tpu.transpose %10, [1, 0, 2] : vector<24x4x32xf32> -> vector<4x24x32xf32>
    "tpu.trace_start"() <{level = 10 : i32, message = "hqd,hkd->hqk"}> : () -> ()
    %cst_7 = arith.constant dense<0.000000e+00> : vector<4x16x24xf32>
    %12 = tpu.matmul %7, %9, %cst_7 {dimension_numbers = #tpu.dot_dimension_numbers<[2], [2], [1], [1], [0, 0, 0, 1, 1, 1], [0], [0]>} : vector<4x16x32xf32>, vector<4x24x32xf32>, vector<4x16x24xf32> -> vector<4x16x24xf32>
    %c0_i32 = arith.constant 0 : i32
    "tpu.trace_stop"() : () -> ()
    %13 = vector.broadcast %c0_i32 : i32 to vector<16x24xi32>
    %14 = arith.cmpi eq, %3, %13 : vector<16x24xi32>
    %15 = vector.shape_cast %14 : vector<16x24xi1> to vector<1x16x24xi1>
    %cst_8 = arith.constant -3.276700e+04 : f32
    %16 = vector.shape_cast %15 : vector<1x16x24xi1> to vector<1x16x24xi1>
    %17 = vector.broadcast %16 : vector<1x16x24xi1> to vector<4x16x24xi1>
    %18 = vector.broadcast %cst_8 : f32 to vector<4x16x24xf32>
    %19 = arith.select %17, %18, %12 : vector<4x16x24xi1>, vector<4x16x24xf32>
    %cst_9 = arith.constant dense<0xFF800000> : vector<4x16xf32>
    %20 = vector.multi_reduction <maximumf>, %19, %cst_9 [2] : vector<4x16x24xf32> to vector<4x16xf32>
    %21 = vector.shape_cast %20 : vector<4x16xf32> to vector<4x16x1xf32>
    %22 = vector.broadcast %21 : vector<4x16x1xf32> to vector<4x16x24xf32>
    %23 = arith.subf %19, %22 : vector<4x16x24xf32>
    %24 = math.exp %23 : vector<4x16x24xf32>
    %cst_10 = arith.constant dense<0.000000e+00> : vector<4x16xf32>
    %25 = vector.multi_reduction <add>, %24, %cst_10 [2] : vector<4x16x24xf32> to vector<4x16xf32>
    %26 = vector.shape_cast %25 : vector<4x16xf32> to vector<4x16x1xf32>
    %27 = tpu.reciprocal %26 {approx = true} : vector<4x16x1xf32> -> vector<4x16x1xf32>
    %28 = arith.mulf %26, %27 : vector<4x16x1xf32>
    %cst_11 = arith.constant 2.000000e+00 : f32
    %29 = vector.broadcast %cst_11 : f32 to vector<4x16x1xf32>
    %30 = arith.subf %29, %28 : vector<4x16x1xf32>
    %31 = arith.mulf %27, %30 : vector<4x16x1xf32>
    %32 = vector.broadcast %31 : vector<4x16x1xf32> to vector<4x16x24xf32>
    %33 = arith.mulf %24, %32 : vector<4x16x24xf32>
    "tpu.trace_start"() <{level = 10 : i32, message = "hqk,hkd->hqd"}> : () -> ()
    %cst_12 = arith.constant dense<0.000000e+00> : vector<4x16x32xf32>
    %34 = tpu.matmul %33, %11, %cst_12 {dimension_numbers = #tpu.dot_dimension_numbers<[2], [1], [1], [2], [0, 0, 0, 1, 1, 2], [0], [0]>} : vector<4x16x24xf32>, vector<4x24x32xf32>, vector<4x16x32xf32> -> vector<4x16x32xf32>
    "tpu.trace_stop"() : () -> ()
    %35 = tpu.transpose %34, [1, 0, 2] : vector<4x16x32xf32> -> vector<16x4x32xf32>
    %36 = vector.shape_cast %35 : vector<16x4x32xf32> to vector<16x128xf32>
    %c0_13 = arith.constant 0 : index
    %c0_14 = arith.constant 0 : index
    %37 = vector.load %arg4[%c0_13, %c0_14] : memref<16x128xf32, #tpu.memory_space<vmem>>, vector<16x128xf32>
    tpu.vector_store %arg4[%c0_13, %c0_14], %36 {strides = array<i32>} : memref<16x128xf32, #tpu.memory_space<vmem>>, vector<16x128xf32>,
    return
  }
}

module attributes {stable_mosaic.version = 11 : i64} {
  func.func @_self_attn_postln_kernel(%arg0: i32, %arg1: memref<1x16x16xi32, #tpu.memory_space<vmem>>, %arg2: memref<1x16x128xf32, #tpu.memory_space<vmem>>, %arg3: memref<128x384xf32, #tpu.memory_space<vmem>>, %arg4: memref<1x384xf32, #tpu.memory_space<vmem>>, %arg5: memref<128x128xf32, #tpu.memory_space<vmem>>, %arg6: memref<1x128xf32, #tpu.memory_space<vmem>>, %arg7: memref<1x128xf32, #tpu.memory_space<vmem>>, %arg8: memref<1x128xf32, #tpu.memory_space<vmem>>, %arg9: memref<1x16x128xf32, #tpu.memory_space<vmem>>) attributes {dimension_semantics = [#tpu.dimension_semantics<parallel>], iteration_bounds = array<i64: 2>, scalar_prefetch = 0 : i64, scratch_operands = 0 : i64, tpu.core_type = #tpu.core_type<tc>, window_params = [{transform_indices = @transform_0, window_bounds = array<i64: 1, 16, 16>}, {transform_indices = @transform_1, window_bounds = array<i64: 1, 16, 128>}, {pipeline_mode = #tpu.pipeline_mode<synchronous>, transform_indices = @transform_2, window_bounds = array<i64: 128, 384>}, {pipeline_mode = #tpu.pipeline_mode<synchronous>, transform_indices = @transform_3, window_bounds = array<i64: 1, 384>}, {pipeline_mode = #tpu.pipeline_mode<synchronous>, transform_indices = @transform_4, window_bounds = array<i64: 128, 128>}, {pipeline_mode = #tpu.pipeline_mode<synchronous>, transform_indices = @transform_5, window_bounds = array<i64: 1, 128>}, {pipeline_mode = #tpu.pipeline_mode<synchronous>, transform_indices = @transform_6, window_bounds = array<i64: 1, 128>}, {pipeline_mode = #tpu.pipeline_mode<synchronous>, transform_indices = @transform_7, window_bounds = array<i64: 1, 128>}, {transform_indices = @transform_8, window_bounds = array<i64: 1, 16, 128>}]} {
    %c0 = arith.constant 0 : index
    %c0_0 = arith.constant 0 : index
    %c0_1 = arith.constant 0 : index
    %0 = vector.load %arg2[%c0, %c0_0, %c0_1] : memref<1x16x128xf32, #tpu.memory_space<vmem>>, vector<1x16x128xf32>
    %1 = vector.shape_cast %0 : vector<1x16x128xf32> to vector<16x128xf32>
    %c0_2 = arith.constant 0 : index
    %c0_3 = arith.constant 0 : index
    %2 = vector.load %arg3[%c0_2, %c0_3] : memref<128x384xf32, #tpu.memory_space<vmem>>, vector<128x384xf32>
    %cst = arith.constant dense<0.000000e+00> : vector<16x384xf32>
    %3 = tpu.matmul %1, %2, %cst {dimension_numbers = #tpu.dot_dimension_numbers<[1], [0], [0], [1], [0, 0, 1, 1], [], []>} : vector<16x128xf32>, vector<128x384xf32>, vector<16x384xf32> -> vector<16x384xf32>
    %c0_4 = arith.constant 0 : index
    %c0_5 = arith.constant 0 : index
    %4 = vector.load %arg4[%c0_4, %c0_5] : memref<1x384xf32, #tpu.memory_space<vmem>>, vector<1x384xf32>
    %5 = vector.broadcast %4 : vector<1x384xf32> to vector<16x384xf32>
    %6 = arith.addf %3, %5 : vector<16x384xf32>
    %7 = vector.extract_strided_slice %6 {offsets = [0, 0], sizes = [16, 128], strides = [1, 1]} : vector<16x384xf32> to vector<16x128xf32>
    %8 = vector.extract_strided_slice %6 {offsets = [0, 128], sizes = [16, 128], strides = [1, 1]} : vector<16x384xf32> to vector<16x128xf32>
    %9 = vector.extract_strided_slice %6 {offsets = [0, 256], sizes = [16, 128], strides = [1, 1]} : vector<16x384xf32> to vector<16x128xf32>
    %c0_6 = arith.constant 0 : index
    %c0_7 = arith.constant 0 : index
    %c0_8 = arith.constant 0 : index
    %10 = vector.load %arg1[%c0_6, %c0_7, %c0_8] : memref<1x16x16xi32, #tpu.memory_space<vmem>>, vector<1x16x16xi32>
    %11 = vector.shape_cast %10 : vector<1x16x16xi32> to vector<16x16xi32>
    %c0_i32 = arith.constant 0 : i32
    %12 = vector.broadcast %c0_i32 : i32 to vector<16x16xi32>
    %13 = arith.cmpi eq, %11, %12 : vector<16x16xi32>
    %cst_9 = arith.constant 0.176776692 : f32
    %14 = vector.broadcast %cst_9 : f32 to vector<16x128xf32>
    %15 = arith.mulf %7, %14 : vector<16x128xf32>
    %16 = vector.extract_strided_slice %15 {offsets = [0, 0], sizes = [16, 32], strides = [1, 1]} : vector<16x128xf32> to vector<16x32xf32>
    %17 = vector.extract_strided_slice %8 {offsets = [0, 0], sizes = [16, 32], strides = [1, 1]} : vector<16x128xf32> to vector<16x32xf32>
    %18 = vector.extract_strided_slice %9 {offsets = [0, 0], sizes = [16, 32], strides = [1, 1]} : vector<16x128xf32> to vector<16x32xf32>
    "tpu.trace_start"() <{level = 10 : i32, message = "qd,kd->qk"}> : () -> ()
    %cst_10 = arith.constant dense<0.000000e+00> : vector<16x16xf32>
    %19 = tpu.matmul %16, %17, %cst_10 {dimension_numbers = #tpu.dot_dimension_numbers<[1], [1], [0], [0], [0, 0, 1, 0], [], []>} : vector<16x32xf32>, vector<16x32xf32>, vector<16x16xf32> -> vector<16x16xf32>
    %cst_11 = arith.constant -3.276700e+04 : f32
    "tpu.trace_stop"() : () -> ()
    %20 = vector.broadcast %cst_11 : f32 to vector<16x16xf32>
    %21 = arith.select %13, %20, %19 : vector<16x16xi1>, vector<16x16xf32>
    %cst_12 = arith.constant dense<0xFF800000> : vector<16xf32>
    %22 = vector.multi_reduction <maximumf>, %21, %cst_12 [1] : vector<16x16xf32> to vector<16xf32>
    %23 = vector.shape_cast %22 : vector<16xf32> to vector<16x1xf32>
    %24 = vector.broadcast %23 : vector<16x1xf32> to vector<16x16xf32>
    %25 = arith.subf %21, %24 : vector<16x16xf32>
    %26 = math.exp %25 : vector<16x16xf32>
    %cst_13 = arith.constant dense<0.000000e+00> : vector<16xf32>
    %27 = vector.multi_reduction <add>, %26, %cst_13 [1] : vector<16x16xf32> to vector<16xf32>
    %28 = vector.shape_cast %27 : vector<16xf32> to vector<16x1xf32>
    %29 = tpu.reciprocal %28 {approx = true} : vector<16x1xf32> -> vector<16x1xf32>
    %30 = arith.mulf %28, %29 : vector<16x1xf32>
    %cst_14 = arith.constant 2.000000e+00 : f32
    %31 = vector.broadcast %cst_14 : f32 to vector<16x1xf32>
    %32 = arith.subf %31, %30 : vector<16x1xf32>
    %33 = arith.mulf %29, %32 : vector<16x1xf32>
    %34 = vector.broadcast %33 : vector<16x1xf32> to vector<16x16xf32>
    %35 = arith.mulf %26, %34 : vector<16x16xf32>
    %cst_15 = arith.constant dense<0.000000e+00> : vector<16x32xf32>
    %36 = tpu.matmul %35, %18, %cst_15 {dimension_numbers = #tpu.dot_dimension_numbers<[1], [0], [0], [1], [0, 0, 1, 1], [], []>} : vector<16x16xf32>, vector<16x32xf32>, vector<16x32xf32> -> vector<16x32xf32>
    %37 = vector.extract_strided_slice %15 {offsets = [0, 32], sizes = [16, 32], strides = [1, 1]} : vector<16x128xf32> to vector<16x32xf32>
    %38 = vector.extract_strided_slice %8 {offsets = [0, 32], sizes = [16, 32], strides = [1, 1]} : vector<16x128xf32> to vector<16x32xf32>
    %39 = vector.extract_strided_slice %9 {offsets = [0, 32], sizes = [16, 32], strides = [1, 1]} : vector<16x128xf32> to vector<16x32xf32>
    "tpu.trace_start"() <{level = 10 : i32, message = "qd,kd->qk"}> : () -> ()
    %cst_16 = arith.constant dense<0.000000e+00> : vector<16x16xf32>
    %40 = tpu.matmul %37, %38, %cst_16 {dimension_numbers = #tpu.dot_dimension_numbers<[1], [1], [0], [0], [0, 0, 1, 0], [], []>} : vector<16x32xf32>, vector<16x32xf32>, vector<16x16xf32> -> vector<16x16xf32>
    %cst_17 = arith.constant -3.276700e+04 : f32
    "tpu.trace_stop"() : () -> ()
    %41 = vector.broadcast %cst_17 : f32 to vector<16x16xf32>
    %42 = arith.select %13, %41, %40 : vector<16x16xi1>, vector<16x16xf32>
    %cst_18 = arith.constant dense<0xFF800000> : vector<16xf32>
    %43 = vector.multi_reduction <maximumf>, %42, %cst_18 [1] : vector<16x16xf32> to vector<16xf32>
    %44 = vector.shape_cast %43 : vector<16xf32> to vector<16x1xf32>
    %45 = vector.broadcast %44 : vector<16x1xf32> to vector<16x16xf32>
    %46 = arith.subf %42, %45 : vector<16x16xf32>
    %47 = math.exp %46 : vector<16x16xf32>
    %cst_19 = arith.constant dense<0.000000e+00> : vector<16xf32>
    %48 = vector.multi_reduction <add>, %47, %cst_19 [1] : vector<16x16xf32> to vector<16xf32>
    %49 = vector.shape_cast %48 : vector<16xf32> to vector<16x1xf32>
    %50 = tpu.reciprocal %49 {approx = true} : vector<16x1xf32> -> vector<16x1xf32>
    %51 = arith.mulf %49, %50 : vector<16x1xf32>
    %cst_20 = arith.constant 2.000000e+00 : f32
    %52 = vector.broadcast %cst_20 : f32 to vector<16x1xf32>
    %53 = arith.subf %52, %51 : vector<16x1xf32>
    %54 = arith.mulf %50, %53 : vector<16x1xf32>
    %55 = vector.broadcast %54 : vector<16x1xf32> to vector<16x16xf32>
    %56 = arith.mulf %47, %55 : vector<16x16xf32>
    %cst_21 = arith.constant dense<0.000000e+00> : vector<16x32xf32>
    %57 = tpu.matmul %56, %39, %cst_21 {dimension_numbers = #tpu.dot_dimension_numbers<[1], [0], [0], [1], [0, 0, 1, 1], [], []>} : vector<16x16xf32>, vector<16x32xf32>, vector<16x32xf32> -> vector<16x32xf32>
    %58 = vector.extract_strided_slice %15 {offsets = [0, 64], sizes = [16, 32], strides = [1, 1]} : vector<16x128xf32> to vector<16x32xf32>
    %59 = vector.extract_strided_slice %8 {offsets = [0, 64], sizes = [16, 32], strides = [1, 1]} : vector<16x128xf32> to vector<16x32xf32>
    %60 = vector.extract_strided_slice %9 {offsets = [0, 64], sizes = [16, 32], strides = [1, 1]} : vector<16x128xf32> to vector<16x32xf32>
    "tpu.trace_start"() <{level = 10 : i32, message = "qd,kd->qk"}> : () -> ()
    %cst_22 = arith.constant dense<0.000000e+00> : vector<16x16xf32>
    %61 = tpu.matmul %58, %59, %cst_22 {dimension_numbers = #tpu.dot_dimension_numbers<[1], [1], [0], [0], [0, 0, 1, 0], [], []>} : vector<16x32xf32>, vector<16x32xf32>, vector<16x16xf32> -> vector<16x16xf32>
    %cst_23 = arith.constant -3.276700e+04 : f32
    "tpu.trace_stop"() : () -> ()
    %62 = vector.broadcast %cst_23 : f32 to vector<16x16xf32>
    %63 = arith.select %13, %62, %61 : vector<16x16xi1>, vector<16x16xf32>
    %cst_24 = arith.constant dense<0xFF800000> : vector<16xf32>
    %64 = vector.multi_reduction <maximumf>, %63, %cst_24 [1] : vector<16x16xf32> to vector<16xf32>
    %65 = vector.shape_cast %64 : vector<16xf32> to vector<16x1xf32>
    %66 = vector.broadcast %65 : vector<16x1xf32> to vector<16x16xf32>
    %67 = arith.subf %63, %66 : vector<16x16xf32>
    %68 = math.exp %67 : vector<16x16xf32>
    %cst_25 = arith.constant dense<0.000000e+00> : vector<16xf32>
    %69 = vector.multi_reduction <add>, %68, %cst_25 [1] : vector<16x16xf32> to vector<16xf32>
    %70 = vector.shape_cast %69 : vector<16xf32> to vector<16x1xf32>
    %71 = tpu.reciprocal %70 {approx = true} : vector<16x1xf32> -> vector<16x1xf32>
    %72 = arith.mulf %70, %71 : vector<16x1xf32>
    %cst_26 = arith.constant 2.000000e+00 : f32
    %73 = vector.broadcast %cst_26 : f32 to vector<16x1xf32>
    %74 = arith.subf %73, %72 : vector<16x1xf32>
    %75 = arith.mulf %71, %74 : vector<16x1xf32>
    %76 = vector.broadcast %75 : vector<16x1xf32> to vector<16x16xf32>
    %77 = arith.mulf %68, %76 : vector<16x16xf32>
    %cst_27 = arith.constant dense<0.000000e+00> : vector<16x32xf32>
    %78 = tpu.matmul %77, %60, %cst_27 {dimension_numbers = #tpu.dot_dimension_numbers<[1], [0], [0], [1], [0, 0, 1, 1], [], []>} : vector<16x16xf32>, vector<16x32xf32>, vector<16x32xf32> -> vector<16x32xf32>
    %79 = vector.extract_strided_slice %15 {offsets = [0, 96], sizes = [16, 32], strides = [1, 1]} : vector<16x128xf32> to vector<16x32xf32>
    %80 = vector.extract_strided_slice %8 {offsets = [0, 96], sizes = [16, 32], strides = [1, 1]} : vector<16x128xf32> to vector<16x32xf32>
    %81 = vector.extract_strided_slice %9 {offsets = [0, 96], sizes = [16, 32], strides = [1, 1]} : vector<16x128xf32> to vector<16x32xf32>
    "tpu.trace_start"() <{level = 10 : i32, message = "qd,kd->qk"}> : () -> ()
    %cst_28 = arith.constant dense<0.000000e+00> : vector<16x16xf32>
    %82 = tpu.matmul %79, %80, %cst_28 {dimension_numbers = #tpu.dot_dimension_numbers<[1], [1], [0], [0], [0, 0, 1, 0], [], []>} : vector<16x32xf32>, vector<16x32xf32>, vector<16x16xf32> -> vector<16x16xf32>
    %cst_29 = arith.constant -3.276700e+04 : f32
    "tpu.trace_stop"() : () -> ()
    %83 = vector.broadcast %cst_29 : f32 to vector<16x16xf32>
    %84 = arith.select %13, %83, %82 : vector<16x16xi1>, vector<16x16xf32>
    %cst_30 = arith.constant dense<0xFF800000> : vector<16xf32>
    %85 = vector.multi_reduction <maximumf>, %84, %cst_30 [1] : vector<16x16xf32> to vector<16xf32>
    %86 = vector.shape_cast %85 : vector<16xf32> to vector<16x1xf32>
    %87 = vector.broadcast %86 : vector<16x1xf32> to vector<16x16xf32>
    %88 = arith.subf %84, %87 : vector<16x16xf32>
    %89 = math.exp %88 : vector<16x16xf32>
    %cst_31 = arith.constant dense<0.000000e+00> : vector<16xf32>
    %90 = vector.multi_reduction <add>, %89, %cst_31 [1] : vector<16x16xf32> to vector<16xf32>
    %91 = vector.shape_cast %90 : vector<16xf32> to vector<16x1xf32>
    %92 = tpu.reciprocal %91 {approx = true} : vector<16x1xf32> -> vector<16x1xf32>
    %93 = arith.mulf %91, %92 : vector<16x1xf32>
    %cst_32 = arith.constant 2.000000e+00 : f32
    %94 = vector.broadcast %cst_32 : f32 to vector<16x1xf32>
    %95 = arith.subf %94, %93 : vector<16x1xf32>
    %96 = arith.mulf %92, %95 : vector<16x1xf32>
    %97 = vector.broadcast %96 : vector<16x1xf32> to vector<16x16xf32>
    %98 = arith.mulf %89, %97 : vector<16x16xf32>
    %cst_33 = arith.constant dense<0.000000e+00> : vector<16x32xf32>
    %99 = tpu.matmul %98, %81, %cst_33 {dimension_numbers = #tpu.dot_dimension_numbers<[1], [0], [0], [1], [0, 0, 1, 1], [], []>} : vector<16x16xf32>, vector<16x32xf32>, vector<16x32xf32> -> vector<16x32xf32>
    %100 = tpu.concatenate %36, %57, %78, %99 in 1 : vector<16x32xf32>, vector<16x32xf32>, vector<16x32xf32>, vector<16x32xf32> -> vector<16x128xf32>
    %c0_34 = arith.constant 0 : index
    %c0_35 = arith.constant 0 : index
    %101 = vector.load %arg5[%c0_34, %c0_35] : memref<128x128xf32, #tpu.memory_space<vmem>>, vector<128x128xf32>
    %cst_36 = arith.constant dense<0.000000e+00> : vector<16x128xf32>
    %102 = tpu.matmul %100, %101, %cst_36 {dimension_numbers = #tpu.dot_dimension_numbers<[1], [0], [0], [1], [0, 0, 1, 1], [], []>} : vector<16x128xf32>, vector<128x128xf32>, vector<16x128xf32> -> vector<16x128xf32>
    %c0_37 = arith.constant 0 : index
    %c0_38 = arith.constant 0 : index
    %103 = vector.load %arg6[%c0_37, %c0_38] : memref<1x128xf32, #tpu.memory_space<vmem>>, vector<1x128xf32>
    %104 = vector.broadcast %103 : vector<1x128xf32> to vector<16x128xf32>
    %105 = arith.addf %102, %104 : vector<16x128xf32>
    %c0_39 = arith.constant 0 : index
    %c0_40 = arith.constant 0 : index
    %106 = vector.load %arg7[%c0_39, %c0_40] : memref<1x128xf32, #tpu.memory_space<vmem>>, vector<1x128xf32>
    %c0_41 = arith.constant 0 : index
    %c0_42 = arith.constant 0 : index
    %107 = vector.load %arg8[%c0_41, %c0_42] : memref<1x128xf32, #tpu.memory_space<vmem>>, vector<1x128xf32>
    %108 = arith.addf %1, %105 : vector<16x128xf32>
    %cst_43 = arith.constant dense<0.000000e+00> : vector<16xf32>
    %109 = vector.multi_reduction <add>, %108, %cst_43 [1] : vector<16x128xf32> to vector<16xf32>
    %110 = vector.shape_cast %109 : vector<16xf32> to vector<16x1xf32>
    %cst_44 = arith.constant 1.280000e+02 : f32
    %111 = vector.broadcast %cst_44 : f32 to vector<16x1xf32>
    %112 = arith.divf %110, %111 : vector<16x1xf32>
    %113 = vector.broadcast %112 : vector<16x1xf32> to vector<16x128xf32>
    %114 = arith.subf %108, %113 : vector<16x128xf32>
    %115 = vector.broadcast %112 : vector<16x1xf32> to vector<16x128xf32>
    %116 = arith.subf %108, %115 : vector<16x128xf32>
    %117 = arith.mulf %114, %116 : vector<16x128xf32>
    %cst_45 = arith.constant dense<0.000000e+00> : vector<16xf32>
    %118 = vector.multi_reduction <add>, %117, %cst_45 [1] : vector<16x128xf32> to vector<16xf32>
    %119 = vector.shape_cast %118 : vector<16xf32> to vector<16x1xf32>
    %cst_46 = arith.constant 1.280000e+02 : f32
    %120 = vector.broadcast %cst_46 : f32 to vector<16x1xf32>
    %121 = arith.divf %119, %120 : vector<16x1xf32>
    %122 = vector.broadcast %112 : vector<16x1xf32> to vector<16x128xf32>
    %123 = arith.subf %108, %122 : vector<16x128xf32>
    %cst_47 = arith.constant 9.99999974E-6 : f32
    %124 = vector.broadcast %cst_47 : f32 to vector<16x1xf32>
    %125 = arith.addf %121, %124 : vector<16x1xf32>
    %126 = math.rsqrt %125 : vector<16x1xf32>
    %127 = vector.broadcast %126 : vector<16x1xf32> to vector<16x128xf32>
    %128 = arith.mulf %123, %127 : vector<16x128xf32>
    %129 = vector.broadcast %106 : vector<1x128xf32> to vector<16x128xf32>
    %130 = arith.mulf %128, %129 : vector<16x128xf32>
    %131 = vector.broadcast %107 : vector<1x128xf32> to vector<16x128xf32>
    %132 = arith.addf %130, %131 : vector<16x128xf32>
    %c0_48 = arith.constant 0 : index
    %c0_49 = arith.constant 0 : index
    %c0_50 = arith.constant 0 : index
    %133 = vector.load %arg9[%c0_48, %c0_49, %c0_50] : memref<1x16x128xf32, #tpu.memory_space<vmem>>, vector<1x16x128xf32>
    %134 = vector.shape_cast %133 : vector<1x16x128xf32> to vector<16x128xf32>
    %135 = vector.shape_cast %132 : vector<16x128xf32> to vector<1x16x128xf32>
    tpu.vector_store %arg9[%c0_48, %c0_49, %c0_50], %135 {strides = array<i32>} : memref<1x16x128xf32, #tpu.memory_space<vmem>>, vector<1x16x128xf32>,
    return
  }
  func.func @transform_0(%arg0: i32) -> (i32, i32, i32) {
    %c0_i32 = arith.constant 0 : i32
    %c0_i32_0 = arith.constant 0 : i32
    %c0_i32_1 = arith.constant 0 : i32
    return %arg0, %c0_i32, %c0_i32_0 : i32, i32, i32
  }
  func.func @transform_1(%arg0: i32) -> (i32, i32, i32) {
    %c0_i32 = arith.constant 0 : i32
    %c0_i32_0 = arith.constant 0 : i32
    %c0_i32_1 = arith.constant 0 : i32
    return %arg0, %c0_i32, %c0_i32_0 : i32, i32, i32
  }
  func.func @transform_2(%arg0: i32) -> (i32, i32) {
    %c0_i32 = arith.constant 0 : i32
    %c0_i32_0 = arith.constant 0 : i32
    %c0_i32_1 = arith.constant 0 : i32
    return %c0_i32, %c0_i32_0 : i32, i32
  }
  func.func @transform_3(%arg0: i32) -> (i32, i32) {
    %c0_i32 = arith.constant 0 : i32
    %c0_i32_0 = arith.constant 0 : i32
    %c0_i32_1 = arith.constant 0 : i32
    return %c0_i32, %c0_i32_0 : i32, i32
  }
  func.func @transform_4(%arg0: i32) -> (i32, i32) {
    %c0_i32 = arith.constant 0 : i32
    %c0_i32_0 = arith.constant 0 : i32
    %c0_i32_1 = arith.constant 0 : i32
    return %c0_i32, %c0_i32_0 : i32, i32
  }
  func.func @transform_5(%arg0: i32) -> (i32, i32) {
    %c0_i32 = arith.constant 0 : i32
    %c0_i32_0 = arith.constant 0 : i32
    %c0_i32_1 = arith.constant 0 : i32
    return %c0_i32, %c0_i32_0 : i32, i32
  }
  func.func @transform_6(%arg0: i32) -> (i32, i32) {
    %c0_i32 = arith.constant 0 : i32
    %c0_i32_0 = arith.constant 0 : i32
    %c0_i32_1 = arith.constant 0 : i32
    return %c0_i32, %c0_i32_0 : i32, i32
  }
  func.func @transform_7(%arg0: i32) -> (i32, i32) {
    %c0_i32 = arith.constant 0 : i32
    %c0_i32_0 = arith.constant 0 : i32
    %c0_i32_1 = arith.constant 0 : i32
    return %c0_i32, %c0_i32_0 : i32, i32
  }
  func.func @transform_8(%arg0: i32) -> (i32, i32, i32) {
    %c0_i32 = arith.constant 0 : i32
    %c0_i32_0 = arith.constant 0 : i32
    %c0_i32_1 = arith.constant 0 : i32
    return %arg0, %c0_i32, %c0_i32_0 : i32, i32, i32
  }
}

module attributes {stable_mosaic.version = 11 : i64} {
  func.func @_cross_attn_ffn_kernel(%arg0: i32, %arg1: memref<1x16x24xi32, #tpu.memory_space<vmem>>, %arg2: memref<1x16x128xf32, #tpu.memory_space<vmem>>, %arg3: memref<1x24x128xf32, #tpu.memory_space<vmem>>, %arg4: memref<1x24x128xf32, #tpu.memory_space<vmem>>, %arg5: memref<128x128xf32, #tpu.memory_space<vmem>>, %arg6: memref<1x128xf32, #tpu.memory_space<vmem>>, %arg7: memref<128x128xf32, #tpu.memory_space<vmem>>, %arg8: memref<1x128xf32, #tpu.memory_space<vmem>>, %arg9: memref<128x128xf32, #tpu.memory_space<vmem>>, %arg10: memref<1x128xf32, #tpu.memory_space<vmem>>, %arg11: memref<128x128xf32, #tpu.memory_space<vmem>>, %arg12: memref<1x128xf32, #tpu.memory_space<vmem>>, %arg13: memref<1x128xf32, #tpu.memory_space<vmem>>, %arg14: memref<1x128xf32, #tpu.memory_space<vmem>>, %arg15: memref<1x128xf32, #tpu.memory_space<vmem>>, %arg16: memref<1x128xf32, #tpu.memory_space<vmem>>, %arg17: memref<128x512xf32, #tpu.memory_space<vmem>>, %arg18: memref<1x512xf32, #tpu.memory_space<vmem>>, %arg19: memref<512x128xf32, #tpu.memory_space<vmem>>, %arg20: memref<1x128xf32, #tpu.memory_space<vmem>>, %arg21: memref<1x16x128xf32, #tpu.memory_space<vmem>>) attributes {dimension_semantics = [#tpu.dimension_semantics<parallel>], iteration_bounds = array<i64: 2>, scalar_prefetch = 0 : i64, scratch_operands = 0 : i64, tpu.core_type = #tpu.core_type<tc>, window_params = [{transform_indices = @transform_0, window_bounds = array<i64: 1, 16, 24>}, {transform_indices = @transform_1, window_bounds = array<i64: 1, 16, 128>}, {transform_indices = @transform_2, window_bounds = array<i64: 1, 24, 128>}, {transform_indices = @transform_3, window_bounds = array<i64: 1, 24, 128>}, {pipeline_mode = #tpu.pipeline_mode<synchronous>, transform_indices = @transform_4, window_bounds = array<i64: 128, 128>}, {pipeline_mode = #tpu.pipeline_mode<synchronous>, transform_indices = @transform_5, window_bounds = array<i64: 1, 128>}, {pipeline_mode = #tpu.pipeline_mode<synchronous>, transform_indices = @transform_6, window_bounds = array<i64: 128, 128>}, {pipeline_mode = #tpu.pipeline_mode<synchronous>, transform_indices = @transform_7, window_bounds = array<i64: 1, 128>}, {pipeline_mode = #tpu.pipeline_mode<synchronous>, transform_indices = @transform_8, window_bounds = array<i64: 128, 128>}, {pipeline_mode = #tpu.pipeline_mode<synchronous>, transform_indices = @transform_9, window_bounds = array<i64: 1, 128>}, {pipeline_mode = #tpu.pipeline_mode<synchronous>, transform_indices = @transform_10, window_bounds = array<i64: 128, 128>}, {pipeline_mode = #tpu.pipeline_mode<synchronous>, transform_indices = @transform_11, window_bounds = array<i64: 1, 128>}, {pipeline_mode = #tpu.pipeline_mode<synchronous>, transform_indices = @transform_12, window_bounds = array<i64: 1, 128>}, {pipeline_mode = #tpu.pipeline_mode<synchronous>, transform_indices = @transform_13, window_bounds = array<i64: 1, 128>}, {pipeline_mode = #tpu.pipeline_mode<synchronous>, transform_indices = @transform_14, window_bounds = array<i64: 1, 128>}, {pipeline_mode = #tpu.pipeline_mode<synchronous>, transform_indices = @transform_15, window_bounds = array<i64: 1, 128>}, {pipeline_mode = #tpu.pipeline_mode<synchronous>, transform_indices = @transform_16, window_bounds = array<i64: 128, 512>}, {pipeline_mode = #tpu.pipeline_mode<synchronous>, transform_indices = @transform_17, window_bounds = array<i64: 1, 512>}, {pipeline_mode = #tpu.pipeline_mode<synchronous>, transform_indices = @transform_18, window_bounds = array<i64: 512, 128>}, {pipeline_mode = #tpu.pipeline_mode<synchronous>, transform_indices = @transform_19, window_bounds = array<i64: 1, 128>}, {transform_indices = @transform_20, window_bounds = array<i64: 1, 16, 128>}]} {
    %c0 = arith.constant 0 : index
    %c0_0 = arith.constant 0 : index
    %c0_1 = arith.constant 0 : index
    %0 = vector.load %arg2[%c0, %c0_0, %c0_1] : memref<1x16x128xf32, #tpu.memory_space<vmem>>, vector<1x16x128xf32>
    %1 = vector.shape_cast %0 : vector<1x16x128xf32> to vector<16x128xf32>
    %c0_2 = arith.constant 0 : index
    %c0_3 = arith.constant 0 : index
    %2 = vector.load %arg5[%c0_2, %c0_3] : memref<128x128xf32, #tpu.memory_space<vmem>>, vector<128x128xf32>
    %cst = arith.constant dense<0.000000e+00> : vector<16x128xf32>
    %3 = tpu.matmul %1, %2, %cst {dimension_numbers = #tpu.dot_dimension_numbers<[1], [0], [0], [1], [0, 0, 1, 1], [], []>} : vector<16x128xf32>, vector<128x128xf32>, vector<16x128xf32> -> vector<16x128xf32>
    %c0_4 = arith.constant 0 : index
    %c0_5 = arith.constant 0 : index
    %4 = vector.load %arg6[%c0_4, %c0_5] : memref<1x128xf32, #tpu.memory_space<vmem>>, vector<1x128xf32>
    %5 = vector.broadcast %4 : vector<1x128xf32> to vector<16x128xf32>
    %6 = arith.addf %3, %5 : vector<16x128xf32>
    %c0_6 = arith.constant 0 : index
    %c0_7 = arith.constant 0 : index
    %c0_8 = arith.constant 0 : index
    %7 = vector.load %arg3[%c0_6, %c0_7, %c0_8] : memref<1x24x128xf32, #tpu.memory_space<vmem>>, vector<1x24x128xf32>
    %8 = vector.shape_cast %7 : vector<1x24x128xf32> to vector<24x128xf32>
    %c0_9 = arith.constant 0 : index
    %c0_10 = arith.constant 0 : index
    %9 = vector.load %arg7[%c0_9, %c0_10] : memref<128x128xf32, #tpu.memory_space<vmem>>, vector<128x128xf32>
    %cst_11 = arith.constant dense<0.000000e+00> : vector<24x128xf32>
    %10 = tpu.matmul %8, %9, %cst_11 {dimension_numbers = #tpu.dot_dimension_numbers<[1], [0], [0], [1], [0, 0, 1, 1], [], []>} : vector<24x128xf32>, vector<128x128xf32>, vector<24x128xf32> -> vector<24x128xf32>
    %c0_12 = arith.constant 0 : index
    %c0_13 = arith.constant 0 : index
    %11 = vector.load %arg8[%c0_12, %c0_13] : memref<1x128xf32, #tpu.memory_space<vmem>>, vector<1x128xf32>
    %12 = vector.broadcast %11 : vector<1x128xf32> to vector<24x128xf32>
    %13 = arith.addf %10, %12 : vector<24x128xf32>
    %c0_14 = arith.constant 0 : index
    %c0_15 = arith.constant 0 : index
    %c0_16 = arith.constant 0 : index
    %14 = vector.load %arg4[%c0_14, %c0_15, %c0_16] : memref<1x24x128xf32, #tpu.memory_space<vmem>>, vector<1x24x128xf32>
    %15 = vector.shape_cast %14 : vector<1x24x128xf32> to vector<24x128xf32>
    %c0_17 = arith.constant 0 : index
    %c0_18 = arith.constant 0 : index
    %16 = vector.load %arg9[%c0_17, %c0_18] : memref<128x128xf32, #tpu.memory_space<vmem>>, vector<128x128xf32>
    %cst_19 = arith.constant dense<0.000000e+00> : vector<24x128xf32>
    %17 = tpu.matmul %15, %16, %cst_19 {dimension_numbers = #tpu.dot_dimension_numbers<[1], [0], [0], [1], [0, 0, 1, 1], [], []>} : vector<24x128xf32>, vector<128x128xf32>, vector<24x128xf32> -> vector<24x128xf32>
    %c0_20 = arith.constant 0 : index
    %c0_21 = arith.constant 0 : index
    %18 = vector.load %arg10[%c0_20, %c0_21] : memref<1x128xf32, #tpu.memory_space<vmem>>, vector<1x128xf32>
    %19 = vector.broadcast %18 : vector<1x128xf32> to vector<24x128xf32>
    %20 = arith.addf %17, %19 : vector<24x128xf32>
    %c0_22 = arith.constant 0 : index
    %c0_23 = arith.constant 0 : index
    %c0_24 = arith.constant 0 : index
    %21 = vector.load %arg1[%c0_22, %c0_23, %c0_24] : memref<1x16x24xi32, #tpu.memory_space<vmem>>, vector<1x16x24xi32>
    %22 = vector.shape_cast %21 : vector<1x16x24xi32> to vector<16x24xi32>
    %c0_i32 = arith.constant 0 : i32
    %23 = vector.broadcast %c0_i32 : i32 to vector<16x24xi32>
    %24 = arith.cmpi eq, %22, %23 : vector<16x24xi32>
    %cst_25 = arith.constant 0.176776692 : f32
    %25 = vector.broadcast %cst_25 : f32 to vector<16x128xf32>
    %26 = arith.mulf %6, %25 : vector<16x128xf32>
    %27 = vector.extract_strided_slice %26 {offsets = [0, 0], sizes = [16, 32], strides = [1, 1]} : vector<16x128xf32> to vector<16x32xf32>
    %28 = vector.extract_strided_slice %13 {offsets = [0, 0], sizes = [24, 32], strides = [1, 1]} : vector<24x128xf32> to vector<24x32xf32>
    %29 = vector.extract_strided_slice %20 {offsets = [0, 0], sizes = [24, 32], strides = [1, 1]} : vector<24x128xf32> to vector<24x32xf32>
    "tpu.trace_start"() <{level = 10 : i32, message = "qd,kd->qk"}> : () -> ()
    %cst_26 = arith.constant dense<0.000000e+00> : vector<16x24xf32>
    %30 = tpu.matmul %27, %28, %cst_26 {dimension_numbers = #tpu.dot_dimension_numbers<[1], [1], [0], [0], [0, 0, 1, 0], [], []>} : vector<16x32xf32>, vector<24x32xf32>, vector<16x24xf32> -> vector<16x24xf32>
    %cst_27 = arith.constant -3.276700e+04 : f32
    "tpu.trace_stop"() : () -> ()
    %31 = vector.broadcast %cst_27 : f32 to vector<16x24xf32>
    %32 = arith.select %24, %31, %30 : vector<16x24xi1>, vector<16x24xf32>
    %cst_28 = arith.constant dense<0xFF800000> : vector<16xf32>
    %33 = vector.multi_reduction <maximumf>, %32, %cst_28 [1] : vector<16x24xf32> to vector<16xf32>
    %34 = vector.shape_cast %33 : vector<16xf32> to vector<16x1xf32>
    %35 = vector.broadcast %34 : vector<16x1xf32> to vector<16x24xf32>
    %36 = arith.subf %32, %35 : vector<16x24xf32>
    %37 = math.exp %36 : vector<16x24xf32>
    %cst_29 = arith.constant dense<0.000000e+00> : vector<16xf32>
    %38 = vector.multi_reduction <add>, %37, %cst_29 [1] : vector<16x24xf32> to vector<16xf32>
    %39 = vector.shape_cast %38 : vector<16xf32> to vector<16x1xf32>
    %40 = tpu.reciprocal %39 {approx = true} : vector<16x1xf32> -> vector<16x1xf32>
    %41 = arith.mulf %39, %40 : vector<16x1xf32>
    %cst_30 = arith.constant 2.000000e+00 : f32
    %42 = vector.broadcast %cst_30 : f32 to vector<16x1xf32>
    %43 = arith.subf %42, %41 : vector<16x1xf32>
    %44 = arith.mulf %40, %43 : vector<16x1xf32>
    %45 = vector.broadcast %44 : vector<16x1xf32> to vector<16x24xf32>
    %46 = arith.mulf %37, %45 : vector<16x24xf32>
    %cst_31 = arith.constant dense<0.000000e+00> : vector<16x32xf32>
    %47 = tpu.matmul %46, %29, %cst_31 {dimension_numbers = #tpu.dot_dimension_numbers<[1], [0], [0], [1], [0, 0, 1, 1], [], []>} : vector<16x24xf32>, vector<24x32xf32>, vector<16x32xf32> -> vector<16x32xf32>
    %48 = vector.extract_strided_slice %26 {offsets = [0, 32], sizes = [16, 32], strides = [1, 1]} : vector<16x128xf32> to vector<16x32xf32>
    %49 = vector.extract_strided_slice %13 {offsets = [0, 32], sizes = [24, 32], strides = [1, 1]} : vector<24x128xf32> to vector<24x32xf32>
    %50 = vector.extract_strided_slice %20 {offsets = [0, 32], sizes = [24, 32], strides = [1, 1]} : vector<24x128xf32> to vector<24x32xf32>
    "tpu.trace_start"() <{level = 10 : i32, message = "qd,kd->qk"}> : () -> ()
    %cst_32 = arith.constant dense<0.000000e+00> : vector<16x24xf32>
    %51 = tpu.matmul %48, %49, %cst_32 {dimension_numbers = #tpu.dot_dimension_numbers<[1], [1], [0], [0], [0, 0, 1, 0], [], []>} : vector<16x32xf32>, vector<24x32xf32>, vector<16x24xf32> -> vector<16x24xf32>
    %cst_33 = arith.constant -3.276700e+04 : f32
    "tpu.trace_stop"() : () -> ()
    %52 = vector.broadcast %cst_33 : f32 to vector<16x24xf32>
    %53 = arith.select %24, %52, %51 : vector<16x24xi1>, vector<16x24xf32>
    %cst_34 = arith.constant dense<0xFF800000> : vector<16xf32>
    %54 = vector.multi_reduction <maximumf>, %53, %cst_34 [1] : vector<16x24xf32> to vector<16xf32>
    %55 = vector.shape_cast %54 : vector<16xf32> to vector<16x1xf32>
    %56 = vector.broadcast %55 : vector<16x1xf32> to vector<16x24xf32>
    %57 = arith.subf %53, %56 : vector<16x24xf32>
    %58 = math.exp %57 : vector<16x24xf32>
    %cst_35 = arith.constant dense<0.000000e+00> : vector<16xf32>
    %59 = vector.multi_reduction <add>, %58, %cst_35 [1] : vector<16x24xf32> to vector<16xf32>
    %60 = vector.shape_cast %59 : vector<16xf32> to vector<16x1xf32>
    %61 = tpu.reciprocal %60 {approx = true} : vector<16x1xf32> -> vector<16x1xf32>
    %62 = arith.mulf %60, %61 : vector<16x1xf32>
    %cst_36 = arith.constant 2.000000e+00 : f32
    %63 = vector.broadcast %cst_36 : f32 to vector<16x1xf32>
    %64 = arith.subf %63, %62 : vector<16x1xf32>
    %65 = arith.mulf %61, %64 : vector<16x1xf32>
    %66 = vector.broadcast %65 : vector<16x1xf32> to vector<16x24xf32>
    %67 = arith.mulf %58, %66 : vector<16x24xf32>
    %cst_37 = arith.constant dense<0.000000e+00> : vector<16x32xf32>
    %68 = tpu.matmul %67, %50, %cst_37 {dimension_numbers = #tpu.dot_dimension_numbers<[1], [0], [0], [1], [0, 0, 1, 1], [], []>} : vector<16x24xf32>, vector<24x32xf32>, vector<16x32xf32> -> vector<16x32xf32>
    %69 = vector.extract_strided_slice %26 {offsets = [0, 64], sizes = [16, 32], strides = [1, 1]} : vector<16x128xf32> to vector<16x32xf32>
    %70 = vector.extract_strided_slice %13 {offsets = [0, 64], sizes = [24, 32], strides = [1, 1]} : vector<24x128xf32> to vector<24x32xf32>
    %71 = vector.extract_strided_slice %20 {offsets = [0, 64], sizes = [24, 32], strides = [1, 1]} : vector<24x128xf32> to vector<24x32xf32>
    "tpu.trace_start"() <{level = 10 : i32, message = "qd,kd->qk"}> : () -> ()
    %cst_38 = arith.constant dense<0.000000e+00> : vector<16x24xf32>
    %72 = tpu.matmul %69, %70, %cst_38 {dimension_numbers = #tpu.dot_dimension_numbers<[1], [1], [0], [0], [0, 0, 1, 0], [], []>} : vector<16x32xf32>, vector<24x32xf32>, vector<16x24xf32> -> vector<16x24xf32>
    %cst_39 = arith.constant -3.276700e+04 : f32
    "tpu.trace_stop"() : () -> ()
    %73 = vector.broadcast %cst_39 : f32 to vector<16x24xf32>
    %74 = arith.select %24, %73, %72 : vector<16x24xi1>, vector<16x24xf32>
    %cst_40 = arith.constant dense<0xFF800000> : vector<16xf32>
    %75 = vector.multi_reduction <maximumf>, %74, %cst_40 [1] : vector<16x24xf32> to vector<16xf32>
    %76 = vector.shape_cast %75 : vector<16xf32> to vector<16x1xf32>
    %77 = vector.broadcast %76 : vector<16x1xf32> to vector<16x24xf32>
    %78 = arith.subf %74, %77 : vector<16x24xf32>
    %79 = math.exp %78 : vector<16x24xf32>
    %cst_41 = arith.constant dense<0.000000e+00> : vector<16xf32>
    %80 = vector.multi_reduction <add>, %79, %cst_41 [1] : vector<16x24xf32> to vector<16xf32>
    %81 = vector.shape_cast %80 : vector<16xf32> to vector<16x1xf32>
    %82 = tpu.reciprocal %81 {approx = true} : vector<16x1xf32> -> vector<16x1xf32>
    %83 = arith.mulf %81, %82 : vector<16x1xf32>
    %cst_42 = arith.constant 2.000000e+00 : f32
    %84 = vector.broadcast %cst_42 : f32 to vector<16x1xf32>
    %85 = arith.subf %84, %83 : vector<16x1xf32>
    %86 = arith.mulf %82, %85 : vector<16x1xf32>
    %87 = vector.broadcast %86 : vector<16x1xf32> to vector<16x24xf32>
    %88 = arith.mulf %79, %87 : vector<16x24xf32>
    %cst_43 = arith.constant dense<0.000000e+00> : vector<16x32xf32>
    %89 = tpu.matmul %88, %71, %cst_43 {dimension_numbers = #tpu.dot_dimension_numbers<[1], [0], [0], [1], [0, 0, 1, 1], [], []>} : vector<16x24xf32>, vector<24x32xf32>, vector<16x32xf32> -> vector<16x32xf32>
    %90 = vector.extract_strided_slice %26 {offsets = [0, 96], sizes = [16, 32], strides = [1, 1]} : vector<16x128xf32> to vector<16x32xf32>
    %91 = vector.extract_strided_slice %13 {offsets = [0, 96], sizes = [24, 32], strides = [1, 1]} : vector<24x128xf32> to vector<24x32xf32>
    %92 = vector.extract_strided_slice %20 {offsets = [0, 96], sizes = [24, 32], strides = [1, 1]} : vector<24x128xf32> to vector<24x32xf32>
    "tpu.trace_start"() <{level = 10 : i32, message = "qd,kd->qk"}> : () -> ()
    %cst_44 = arith.constant dense<0.000000e+00> : vector<16x24xf32>
    %93 = tpu.matmul %90, %91, %cst_44 {dimension_numbers = #tpu.dot_dimension_numbers<[1], [1], [0], [0], [0, 0, 1, 0], [], []>} : vector<16x32xf32>, vector<24x32xf32>, vector<16x24xf32> -> vector<16x24xf32>
    %cst_45 = arith.constant -3.276700e+04 : f32
    "tpu.trace_stop"() : () -> ()
    %94 = vector.broadcast %cst_45 : f32 to vector<16x24xf32>
    %95 = arith.select %24, %94, %93 : vector<16x24xi1>, vector<16x24xf32>
    %cst_46 = arith.constant dense<0xFF800000> : vector<16xf32>
    %96 = vector.multi_reduction <maximumf>, %95, %cst_46 [1] : vector<16x24xf32> to vector<16xf32>
    %97 = vector.shape_cast %96 : vector<16xf32> to vector<16x1xf32>
    %98 = vector.broadcast %97 : vector<16x1xf32> to vector<16x24xf32>
    %99 = arith.subf %95, %98 : vector<16x24xf32>
    %100 = math.exp %99 : vector<16x24xf32>
    %cst_47 = arith.constant dense<0.000000e+00> : vector<16xf32>
    %101 = vector.multi_reduction <add>, %100, %cst_47 [1] : vector<16x24xf32> to vector<16xf32>
    %102 = vector.shape_cast %101 : vector<16xf32> to vector<16x1xf32>
    %103 = tpu.reciprocal %102 {approx = true} : vector<16x1xf32> -> vector<16x1xf32>
    %104 = arith.mulf %102, %103 : vector<16x1xf32>
    %cst_48 = arith.constant 2.000000e+00 : f32
    %105 = vector.broadcast %cst_48 : f32 to vector<16x1xf32>
    %106 = arith.subf %105, %104 : vector<16x1xf32>
    %107 = arith.mulf %103, %106 : vector<16x1xf32>
    %108 = vector.broadcast %107 : vector<16x1xf32> to vector<16x24xf32>
    %109 = arith.mulf %100, %108 : vector<16x24xf32>
    %cst_49 = arith.constant dense<0.000000e+00> : vector<16x32xf32>
    %110 = tpu.matmul %109, %92, %cst_49 {dimension_numbers = #tpu.dot_dimension_numbers<[1], [0], [0], [1], [0, 0, 1, 1], [], []>} : vector<16x24xf32>, vector<24x32xf32>, vector<16x32xf32> -> vector<16x32xf32>
    %111 = tpu.concatenate %47, %68, %89, %110 in 1 : vector<16x32xf32>, vector<16x32xf32>, vector<16x32xf32>, vector<16x32xf32> -> vector<16x128xf32>
    %c0_50 = arith.constant 0 : index
    %c0_51 = arith.constant 0 : index
    %112 = vector.load %arg11[%c0_50, %c0_51] : memref<128x128xf32, #tpu.memory_space<vmem>>, vector<128x128xf32>
    %cst_52 = arith.constant dense<0.000000e+00> : vector<16x128xf32>
    %113 = tpu.matmul %111, %112, %cst_52 {dimension_numbers = #tpu.dot_dimension_numbers<[1], [0], [0], [1], [0, 0, 1, 1], [], []>} : vector<16x128xf32>, vector<128x128xf32>, vector<16x128xf32> -> vector<16x128xf32>
    %c0_53 = arith.constant 0 : index
    %c0_54 = arith.constant 0 : index
    %114 = vector.load %arg12[%c0_53, %c0_54] : memref<1x128xf32, #tpu.memory_space<vmem>>, vector<1x128xf32>
    %115 = vector.broadcast %114 : vector<1x128xf32> to vector<16x128xf32>
    %116 = arith.addf %113, %115 : vector<16x128xf32>
    %c0_55 = arith.constant 0 : index
    %c0_56 = arith.constant 0 : index
    %117 = vector.load %arg13[%c0_55, %c0_56] : memref<1x128xf32, #tpu.memory_space<vmem>>, vector<1x128xf32>
    %c0_57 = arith.constant 0 : index
    %c0_58 = arith.constant 0 : index
    %118 = vector.load %arg14[%c0_57, %c0_58] : memref<1x128xf32, #tpu.memory_space<vmem>>, vector<1x128xf32>
    %c0_59 = arith.constant 0 : index
    %c0_60 = arith.constant 0 : index
    %119 = vector.load %arg15[%c0_59, %c0_60] : memref<1x128xf32, #tpu.memory_space<vmem>>, vector<1x128xf32>
    %c0_61 = arith.constant 0 : index
    %c0_62 = arith.constant 0 : index
    %120 = vector.load %arg16[%c0_61, %c0_62] : memref<1x128xf32, #tpu.memory_space<vmem>>, vector<1x128xf32>
    %121 = arith.addf %1, %116 : vector<16x128xf32>
    %cst_63 = arith.constant dense<0.000000e+00> : vector<16xf32>
    %122 = vector.multi_reduction <add>, %121, %cst_63 [1] : vector<16x128xf32> to vector<16xf32>
    %123 = vector.shape_cast %122 : vector<16xf32> to vector<16x1xf32>
    %cst_64 = arith.constant 1.280000e+02 : f32
    %124 = vector.broadcast %cst_64 : f32 to vector<16x1xf32>
    %125 = arith.divf %123, %124 : vector<16x1xf32>
    %126 = vector.broadcast %125 : vector<16x1xf32> to vector<16x128xf32>
    %127 = arith.subf %121, %126 : vector<16x128xf32>
    %128 = vector.broadcast %125 : vector<16x1xf32> to vector<16x128xf32>
    %129 = arith.subf %121, %128 : vector<16x128xf32>
    %130 = arith.mulf %127, %129 : vector<16x128xf32>
    %cst_65 = arith.constant dense<0.000000e+00> : vector<16xf32>
    %131 = vector.multi_reduction <add>, %130, %cst_65 [1] : vector<16x128xf32> to vector<16xf32>
    %132 = vector.shape_cast %131 : vector<16xf32> to vector<16x1xf32>
    %cst_66 = arith.constant 1.280000e+02 : f32
    %133 = vector.broadcast %cst_66 : f32 to vector<16x1xf32>
    %134 = arith.divf %132, %133 : vector<16x1xf32>
    %135 = vector.broadcast %125 : vector<16x1xf32> to vector<16x128xf32>
    %136 = arith.subf %121, %135 : vector<16x128xf32>
    %cst_67 = arith.constant 9.99999974E-6 : f32
    %137 = vector.broadcast %cst_67 : f32 to vector<16x1xf32>
    %138 = arith.addf %134, %137 : vector<16x1xf32>
    %139 = math.rsqrt %138 : vector<16x1xf32>
    %140 = vector.broadcast %139 : vector<16x1xf32> to vector<16x128xf32>
    %141 = arith.mulf %136, %140 : vector<16x128xf32>
    %142 = vector.broadcast %117 : vector<1x128xf32> to vector<16x128xf32>
    %143 = arith.mulf %141, %142 : vector<16x128xf32>
    %144 = vector.broadcast %118 : vector<1x128xf32> to vector<16x128xf32>
    %145 = arith.addf %143, %144 : vector<16x128xf32>
    %c0_68 = arith.constant 0 : index
    %c0_69 = arith.constant 0 : index
    %146 = vector.load %arg17[%c0_68, %c0_69] : memref<128x512xf32, #tpu.memory_space<vmem>>, vector<128x512xf32>
    %cst_70 = arith.constant dense<0.000000e+00> : vector<16x512xf32>
    %147 = tpu.matmul %145, %146, %cst_70 {dimension_numbers = #tpu.dot_dimension_numbers<[1], [0], [0], [1], [0, 0, 1, 1], [], []>} : vector<16x128xf32>, vector<128x512xf32>, vector<16x512xf32> -> vector<16x512xf32>
    %c0_71 = arith.constant 0 : index
    %c0_72 = arith.constant 0 : index
    %148 = vector.load %arg18[%c0_71, %c0_72] : memref<1x512xf32, #tpu.memory_space<vmem>>, vector<1x512xf32>
    %149 = vector.broadcast %148 : vector<1x512xf32> to vector<16x512xf32>
    %150 = arith.addf %147, %149 : vector<16x512xf32>
    %cst_73 = arith.constant 5.000000e-01 : f32
    %151 = vector.broadcast %cst_73 : f32 to vector<16x512xf32>
    %152 = arith.mulf %151, %150 : vector<16x512xf32>
    %cst_74 = arith.constant 4.471500e-02 : f32
    %153 = vector.broadcast %cst_74 : f32 to vector<16x512xf32>
    %154 = arith.mulf %153, %150 : vector<16x512xf32>
    %155 = arith.mulf %154, %150 : vector<16x512xf32>
    %156 = arith.mulf %155, %150 : vector<16x512xf32>
    %157 = arith.addf %150, %156 : vector<16x512xf32>
    %cst_75 = arith.constant 0.797884583 : f32
    %158 = vector.broadcast %cst_75 : f32 to vector<16x512xf32>
    %159 = arith.mulf %158, %157 : vector<16x512xf32>
    %160 = math.tanh %159 : vector<16x512xf32>
    %cst_76 = arith.constant 1.000000e+00 : f32
    %161 = vector.broadcast %cst_76 : f32 to vector<16x512xf32>
    %162 = arith.addf %161, %160 : vector<16x512xf32>
    %163 = arith.mulf %152, %162 : vector<16x512xf32>
    %c0_77 = arith.constant 0 : index
    %c0_78 = arith.constant 0 : index
    %164 = vector.load %arg19[%c0_77, %c0_78] : memref<512x128xf32, #tpu.memory_space<vmem>>, vector<512x128xf32>
    %cst_79 = arith.constant dense<0.000000e+00> : vector<16x128xf32>
    %165 = tpu.matmul %163, %164, %cst_79 {dimension_numbers = #tpu.dot_dimension_numbers<[1], [0], [0], [1], [0, 0, 1, 1], [], []>} : vector<16x512xf32>, vector<512x128xf32>, vector<16x128xf32> -> vector<16x128xf32>
    %c0_80 = arith.constant 0 : index
    %c0_81 = arith.constant 0 : index
    %166 = vector.load %arg20[%c0_80, %c0_81] : memref<1x128xf32, #tpu.memory_space<vmem>>, vector<1x128xf32>
    %167 = vector.broadcast %166 : vector<1x128xf32> to vector<16x128xf32>
    %168 = arith.addf %165, %167 : vector<16x128xf32>
    %169 = arith.addf %145, %168 : vector<16x128xf32>
    %cst_82 = arith.constant dense<0.000000e+00> : vector<16xf32>
    %170 = vector.multi_reduction <add>, %169, %cst_82 [1] : vector<16x128xf32> to vector<16xf32>
    %171 = vector.shape_cast %170 : vector<16xf32> to vector<16x1xf32>
    %cst_83 = arith.constant 1.280000e+02 : f32
    %172 = vector.broadcast %cst_83 : f32 to vector<16x1xf32>
    %173 = arith.divf %171, %172 : vector<16x1xf32>
    %174 = vector.broadcast %173 : vector<16x1xf32> to vector<16x128xf32>
    %175 = arith.subf %169, %174 : vector<16x128xf32>
    %176 = vector.broadcast %173 : vector<16x1xf32> to vector<16x128xf32>
    %177 = arith.subf %169, %176 : vector<16x128xf32>
    %178 = arith.mulf %175, %177 : vector<16x128xf32>
    %cst_84 = arith.constant dense<0.000000e+00> : vector<16xf32>
    %179 = vector.multi_reduction <add>, %178, %cst_84 [1] : vector<16x128xf32> to vector<16xf32>
    %180 = vector.shape_cast %179 : vector<16xf32> to vector<16x1xf32>
    %cst_85 = arith.constant 1.280000e+02 : f32
    %181 = vector.broadcast %cst_85 : f32 to vector<16x1xf32>
    %182 = arith.divf %180, %181 : vector<16x1xf32>
    %183 = vector.broadcast %173 : vector<16x1xf32> to vector<16x128xf32>
    %184 = arith.subf %169, %183 : vector<16x128xf32>
    %cst_86 = arith.constant 9.99999974E-6 : f32
    %185 = vector.broadcast %cst_86 : f32 to vector<16x1xf32>
    %186 = arith.addf %182, %185 : vector<16x1xf32>
    %187 = math.rsqrt %186 : vector<16x1xf32>
    %188 = vector.broadcast %187 : vector<16x1xf32> to vector<16x128xf32>
    %189 = arith.mulf %184, %188 : vector<16x128xf32>
    %190 = vector.broadcast %119 : vector<1x128xf32> to vector<16x128xf32>
    %191 = arith.mulf %189, %190 : vector<16x128xf32>
    %192 = vector.broadcast %120 : vector<1x128xf32> to vector<16x128xf32>
    %193 = arith.addf %191, %192 : vector<16x128xf32>
    %c0_87 = arith.constant 0 : index
    %c0_88 = arith.constant 0 : index
    %c0_89 = arith.constant 0 : index
    %194 = vector.load %arg21[%c0_87, %c0_88, %c0_89] : memref<1x16x128xf32, #tpu.memory_space<vmem>>, vector<1x16x128xf32>
    %195 = vector.shape_cast %194 : vector<1x16x128xf32> to vector<16x128xf32>
    %196 = vector.shape_cast %193 : vector<16x128xf32> to vector<1x16x128xf32>
    tpu.vector_store %arg21[%c0_87, %c0_88, %c0_89], %196 {strides = array<i32>} : memref<1x16x128xf32, #tpu.memory_space<vmem>>, vector<1x16x128xf32>,
    return
  }
  func.func @transform_0(%arg0: i32) -> (i32, i32, i32) {
    %c0_i32 = arith.constant 0 : i32
    %c0_i32_0 = arith.constant 0 : i32
    %c0_i32_1 = arith.constant 0 : i32
    return %arg0, %c0_i32, %c0_i32_0 : i32, i32, i32
  }
  func.func @transform_1(%arg0: i32) -> (i32, i32, i32) {
    %c0_i32 = arith.constant 0 : i32
    %c0_i32_0 = arith.constant 0 : i32
    %c0_i32_1 = arith.constant 0 : i32
    return %arg0, %c0_i32, %c0_i32_0 : i32, i32, i32
  }
  func.func @transform_2(%arg0: i32) -> (i32, i32, i32) {
    %c0_i32 = arith.constant 0 : i32
    %c0_i32_0 = arith.constant 0 : i32
    %c0_i32_1 = arith.constant 0 : i32
    return %arg0, %c0_i32, %c0_i32_0 : i32, i32, i32
  }
  func.func @transform_3(%arg0: i32) -> (i32, i32, i32) {
    %c0_i32 = arith.constant 0 : i32
    %c0_i32_0 = arith.constant 0 : i32
    %c0_i32_1 = arith.constant 0 : i32
    return %arg0, %c0_i32, %c0_i32_0 : i32, i32, i32
  }
  func.func @transform_4(%arg0: i32) -> (i32, i32) {
    %c0_i32 = arith.constant 0 : i32
    %c0_i32_0 = arith.constant 0 : i32
    %c0_i32_1 = arith.constant 0 : i32
    return %c0_i32, %c0_i32_0 : i32, i32
  }
  func.func @transform_5(%arg0: i32) -> (i32, i32) {
    %c0_i32 = arith.constant 0 : i32
    %c0_i32_0 = arith.constant 0 : i32
    %c0_i32_1 = arith.constant 0 : i32
    return %c0_i32, %c0_i32_0 : i32, i32
  }
  func.func @transform_6(%arg0: i32) -> (i32, i32) {
    %c0_i32 = arith.constant 0 : i32
    %c0_i32_0 = arith.constant 0 : i32
    %c0_i32_1 = arith.constant 0 : i32
    return %c0_i32, %c0_i32_0 : i32, i32
  }
  func.func @transform_7(%arg0: i32) -> (i32, i32) {
    %c0_i32 = arith.constant 0 : i32
    %c0_i32_0 = arith.constant 0 : i32
    %c0_i32_1 = arith.constant 0 : i32
    return %c0_i32, %c0_i32_0 : i32, i32
  }
  func.func @transform_8(%arg0: i32) -> (i32, i32) {
    %c0_i32 = arith.constant 0 : i32
    %c0_i32_0 = arith.constant 0 : i32
    %c0_i32_1 = arith.constant 0 : i32
    return %c0_i32, %c0_i32_0 : i32, i32
  }
  func.func @transform_9(%arg0: i32) -> (i32, i32) {
    %c0_i32 = arith.constant 0 : i32
    %c0_i32_0 = arith.constant 0 : i32
    %c0_i32_1 = arith.constant 0 : i32
    return %c0_i32, %c0_i32_0 : i32, i32
  }
  func.func @transform_10(%arg0: i32) -> (i32, i32) {
    %c0_i32 = arith.constant 0 : i32
    %c0_i32_0 = arith.constant 0 : i32
    %c0_i32_1 = arith.constant 0 : i32
    return %c0_i32, %c0_i32_0 : i32, i32
  }
  func.func @transform_11(%arg0: i32) -> (i32, i32) {
    %c0_i32 = arith.constant 0 : i32
    %c0_i32_0 = arith.constant 0 : i32
    %c0_i32_1 = arith.constant 0 : i32
    return %c0_i32, %c0_i32_0 : i32, i32
  }
  func.func @transform_12(%arg0: i32) -> (i32, i32) {
    %c0_i32 = arith.constant 0 : i32
    %c0_i32_0 = arith.constant 0 : i32
    %c0_i32_1 = arith.constant 0 : i32
    return %c0_i32, %c0_i32_0 : i32, i32
  }
  func.func @transform_13(%arg0: i32) -> (i32, i32) {
    %c0_i32 = arith.constant 0 : i32
    %c0_i32_0 = arith.constant 0 : i32
    %c0_i32_1 = arith.constant 0 : i32
    return %c0_i32, %c0_i32_0 : i32, i32
  }
  func.func @transform_14(%arg0: i32) -> (i32, i32) {
    %c0_i32 = arith.constant 0 : i32
    %c0_i32_0 = arith.constant 0 : i32
    %c0_i32_1 = arith.constant 0 : i32
    return %c0_i32, %c0_i32_0 : i32, i32
  }
  func.func @transform_15(%arg0: i32) -> (i32, i32) {
    %c0_i32 = arith.constant 0 : i32
    %c0_i32_0 = arith.constant 0 : i32
    %c0_i32_1 = arith.constant 0 : i32
    return %c0_i32, %c0_i32_0 : i32, i32
  }
  func.func @transform_16(%arg0: i32) -> (i32, i32) {
    %c0_i32 = arith.constant 0 : i32
    %c0_i32_0 = arith.constant 0 : i32
    %c0_i32_1 = arith.constant 0 : i32
    return %c0_i32, %c0_i32_0 : i32, i32
  }
  func.func @transform_17(%arg0: i32) -> (i32, i32) {
    %c0_i32 = arith.constant 0 : i32
    %c0_i32_0 = arith.constant 0 : i32
    %c0_i32_1 = arith.constant 0 : i32
    return %c0_i32, %c0_i32_0 : i32, i32
  }
  func.func @transform_18(%arg0: i32) -> (i32, i32) {
    %c0_i32 = arith.constant 0 : i32
    %c0_i32_0 = arith.constant 0 : i32
    %c0_i32_1 = arith.constant 0 : i32
    return %c0_i32, %c0_i32_0 : i32, i32
  }
  func.func @transform_19(%arg0: i32) -> (i32, i32) {
    %c0_i32 = arith.constant 0 : i32
    %c0_i32_0 = arith.constant 0 : i32
    %c0_i32_1 = arith.constant 0 : i32
    return %c0_i32, %c0_i32_0 : i32, i32
  }
  func.func @transform_20(%arg0: i32) -> (i32, i32, i32) {
    %c0_i32 = arith.constant 0 : i32
    %c0_i32_0 = arith.constant 0 : i32
    %c0_i32_1 = arith.constant 0 : i32
    return %arg0, %c0_i32, %c0_i32_0 : i32, i32, i32
  }
}

</mosaic_0001>

<bundles_post_ra>
// kernel: tpu_custom_call.1
= control target key start
LH: loop header
LB: loop body
LE: loop exit
PB: predicated region body
PF: predicated region fallthrough
CT: control target
= control target key end

     0   :  { %7 = vsyncpa [#allocation3], 0  ;;  %s635_s0 = inlined_call_operand.hbm [shape: f32[8,128], index: 0, kind: input, shape index: {}]   ;;  %s636_s1 = inlined_call_operand.hbm [shape: f32[16,128], index: 1, kind: input, shape index: {}]   ;;  %s637_s2 = inlined_call_operand.hbm [shape: f32[16,128], index: 2, kind: output, shape index: {}]  }
   0x1   :  { %8 = vsyncpa [#allocation6], 0 }
   0x2   :  { %10 = vsyncpa [#allocation6 + $0x1], 0 }
   0x3   :  { %11 = vsyncpa [#allocation4], 0 }
   0x4   :  { %13 = vsyncpa [#allocation4 + $0x1], 0  ;;  %s497_s9 = smov 0   ;;  %s499_s10 = smov 0  }
   0x5   :  { %s501_s11 = smov 0   ;;  %s503_s12 = smov 0  }
   0x6 LB: > { %s518_s13 = sadd.s32 4294967295, %s479_s12   ;;  %s278_s14 = sadd.s32 4294967294, %s479_s12   ;;  %s479_s12 = sphi %s503_s12, %s647_s12   ;;  %s475_s11 = sphi %s501_s11, %s646_s11   ;;  %s471_s10 = sphi %s499_s10, %s645_s10   ;;  %s467_s9 = sphi %s497_s9, %s644_s9  }
   0x7   : > { %p60_p0 = scmp.ne.s32.totalorder %s471_s10, %s467_s9  ;;  %p61_p1 = scmp.eq.s32.totalorder %s518_s13, 0 }
   0x8   : > { %p84_p2 = scmp.eq.s32.totalorder %s518_s13, 1  ;;  %p90_p3 = scmp.eq.s32.totalorder %s278_s14, 1 }
   0x9   : > { %p527_p4 = por %p61_p1, %p60_p0  ;;  %p279_p5 = scmp.ge.s32.totalorder %s479_s12, 1 }
   0xa   : > { %p532_p6 = por %p90_p3, %p60_p0  ;;  %p97_p7 = scmp.lt.s32.totalorder %s479_s12, 3 }
   0xb   : > { %s109_s19 = sshll.u32 %s635_s0, 4  ;;  %s481_s21 = smov [#allocation2]   ;;  %s110_s19 = int_to_ptr.hbm [resolvable:$true] %s109_s19 }
   0xc   : > { %p540_p8 = pnand %p279_p5, %p97_p7  ;;  %s111_s22 = sshll.u32 %s481_s21, 4  ;;  %s112_s22 = int_to_ptr.vmem [resolvable:$true] %s111_s22 }
   0xd   : > { %s550_s23 = sadd.s32 1, %s479_s12   ;;  %s47_s24 = sadd.s32 1, %s475_s11 }
   0xe   : > { %p300_p10 = pneg %p540_p8  ;;  %s44_s25 = ssub.s32 %s479_s12, %s550_s23 }
   0xf   : > { %p45_p12 = scmp.eq.s32.totalorder %s44_s25, 0  ;;  %p54_p13 = scmp.ne.s32.totalorder %s475_s11, %s471_s10 }
  0x10   : > { %p301_p11 = pnand %p300_p10, %p61_p1  ;;  %p55_p0 = scmp.eq.s32.totalorder %s479_s12, 0 }
  0x11   : > { %s559_s26 = scalar_select %p45_p12, %s475_s11, %s47_s24  }
  0x12   : > { %303 = dma.hbm_to_vmem [thread:$0]  (!%p301_p11), %s110_s19, 128, %s112_s22, [#allocation3]  }
  0x13   : > { %p563_p3 = por %p84_p2, %p54_p13  ;;  %p313_p5 = scmp.lt.s32.totalorder %s479_s12, 2 }
  0x14   : > { %s122_s28 = sand.u32 1, %s475_s11   ;;  %s283_s29 = sshll.u32 %s479_s12, 3 }
  0x15   : > { %p56_p7 = por %p55_p0, %p54_p13  ;;  %s282_s30 = sshll.u32 %s122_s28, 3 }
  0x16   : > { %s130_s5 = scalar_lea.hbm %s636_s1, %s283_s29  ;;  %s126_s7 = scalar_lea.vmem [#allocation5], %s282_s30 }
  0x17   : > { %s132_s6 = sshll.u32 %s130_s5, 4  ;;  %s134_s8 = sshll.u32 %s126_s7, 4  ;;  %s133_s6 = int_to_ptr.hbm [resolvable:$true] %s132_s6  ;;  %s135_s8 = int_to_ptr.vmem [resolvable:$true] %s134_s8 }
  0x18   : > { %p573_p10 = pnand %p313_p5, %p56_p7  ;;  %s123_s17 = scalar_lea.sflag [#allocation6], %s122_s28 }
  0x19   : > { %s379_s18 = sshra.s32 %s133_s6, 4  ;;  %s386_s24 = scalar_lea.hbm %s636_s1, 16  ;;  %s380_s18 = int_to_ptr.hbm [resolvable:$true] %s379_s18 }
  0x1a   : > { %s381_s19 = scalar_lea.hbm %s380_s18, 8  ;;  %p383_p11 = pneg %p573_p10 }
  0x1b   : > { %p382_p2 = scmp.ne.s32.totalorder %s380_s18, %s381_s19  ;;  %p387_p0 = scmp.lt.s32.totalorder %s380_s18, %s636_s1 }
  0x1c   : > { %p388_p5 = scmp.lt.s32.totalorder %s386_s24, %s381_s19 }
  0x1d   : > { %p384_p12 = pnand %p383_p11, %p382_p2 }
  0x1e   : > { %p389_p7 = por %p388_p5, %p387_p0 }
  0x1f   : > { %p385_p13 = pneg %p384_p12 }
  0x21   : > { %p390_p9 = pnand %p389_p7, %p385_p13 }
  0x23   : > { %393 = shalt.err (!%p390_p9)
}
  0x24   : > { %307 = dma.hbm_to_vmem [thread:$0]  (!%p573_p10), %s133_s6, 128, %s135_s8, %s123_s17  }
  0x25   : > { %143 = sbr.rel (%p540_p8) target bundleno = 62 (0x3e), region = 28 }
  0x2a   : > { %454 = dma.done.wait (%p61_p1), [#allocation3], 128  }
  0x2b   : > { %456 = vsyncadd (%p61_p1), [#allocation3], 4294967168  ;;  %s594_s28 = sand.u32 1, %s471_s10  }
  0x2c   : > { %s286_s30 = sshll.u32 %s594_s28, 3  ;;  %s151_s3 = scalar_lea.sflag [#allocation6], %s594_s28 }
  0x2d   : > { %s154_s4 = scalar_lea.vmem [#allocation5], %s286_s30 }
  0x2e   : > { %458 = dma.done.wait (%p527_p4), %s151_s3, 128  }
  0x2f   : > { %460 = vsyncadd (%p527_p4), %s151_s3, 4294967168  ;;  %s289_s20 = sshll.u32 %s518_s13, 3  ;;  %s175_s8 = scalar_lea.vmem [#allocation7], %s286_s30  ;;  %v176_v0 = vld [vmem:[%s154_s4] sm:$0xff]  ;;  %v177_v1 = vld [vmem:[#allocation2] sm:$0xff] }
  0x30   : > { %s191_s7 = scalar_lea.hbm %s637_s2, %s289_s20  ;;  %s193_s14 = sshll.u32 %s175_s8, 4  ;;  %v178_v2 = vadd.f32 %v177_v1, %v176_v0  ;;  %s194_s14 = int_to_ptr.vmem [resolvable:$true] %s193_s14 }
  0x31   : > { %s195_s17 = sshll.u32 %s191_s7, 4  ;;  %s181_s18 = scalar_lea.sflag [#allocation4], %s594_s28  ;;  %s196_s17 = int_to_ptr.hbm [resolvable:$true] %s195_s17 }
  0x32   : > { %179 = vst [vmem:[%s175_s8] sm:$0xff] %v178_v2  ;;  %s423_s15 = sshra.s32 %s196_s17, 4  ;;  %s429_s22 = scalar_lea.hbm %s637_s2, 16  ;;  %s424_s15 = int_to_ptr.hbm [resolvable:$true] %s423_s15 }
  0x33   : > { %s425_s19 = scalar_lea.hbm %s424_s15, 8  ;;  %p430_p9 = scmp.lt.s32.totalorder %s424_s15, %s637_s2 }
  0x34   : > { %p426_p1 = scmp.ne.s32.totalorder %s424_s15, %s425_s19  ;;  %p431_p10 = scmp.lt.s32.totalorder %s429_s22, %s425_s19 }
  0x36   : > { %p427_p4 = pnand %p426_p1, %p563_p3  ;;  %p432_p2 = por %p431_p10, %p430_p9 }
  0x38   : > { %p428_p8 = pneg %p427_p4 }
  0x3a   : > { %p433_p11 = pnand %p432_p2, %p428_p8 }
  0x3c   : > { %436 = shalt.err (!%p433_p11)
}
  0x3d   : > { %298 = dma.vmem_to_hbm [thread:$0]  (%p563_p3), %s194_s14, 128, %s196_s17, %s181_s18  }
  0x3e PF: > { %s207_s29 = sand.u32 1, %s467_s9   ;;  %p643_p12 = scmp.ge.s32.totalorder %s479_s12, 2 }
  0x3f   : > { %s208_s28 = scalar_lea.sflag [#allocation4], %s207_s29 }
  0x40   : > { %p309_p13 = pnand %p643_p12, %p532_p6 }
  0x42   : > { %p310_p0 = pneg %p309_p13 }
  0x44   : > { %462 = dma.done.wait (%p310_p0), %s208_s28, 128  }
  0x45   : > { %464 = vsyncadd (%p310_p0), %s208_s28, 4294967168  ;;  %p16_p5 = scmp.ge.s32.totalorder %s550_s23, 4   ;;  %s644_s9 = smov %s471_s10 }
  0x46   : > { %s645_s10 = smov %s475_s11  ;;  %s646_s11 = smov %s559_s26 }
  0x47   : > { %s647_s12 = smov %s550_s23  ;;  %18 = sbr.rel (!%p16_p5) target bundleno = 6 (0x6), region = 78 }
  0x4c   :  { %214 = vsyncpa [#allocation3], 1 }
  0x4d   :  { %216 = vsyncpa [#allocation3 + $0x1], 1 }
  0x4e   :  { %217 = vsyncpa [#allocation6], 1 }
  0x4f   :  { %219 = vsyncpa [#allocation6 + $0x1], 1 }
  0x50   :  { %220 = vsyncpa [#allocation4], 1 }
  0x51   :  { %222 = vsyncpa [#allocation4 + $0x1], 1 }

// kernel: tpu_custom_call.1
= control target key start
LH: loop header
LB: loop body
LE: loop exit
PB: predicated region body
PF: predicated region fallthrough
CT: control target
= control target key end

     0   :  { %9 = vsyncpa [#allocation3], 0  ;;  %s2748_s0 = inlined_call_operand.hbm [shape: f32[16,128], index: 0, kind: input, shape index: {}]   ;;  %s2749_s1 = inlined_call_operand.hbm [shape: f32[24,128], index: 1, kind: input, shape index: {}]   ;;  %s2750_s2 = inlined_call_operand.hbm [shape: f32[24,128], index: 2, kind: input, shape index: {}]   ;;  %s2751_s3 = inlined_call_operand.hbm [shape: s32[16,24], index: 3, kind: input, shape index: {}]   ;;  %s2752_s4 = inlined_call_operand.hbm [shape: f32[16,128], index: 4, kind: output, shape index: {}]  }
   0x1   :  { %10 = vsyncpa [#allocation6], 0 }
   0x2   :  { %11 = vsyncpa [#allocation9], 0 }
   0x3   :  { %12 = vsyncpa [#allocation4], 0  ;;  %s30_s17 = sshll.u32 %s2749_s1, 4  ;;  %s1940_s18 = smov [#allocation5]   ;;  %s31_s17 = int_to_ptr.hbm [resolvable:$true] %s30_s17 }
   0x4   :  { %s32_s19 = sshll.u32 %s1940_s18, 4  ;;  %s17_s22 = sshll.u32 %s2748_s0, 4  ;;  %s33_s19 = int_to_ptr.vmem [resolvable:$true] %s32_s19  ;;  %s18_s22 = int_to_ptr.hbm [resolvable:$true] %s17_s22 }
   0x5   :  { %s1941_s23 = smov 128   ;;  %s1942_s24 = smov 8  }
   0x6   :  { %38 = dma.hbm_to_vmem [thread:$0]  %s31_s17, 384, %s33_s19, [#allocation6], %s1941_s23, %s1941_s23, %s1942_s24  }
   0x7   :  { %s1943_s25 = smov [#allocation2]   ;;  %s43_s1 = sshll.u32 %s2750_s2, 4  ;;  %s44_s1 = int_to_ptr.hbm [resolvable:$true] %s43_s1 }
   0x8   :  { %s19_s26 = sshll.u32 %s1943_s25, 4  ;;  %s56_s30 = sshll.u32 %s2751_s3, 4  ;;  %s20_s26 = int_to_ptr.vmem [resolvable:$true] %s19_s26  ;;  %s57_s30 = int_to_ptr.hbm [resolvable:$true] %s56_s30 }
   0x9   :  { %25 = dma.hbm_to_vmem [thread:$0]  %s18_s22, 256, %s20_s26, [#allocation3], %s1941_s23, %s1941_s23, %s1942_s24  }
   0xa   :  { %s1944_s5 = smov [#allocation7]   ;;  %s1945_s7 = smov [#allocation8]  }
   0xb   :  { %s45_s6 = sshll.u32 %s1944_s5, 4  ;;  %s58_s2 = sshll.u32 %s1945_s7, 4  ;;  %s46_s6 = int_to_ptr.vmem [resolvable:$true] %s45_s6  ;;  %s59_s2 = int_to_ptr.vmem [resolvable:$true] %s58_s2 }
   0xc   :  { %51 = dma.hbm_to_vmem [thread:$0]  %s44_s1, 384, %s46_s6, [#allocation6], %s1941_s23, %s1941_s23, %s1942_s24  }
   0xd   :  { %64 = dma.hbm_to_vmem [thread:$0]  %s57_s30, 256, %s59_s2, [#allocation9], %s1941_s23, %s1941_s23, %s1942_s24  }
   0xe   :  { %1932 = dma.done.wait [#allocation3], 256  }
   0xf   :  { %1933 = vsyncadd [#allocation3], 4294967040 }
  0x10   :  { %1934 = dma.done.wait [#allocation6], 768  }
  0x11   :  { %1935 = vsyncadd [#allocation6], 4294966528 }
  0x12   :  { %1936 = dma.done.wait [#allocation9], 256  }
  0x13   :  { %1937 = vsyncadd [#allocation9], 4294967040  ;;  %v2001_v0 = vld [vmem:[#allocation5 + $0x10] sm:$0xff]  ;;  %s1946_s3 = smov 32   ;;  %s1947_s8 = smov 96   ;;  %v84_v1 = vld [vmem:[#allocation5 + $0x8] sm:$0xff] }
  0x14   :  { %359 = vrot.lane.b32.xlu1 %v2001_v0, %s1946_s3  ;;  %341 = vrot.lane.b32.xlu0 %v2001_v0, %s1947_s8  ;;  %s1948_s9 = smov 64   ;;  %v2012_v2 = vld [vmem:[#allocation5] sm:$0xff]  ;;  %v81_v3 = vld [vmem:[#allocation2] sm:$0xff]  ;;  %v82_v5 = vld [vmem:[#allocation2 + $0x8] sm:$0xff]  ;;  %v1949_v9 = vmov 1983009808  }
  0x15   :  { %348 = vrot.lane.b32.xlu2 %v84_v1, %s1948_s9  ;;  %v2020_v4 = vmul.f32 0.17677669, %v81_v3  ;;  %v2028_v6 = vmul.f32 0.17677669, %v82_v5  ;;  %v119_v10 = vunpack.c.l.s4 %v1949_v9  ;;  %v422_v12 = vrot.slane %v84_v1, 4  ;;  %s1951_s10 = smov [#allocation10]  }
  0x16   :  { %vm114_vm0 = vcmask 1047556   ;;  %v1950_v25 = vmov 1934713408   ;;  %v478_v28 = vrot.slane %v2001_v0, 4  ;;  %v366_v36 = vrot.slane %v2012_v2, 4  ;;  %s1708_s11 = sshll.u32 %s1951_s10, 4  ;;  %s1709_s11 = int_to_ptr.vmem [resolvable:$true] %s1708_s11 }
  0x17   :  { %v2038_v14 = vunpack.c.0.s8 %v119_v10  ;;  %v143_v26 = vunpack.c.l.s4 %v1950_v25  ;;  %v116_v49 = vrot.slane %v2020_v4, 4  ;;  %vm1054_vm1 = vcmask 261120   ;;  %s1710_s14 = sshll.u32 %s2752_s4, 4  ;;  %s1711_s14 = int_to_ptr.hbm [resolvable:$true] %s1710_s14 }
  0x18   :  { %vm1221_vm3 = vcmask 195584   ;;  %vm1696_vm5 = vcmask 523264   ;;  %vm1699_vm6 = vcmask 785408  }
  0x19   :  { %v2049_v33 = vunpack.c.0.s8 %v143_v26 }
  0x1c   :  { %350 = vrot.lane.b32.xlu0 %v2001_v0, %s1948_s9  ;;  %339 = vrot.lane.b32.xlu1 %v84_v1, %s1947_s8 }
  0x1d   :  { %357 = vrot.lane.b32.xlu2 %v84_v1, %s1946_s3 }
  0x24   :  { %346 = vrot.lane.b32.xlu1 %v2012_v2, %s1948_s9  ;;  %337 = vrot.lane.b32.xlu0 %v2012_v2, %s1947_s8 }
  0x25   :  { %355 = vrot.lane.b32.xlu2 %v2012_v2, %s1946_s3 }
  0x2c   :  { %101 = vrot.lane.b32.xlu1 %v2020_v4, %s1948_s9  ;;  %95 = vrot.lane.b32.xlu0 %v2020_v4, %s1947_s8 }
  0x2d   :  { %107 = vrot.lane.b32.xlu2 %v2020_v4, %s1946_s3 }
  0x34   :  { %103 = vrot.lane.b32.xlu1 %v2028_v6, %s1948_s9  ;;  %97 = vrot.lane.b32.xlu0 %v2028_v6, %s1947_s8 }
  0x35   :  { %109 = vrot.lane.b32.xlu2 %v2028_v6, %s1946_s3 }
  0x6f   :  { %v349_v7 = vpop.permute.xlu2 %348 }
  0x70   :  { %v420_v11 = vrot.slane %v349_v7, 4  ;;  %v423_v18 = vsel %vm114_vm0, %v349_v7, %v422_v12 }
  0x71   :  { %v431_v23 = vperm.slane %v423_v18, %v2038_v14 }
  0x72   :  { %v421_v17 = vsel %vm114_vm0, %v420_v11, %v84_v1 }
  0x73   :  { %v427_v22 = vperm.slane %v421_v17, %v2038_v14  ;;  %v458_v32 = vrot.slane %v431_v23, 4 }
  0x75   :  { %v446_v31 = vrot.slane %v427_v22, 4 }
  0x77   :  { %v358_v8 = vpop.permute.xlu2 %357 }
  0x78   :  { %v432_v27 = vrot.slane %v358_v8, 4 }
  0x7f   :  { %v2036_v13 = vpop.permute.xlu2 %355 }
  0x80   :  { %v376_v44 = vrot.slane %v2036_v13, 4 }
  0x86   :  { %v360_v15 = vpop.permute.xlu1 %359  ;;  %v342_v16 = vpop.permute.xlu0 %341 }
  0x87   :  { %v488_v19 = vrot.slane %v360_v15, 4  ;;  %v490_v20 = vrot.slane %v342_v16, 4  ;;  %v2057_v45 = vpop.permute.xlu2 %107 }
  0x88   :  { %v126_v57 = vrot.slane %v2057_v45, 4 }
  0x89   :  { %v491_v21 = vsel %vm114_vm0, %v360_v15, %v490_v20  ;;  %v489_v24 = vsel %vm114_vm0, %v488_v19, %v342_v16 }
  0x8a   :  { %v499_v29 = vperm.slane %v491_v21, %v2038_v14  ;;  %v495_v30 = vperm.slane %v489_v24, %v2038_v14 }
  0x8c   :  { %v512_v41 = vrot.slane %v499_v29, 4  ;;  %v500_v46 = vrot.slane %v495_v30, 4 }
  0x8e   :  { %v351_v34 = vpop.permute.xlu0 %350  ;;  %v340_v35 = vpop.permute.xlu1 %339 }
  0x8f   :  { %v476_v37 = vrot.slane %v351_v34, 4  ;;  %v479_v38 = vsel %vm114_vm0, %v351_v34, %v478_v28  ;;  %v433_v39 = vsel %vm114_vm0, %v432_v27, %v340_v35  ;;  %v434_v40 = vrot.slane %v340_v35, 4 }
  0x90   :  { %v487_v42 = vperm.slane %v479_v38, %v2038_v14  ;;  %v439_v43 = vperm.slane %v433_v39, %v2038_v14 }
  0x91   :  { %v477_v47 = vsel %vm114_vm0, %v476_v37, %v2001_v0  ;;  %v435_v48 = vsel %vm114_vm0, %v358_v8, %v434_v40 }
  0x92   :  { %v483_v50 = vperm.slane %v477_v47, %v2038_v14  ;;  %v513_v51 = vsel %vm114_vm0, %v512_v41, %v487_v42  ;;  %v514_v52 = vrot.slane %v487_v42, 4  ;;  %v443_v53 = vperm.slane %v435_v48, %v2038_v14 }
  0x93   :  { %v519_v54 = vperm.slane %v513_v51, %v2049_v33  ;;  %v444_v55 = vrot.slane %v439_v43, 4  ;;  %v447_v56 = vsel %vm114_vm0, %v439_v43, %v446_v31 }
  0x94   :  { %v501_v58 = vsel %vm114_vm0, %v500_v46, %v483_v50  ;;  %v502_v59 = vrot.slane %v483_v50, 4  ;;  %v515_v60 = vsel %vm114_vm0, %v499_v29, %v514_v52  ;;  %v455_v61 = vperm.slane %v447_v56, %v2049_v33 }
  0x95   :  { %v2073_v62 = vperm.slane %v501_v58, %v2049_v33  ;;  %v523_v63 = vperm.slane %v515_v60, %v2049_v33  ;;  %v528_v0 = vrot.slane %v519_v54, 4  ;;  %v445_v1 = vsel %vm114_vm0, %v444_v55, %v427_v22 }
  0x96   :  { %v503_v3 = vsel %vm114_vm0, %v495_v30, %v502_v59  ;;  %v451_v5 = vperm.slane %v445_v1, %v2049_v33  ;;  %v456_v7 = vrot.slane %v443_v53, 4  ;;  %v459_v8 = vsel %vm114_vm0, %v443_v53, %v458_v32  ;;  %v347_v9 = vpop.permute.xlu1 %346  ;;  %v338_v10 = vpop.permute.xlu0 %337 }
  0x97   :  { %v511_v11 = vperm.slane %v503_v3, %v2049_v33  ;;  %v524_v12 = vrot.slane %v2073_v62, 4  ;;  %v2083_v15 = vsel %vm114_vm0, 0.0, %v528_v0  ;;  %v530_v16 = vrot.slane %v523_v63, 4 }
  0x98   :  { %v457_v17 = vsel %vm114_vm0, %v456_v7, %v431_v23  ;;  %v467_v18 = vperm.slane %v459_v8, %v2049_v33  ;;  %v468_v19 = vrot.slane %v451_v5, 4  ;;  %v470_v20 = vrot.slane %v455_v61, 4 }
  0x99   :  { %v2087_v21 = vrot.slane %v511_v11, 4  ;;  %v2090_v22 = vsel %vm114_vm0, 0.0, %v530_v16  ;;  %v651_v24 = vsel %vm114_vm0, %v530_v16, %v519_v54  ;;  %v2094_v25 = vperm.slane %v457_v17, %v2049_v33 }
  0x9a   :  { %v2097_v26 = vperm.slane %v651_v24, %v2038_v14  ;;  %v656_v27 = vrot.slane %v2090_v22, 4  ;;  %v2101_v23 = vsel %vm114_vm0, 0.0, %v468_v19  ;;  %v2104_v28 = vsel %vm114_vm0, 0.0, %v470_v20 }
  0x9b   :  { %v472_v29 = vrot.slane %v2094_v25, 4  ;;  %v2107_v30 = vrot.slane %v467_v18, 4  ;;  %v2110_v31 = vsel %vm114_vm0, %v470_v20, %v451_v5  ;;  %v591_v32 = vrot.slane %v2104_v28, 4 }
  0x9c   :  { %v364_v34 = vrot.slane %v347_v9, 4  ;;  %v367_v35 = vsel %vm114_vm0, %v347_v9, %v366_v36  ;;  %v377_v37 = vsel %vm114_vm0, %v376_v44, %v338_v10  ;;  %v378_v38 = vrot.slane %v338_v10, 4 }
  0x9d   :  { %v2117_v39 = vsel %vm114_vm0, 0.0, %v2107_v30  ;;  %v375_v40 = vperm.slane %v367_v35, %v2038_v14  ;;  %v383_v41 = vperm.slane %v377_v37, %v2038_v14  ;;  %v2122_v42 = vsel %vm114_vm0, 0.0, %v524_v12 }
  0x9e   :  { %v602_v43 = vrot.slane %v2117_v39, 4  ;;  %v365_v46 = vsel %vm114_vm0, %v364_v34, %v2012_v2  ;;  %v379_v36 = vsel %vm114_vm0, %v2036_v13, %v378_v38  ;;  %v102_v44 = vpop.permute.xlu1 %101  ;;  %v96_v47 = vpop.permute.xlu0 %95  ;;  %v527_v48 = vsel %vm114_vm0, 0.0, %v2087_v21 }
  0x9f   :  { %v371_v50 = vperm.slane %v365_v46, %v2038_v14  ;;  %v402_v51 = vrot.slane %v375_v40, 4  ;;  %v387_v52 = vperm.slane %v379_v36, %v2038_v14  ;;  %v388_v53 = vrot.slane %v383_v41, 4 }
  0xa0   :  { %v113_v54 = vrot.slane %v102_v44, 4  ;;  %v117_v55 = vsel %vm114_vm0, %v102_v44, %v116_v49  ;;  %v127_v2 = vsel %vm114_vm0, %v126_v57, %v96_v47  ;;  %v128_v56 = vrot.slane %v96_v47, 4 }
  0xa1   :  { %v390_v13 = vrot.slane %v371_v50, 4  ;;  %v389_v58 = vsel %vm114_vm0, %v388_v53, %v371_v50  ;;  %v400_v59 = vrot.slane %v387_v52, 4  ;;  %v403_v60 = vsel %vm114_vm0, %v387_v52, %v402_v51 }
  0xa2   :  { %v395_v61 = vperm.slane %v389_v58, %v2049_v33  ;;  %v411_v63 = vperm.slane %v403_v60, %v2049_v33  ;;  %v115_v0 = vsel %vm114_vm0, %v113_v54, %v2020_v4  ;;  %v125_v1 = vperm.slane %v117_v55, %v2038_v14 }
  0xa3   :  { %v391_v49 = vsel %vm114_vm0, %v383_v41, %v390_v13  ;;  %v401_v57 = vsel %vm114_vm0, %v400_v59, %v375_v40  ;;  %v121_v3 = vperm.slane %v115_v0, %v2038_v14  ;;  %v129_v5 = vsel %vm114_vm0, %v2057_v45, %v128_v56 }
  0xa4   :  { %v399_v7 = vperm.slane %v391_v49, %v2049_v33  ;;  %v2151_v8 = vperm.slane %v401_v57, %v2049_v33  ;;  %v412_v9 = vrot.slane %v395_v61, 4  ;;  %v2153_v10 = vrot.slane %v411_v63, 4 }
  0xa5   :  { %v140_v4 = vrot.slane %v121_v3, 4  ;;  %v152_v11 = vrot.slane %v125_v1, 4  ;;  %v133_v12 = vperm.slane %v127_v2, %v2038_v14  ;;  %v137_v16 = vperm.slane %v129_v5, %v2038_v14 }
  0xa6   :  { %v2158_v17 = vsel %vm114_vm0, 0.0, %v412_v9  ;;  %v414_v18 = vrot.slane %v399_v7, 4  ;;  %v416_v45 = vrot.slane %v2151_v8, 4  ;;  %v2163_v19 = vsel %vm114_vm0, 0.0, %v2153_v10 }
  0xa7   :  { %v548_v20 = vrot.slane %v2163_v19, 4  ;;  %v138_v24 = vrot.slane %v133_v12, 4  ;;  %v141_v34 = vsel %vm114_vm0, %v133_v12, %v140_v4  ;;  %v150_v35 = vrot.slane %v137_v16, 4 }
  0xa8   :  { %v2168_v37 = vsel %vm114_vm0, 0.0, %v414_v18  ;;  %v2171_v38 = vsel %vm114_vm0, %v414_v18, %v395_v61  ;;  %v149_v40 = vperm.slane %v141_v34, %v2049_v33  ;;  %v153_v41 = vsel %vm114_vm0, %v137_v16, %v152_v11  ;;  %v98_v61 = vpop.permute.xlu0 %97 }
  0xa9   :  { %v537_v46 = vrot.slane %v2168_v37, 4  ;;  %v139_v36 = vsel %vm114_vm0, %v138_v24, %v121_v3  ;;  %v151_v44 = vsel %vm114_vm0, %v150_v35, %v125_v1  ;;  %v161_v47 = vperm.slane %v153_v41, %v2049_v33 }
  0xaa   :  { %v145_v50 = vperm.slane %v139_v36, %v2049_v33  ;;  %v2181_v51 = vperm.slane %v151_v44, %v2049_v33  ;;  %v164_v52 = vrot.slane %v149_v40, 4  ;;  %v640_v53 = vsel %vm114_vm0, %v2087_v21, %v2073_v62  ;;  %v110_v62 = vpop.permute.xlu2 %109 }
  0xab   :  { %v2186_v54 = vrot.slane %v161_v47, 4  ;;  %v644_v55 = vperm.slane %v640_v53, %v2038_v14  ;;  %v645_v2 = vrot.slane %v527_v48, 4  ;;  %v657_v56 = vsel %vm114_vm0, %v656_v27, %v2083_v15  ;;  %v104_v27 = vpop.permute.xlu1 %103 }
  0xac   :  { %v162_v13 = vrot.slane %v145_v50, 4  ;;  %v2194_v58 = vsel %vm114_vm0, 0.0, %v164_v52  ;;  %v166_v59 = vrot.slane %v2181_v51, 4  ;;  %v2198_v60 = vsel %vm114_vm0, %v164_v52, %v145_v50 }
  0xad   :  { %v2202_v21 = vsel %vm114_vm0, 0.0, %v2186_v54  ;;  %v231_v48 = vrot.slane %v2194_v58, 4  ;;  %v646_v22 = vsel %vm114_vm0, %v645_v2, %v2122_v42  ;;  %v661_v15 = vperm.slane %v657_v56, %v2038_v14 }
  0xae   :  { %v2209_v63 = vsel %vm114_vm0, 0.0, %v162_v13  ;;  %v242_v0 = vrot.slane %v2202_v21, 4  ;;  %v650_v1 = vperm.slane %v646_v22, %v2038_v14  ;;  %v664_v49 = vrot.slane %v644_v55, 4 }
  0xaf   :  { %v676_v57 = vrot.slane %v2097_v26, 4  ;;  %v182_v3 = vrot.slane %v110_v62, 4  ;;  %v172_v5 = vrot.slane %v2028_v6, 4  ;;  %v170_v7 = vrot.slane %v104_v27, 4 }
  0xb0   :  { %v665_v42 = vsel %vm114_vm0, %v650_v1, %v664_v49  ;;  %v184_v9 = vrot.slane %v98_v61, 4  ;;  %v662_v4 = vrot.slane %v650_v1, 4  ;;  %v674_v2 = vrot.slane %v661_v15, 4 }
  0xb1   :  { %v673_v11 = vperm.slane %v665_v42, %v2049_v33  ;;  %v677_v12 = vsel %vm114_vm0, %v661_v15, %v676_v57  ;;  %v173_v16 = vsel %vm114_vm0, %v104_v27, %v172_v5  ;;  %v183_v18 = vsel %vm114_vm0, %v182_v3, %v98_v61 }
  0xb2   :  { %v685_v24 = vperm.slane %v677_v12, %v2049_v33  ;;  %v171_v34 = vsel %vm114_vm0, %v170_v7, %v2028_v6  ;;  %v181_v35 = vperm.slane %v173_v16, %v2038_v14  ;;  %v185_v40 = vsel %vm114_vm0, %v110_v62, %v184_v9 }
  0xb3   :  { %v177_v41 = vperm.slane %v171_v34, %v2038_v14  ;;  %v189_v36 = vperm.slane %v183_v18, %v2038_v14  ;;  %v193_v44 = vperm.slane %v185_v40, %v2038_v14  ;;  %v663_v47 = vsel %vm114_vm0, %v662_v4, %v644_v55 }
  0xb4   :  { %v690_v50 = vrot.slane %v685_v24, 4  ;;  %v208_v52 = vrot.slane %v181_v35, 4  ;;  %v669_v53 = vperm.slane %v663_v47, %v2049_v33  ;;  %v692_v22 = vrot.slane %v673_v11, 4 }
  0xb5   :  { %v196_v56 = vrot.slane %v177_v41, 4  ;;  %v194_v13 = vrot.slane %v189_v36, 4  ;;  %v206_v6 = vrot.slane %v193_v44, 4  ;;  %v675_v61 = vsel %vm114_vm0, %v674_v2, %v2097_v26 }
  0xb6   :  { %v691_v27 = vsel %vm114_vm0, %v690_v50, %v673_v11  ;;  %v209_v62 = vsel %vm114_vm0, %v193_v44, %v208_v52  ;;  %v688_v1 = vrot.slane %v669_v53, 4  ;;  %v681_v26 = vperm.slane %v675_v61, %v2049_v33 }
  0xb7   :  { %1735 = vmatpush.xpose.msk.msra.mxu2 %vm1054_vm1, %v691_v27  ;;  %v195_v55 = vsel %vm114_vm0, %v194_v13, %v177_v41  ;;  %v197_v49 = vsel %vm114_vm0, %v189_v36, %v196_v56  ;;  %v207_v15 = vsel %vm114_vm0, %v206_v6, %v181_v35  ;;  %v217_v57 = vperm.slane %v209_v62, %v2049_v33 }
  0xb8   :  { %v201_v3 = vperm.slane %v195_v55, %v2049_v33  ;;  %v205_v5 = vperm.slane %v197_v49, %v2049_v33  ;;  %v2242_v42 = vperm.slane %v207_v15, %v2049_v33  ;;  %v693_v9 = vsel %vm114_vm0, %v685_v24, %v692_v22 }
  0xb9   :  { %v2245_v7 = vrot.slane %v217_v57, 4  ;;  %v473_v4 = vsel %vm114_vm0, 0.0, %v472_v29  ;;  %v590_v11 = vperm.slane %v2110_v31, %v2038_v14  ;;  %v686_v34 = vrot.slane %v681_v26, 4  ;;  %1740 = vmatpush.xpose.msk.msra.mxu3 %vm1054_vm1, %v693_v9 }
  0xba   :  { %v218_v12 = vrot.slane %v201_v3, 4  ;;  %v220_v16 = vrot.slane %v205_v5, 4  ;;  %v222_v18 = vrot.slane %v2242_v42, 4  ;;  %v689_v24 = vsel %vm114_vm0, %v681_v26, %v688_v1 }
  0xbb   :  { %v2257_v35 = vsel %vm114_vm0, 0.0, %v2245_v7  ;;  %v592_v29 = vsel %vm114_vm0, %v591_v32, %v2101_v23  ;;  %v597_v31 = vsel %vm114_vm0, %v2107_v30, %v2094_v25  ;;  %1730 = vmatpush.xpose.msk.msra.mxu1 %vm1054_vm1, %v689_v24  ;;  %v687_v23 = vsel %vm114_vm0, %v686_v34, %v669_v53 }
  0xbc   :  { %v2268_v40 = vsel %vm114_vm0, 0.0, %v218_v12  ;;  %v2271_v41 = vsel %vm114_vm0, 0.0, %v220_v16  ;;  %v2274_v36 = vsel %vm114_vm0, %v220_v16, %v201_v3  ;;  %v296_v44 = vrot.slane %v2257_v35, 4  ;;  %1725 = vmatpush.xpose.msk.msra.mxu0 %vm1054_vm1, %v687_v23 }
  0xbd   :  { %v285_v28 = vrot.slane %v2271_v41, 4  ;;  %v596_v32 = vperm.slane %v592_v29, %v2038_v14  ;;  %v601_v25 = vperm.slane %v597_v31, %v2038_v14  ;;  %v603_v30 = vsel %vm114_vm0, %v602_v43, %v473_v4 }
  0xbe   :  { %v610_v47 = vrot.slane %v590_v11, 4  ;;  %v417_v50 = vsel %vm114_vm0, 0.0, %v416_v45  ;;  %v536_v52 = vperm.slane %v2171_v38, %v2038_v14  ;;  %v607_v53 = vperm.slane %v603_v30, %v2038_v14 }
  0xbf   :  { %v622_v2 = vrot.slane %v601_v25, 4  ;;  %v608_v56 = vrot.slane %v596_v32, 4  ;;  %v538_v13 = vsel %vm114_vm0, %v537_v46, %v2158_v17  ;;  %v543_v45 = vsel %vm114_vm0, %v2153_v10, %v2151_v8 }
  0xc0   :  { %v611_v39 = vsel %vm114_vm0, %v596_v32, %v610_v47  ;;  %v542_v43 = vperm.slane %v538_v13, %v2038_v14  ;;  %v549_v38 = vsel %vm114_vm0, %v548_v20, %v417_v50  ;;  %v620_v27 = vrot.slane %v607_v53, 4 }
  0xc1   :  { %v619_v6 = vperm.slane %v611_v39, %v2049_v33  ;;  %v623_v22 = vsel %vm114_vm0, %v607_v53, %v622_v2  ;;  %v609_v37 = vsel %vm114_vm0, %v608_v56, %v590_v11  ;;  %v547_v62 = vperm.slane %v543_v45, %v2038_v14 }
  0xc2   :  { %v631_v17 = vperm.slane %v623_v22, %v2049_v33  ;;  %v615_v46 = vperm.slane %v609_v37, %v2049_v33  ;;  %v553_v61 = vperm.slane %v549_v38, %v2038_v14  ;;  %v621_v8 = vsel %vm114_vm0, %v620_v27, %v601_v25 }
  0xc3   :  { %v638_v10 = vrot.slane %v619_v6, 4  ;;  %v556_v19 = vrot.slane %v536_v52, 4  ;;  %v554_v20 = vrot.slane %v542_v43, 4  ;;  %v627_v55 = vperm.slane %v621_v8, %v2049_v33 }
  0xc4   :  { %v636_v1 = vrot.slane %v631_v17, 4  ;;  %v634_v49 = vrot.slane %v615_v46, 4  ;;  %v568_v15 = vrot.slane %v547_v62, 4  ;;  %v566_v26 = vrot.slane %v553_v61, 4 }
  0xc5   :  { %v639_v57 = vsel %vm114_vm0, %v631_v17, %v638_v10  ;;  %v557_v3 = vsel %vm114_vm0, %v542_v43, %v556_v19  ;;  %v555_v5 = vsel %vm114_vm0, %v554_v20, %v536_v52  ;;  %v632_v4 = vrot.slane %v627_v55, 4 }
  0xc6   :  { %v637_v9 = vsel %vm114_vm0, %v636_v1, %v619_v6  ;;  %1741 = vmatpush.xpose.msk.msra.mxu3 %vm1054_vm1, %v639_v57  ;;  %v635_v11 = vsel %vm114_vm0, %v627_v55, %v634_v49  ;;  %v565_v12 = vperm.slane %v557_v3, %v2049_v33  ;;  %v569_v16 = vsel %vm114_vm0, %v553_v61, %v568_v15  ;;  %v87_v1 = vld [vmem:[#allocation7 + $0x8] sm:$0xff]  ;;  %v88_v55 = vld [vmem:[#allocation7 + $0x10] sm:$0xff] }
  0xc7   :  { %1736 = vmatpush.xpose.msk.msra.mxu2 %vm1054_vm1, %v637_v9  ;;  %1731 = vmatpush.xpose.msk.msra.mxu1 %vm1054_vm1, %v635_v11  ;;  %v561_v34 = vperm.slane %v555_v5, %v2049_v33  ;;  %v567_v24 = vsel %vm114_vm0, %v566_v26, %v547_v62  ;;  %v167_v29 = vsel %vm114_vm0, 0.0, %v166_v59  ;;  %v633_v31 = vsel %vm114_vm0, %v632_v4, %v615_v46 }
  0xc8   :  { %v577_v23 = vperm.slane %v569_v16, %v2049_v33  ;;  %v573_v32 = vperm.slane %v567_v24, %v2049_v33  ;;  %v584_v25 = vrot.slane %v565_v12, 4  ;;  %1726 = vmatpush.xpose.msk.msra.mxu0 %vm1054_vm1, %v633_v31  ;;  %v230_v47 = vperm.slane %v2198_v60, %v2038_v14 }
  0xc9   :  { %v580_v30 = vrot.slane %v561_v34, 4  ;;  %v232_v50 = vsel %vm114_vm0, %v231_v48, %v2209_v63  ;;  %v237_v59 = vsel %vm114_vm0, %v2186_v54, %v2181_v51  ;;  %v243_v58 = vsel %vm114_vm0, %v242_v0, %v167_v29 }
  0xca   :  { %v582_v52 = vrot.slane %v577_v23, 4  ;;  %v578_v53 = vrot.slane %v573_v32, 4  ;;  %v585_v2 = vsel %vm114_vm0, %v577_v23, %v584_v25  ;;  %v236_v56 = vperm.slane %v232_v50, %v2038_v14 }
  0xcb   :  { %1742 = vmatpush.xpose.msk.msra.mxu3 %vm1054_vm1, %v585_v2  ;;  %v581_v13 = vsel %vm114_vm0, %v573_v32, %v580_v30  ;;  %v241_v60 = vperm.slane %v237_v59, %v2038_v14  ;;  %v250_v48 = vrot.slane %v230_v47, 4  ;;  %v247_v54 = vperm.slane %v243_v58, %v2038_v14 }
  0xcc   :  { %v583_v63 = vsel %vm114_vm0, %v582_v52, %v565_v12  ;;  %v579_v51 = vsel %vm114_vm0, %v578_v53, %v561_v34  ;;  %1732 = vmatpush.xpose.msk.msra.mxu1 %vm1054_vm1, %v581_v13  ;;  %v248_v39 = vrot.slane %v236_v56, 4  ;;  %v223_v21 = vsel %vm114_vm0, 0.0, %v222_v18 }
  0xcd   :  { %1737 = vmatpush.xpose.msk.msra.mxu2 %vm1054_vm1, %v583_v63  ;;  %1727 = vmatpush.xpose.msk.msra.mxu0 %vm1054_vm1, %v579_v51  ;;  %v251_v43 = vsel %vm114_vm0, %v236_v56, %v250_v48  ;;  %v262_v45 = vrot.slane %v241_v60, 4  ;;  %v284_v0 = vperm.slane %v2274_v36, %v2038_v14  ;;  %v260_v22 = vrot.slane %v247_v54, 4 }
  0xce   :  { %v259_v38 = vperm.slane %v251_v43, %v2049_v33  ;;  %v249_v6 = vsel %vm114_vm0, %v248_v39, %v230_v47  ;;  %v286_v37 = vsel %vm114_vm0, %v285_v28, %v2268_v40  ;;  %v291_v18 = vsel %vm114_vm0, %v2245_v7, %v2242_v42 }
  0xcf   :  { %v263_v27 = vsel %vm114_vm0, %v247_v54, %v262_v45  ;;  %v255_v17 = vperm.slane %v249_v6, %v2049_v33  ;;  %v290_v46 = vperm.slane %v286_v37, %v2038_v14  ;;  %v261_v62 = vsel %vm114_vm0, %v260_v22, %v241_v60  ;;  %v2411_v45 = vld [vmem:[#allocation8] sm:$0xff] }
  0xd0   :  { %v271_v36 = vperm.slane %v263_v27, %v2049_v33  ;;  %v278_v61 = vrot.slane %v259_v38, 4  ;;  %v295_v8 = vperm.slane %v291_v18, %v2038_v14  ;;  %v267_v41 = vperm.slane %v261_v62, %v2049_v33  ;;  %v2419_v62 = vld [vmem:[#allocation8 + $0x8] sm:$0xff] }
  0xd1   :  { %v274_v40 = vrot.slane %v255_v17, 4  ;;  %v297_v28 = vsel %vm114_vm0, %v296_v44, %v223_v21  ;;  %v304_v10 = vrot.slane %v284_v0, 4  ;;  %v302_v3 = vrot.slane %v290_v46, 4 }
  0xd2   :  { %v276_v19 = vrot.slane %v271_v36, 4  ;;  %v279_v20 = vsel %vm114_vm0, %v271_v36, %v278_v61  ;;  %v301_v42 = vperm.slane %v297_v28, %v2038_v14  ;;  %v316_v7 = vrot.slane %v295_v8, 4 }
  0xd3   :  { %v272_v49 = vrot.slane %v267_v41, 4  ;;  %1743 = vmatmul.msk.f32.vlgmr.msra.gmra.mxu3 %vm1054_vm1, %v279_v20  ;;  %v275_v15 = vsel %vm114_vm0, %v267_v41, %v274_v40  ;;  %v305_v57 = vsel %vm114_vm0, %v290_v46, %v304_v10  ;;  %v303_v11 = vsel %vm114_vm0, %v302_v3, %v284_v0 }
  0xd4   :  { %v277_v35 = vsel %vm114_vm0, %v276_v19, %v259_v38  ;;  %1733 = vmatmul.msk.f32.vlgmr.msra.gmra.mxu1 %vm1054_vm1, %v275_v15  ;;  %v313_v44 = vperm.slane %v305_v57, %v2049_v33  ;;  %v317_v5 = vsel %vm114_vm0, %v301_v42, %v316_v7  ;;  %v314_v26 = vrot.slane %v301_v42, 4 }
  0xd5   :  { %1738 = vmatmul.msk.f32.vlgmr.msra.gmra.mxu2 %vm1054_vm1, %v277_v35  ;;  %v273_v9 = vsel %vm114_vm0, %v272_v49, %v255_v17  ;;  %v325_v4 = vperm.slane %v317_v5, %v2049_v33  ;;  %v1775_v12 = vpack.i.bf16 %v87_v1, %v88_v55  ;;  %v309_v16 = vperm.slane %v303_v11, %v2049_v33 }
  0xd6   :  { %1728 = vmatmul.msk.f32.vlgmr.msra.gmra.mxu0 %vm1054_vm1, %v273_v9  ;;  %v315_v34 = vsel %vm114_vm0, %v314_v26, %v295_v8  ;;  %v332_v24 = vrot.slane %v313_v44, 4  ;;  %v782_v59 = vrot.slane %v87_v1, 4  ;;  %v838_v52 = vrot.slane %v88_v55, 4 }
  0xd7   :  { %v330_v29 = vrot.slane %v325_v4, 4  ;;  %v321_v31 = vperm.slane %v315_v34, %v2049_v33  ;;  %1776 = vrot.lane.b32.xlu0 %v1775_v12, %s1946_s3  ;;  %v328_v32 = vrot.slane %v309_v16, 4  ;;  %1766 = vrot.lane.b32.xlu1 %v1775_v12, %s1947_s8  ;;  %vm1207_vm2 = vcmp.eq.s32.totalorder %v2411_v45, 0 }
  0xd8   :  { %v333_v23 = vsel %vm114_vm0, %v325_v4, %v332_v24  ;;  %1771 = vrot.lane.b32.xlu2 %v1775_v12, %s1948_s9  ;;  %vm1208_vm4 = vcmp.eq.s32.totalorder %v2419_v62, 0 }
  0xd9   :  { %v326_v25 = vrot.slane %v321_v31, 4  ;;  %v331_v30 = vsel %vm114_vm0, %v330_v29, %v313_v44  ;;  %v329_v47 = vsel %vm114_vm0, %v321_v31, %v328_v32 }
  0xdb   :  { %v327_v50 = vsel %vm114_vm0, %v326_v25, %v309_v16  ;;  %1744 = vmatmul.msk.f32.gmra.mxu3 %vm1054_vm1, %v333_v23 }
  0xdc   :  { %1734 = vmatmul.msk.f32.gmra.mxu1 %vm1054_vm1, %v329_v47 }
  0xdd   :  { %1739 = vmatmul.msk.f32.gmra.mxu2 %vm1054_vm1, %v331_v30 }
  0xde   :  { %1729 = vmatmul.msk.f32.gmra.mxu0 %vm1054_vm1, %v327_v50 }
 0x132   :  { %v1772_v53 = vpop.permute.xlu2 %1771 }
 0x133   :  { %v1774_v2 = vunpack.i.h.bf16 %v1772_v53  ;;  %v1773_v56 = vunpack.i.l.bf16 %v1772_v53 }
 0x135   :  { %v780_v13 = vrot.slane %v1774_v2, 4  ;;  %v783_v60 = vsel %vm114_vm0, %v1774_v2, %v782_v59  ;;  %v836_v58 = vrot.slane %v1773_v56, 4  ;;  %v839_v48 = vsel %vm114_vm0, %v1773_v56, %v838_v52 }
 0x136   :  { %v791_v51 = vperm.slane %v783_v60, %v2038_v14  ;;  %v847_v27 = vperm.slane %v839_v48, %v2038_v14 }
 0x137   :  { %v781_v21 = vsel %vm114_vm0, %v780_v13, %v87_v1  ;;  %v837_v0 = vsel %vm114_vm0, %v836_v58, %v88_v55 }
 0x138   :  { %v787_v22 = vperm.slane %v781_v21, %v2038_v14  ;;  %v843_v37 = vperm.slane %v837_v0, %v2038_v14  ;;  %v818_v8 = vrot.slane %v791_v51, 4  ;;  %v874_v55 = vrot.slane %v847_v27, 4 }
 0x13a   :  { %v806_v61 = vrot.slane %v787_v22, 4  ;;  %v862_v1 = vrot.slane %v843_v37, 4 }
 0x149   :  { %v1777_v63 = vpop.permute.xlu0 %1776  ;;  %v1767_v43 = vpop.permute.xlu1 %1766 }
 0x14a   :  { %v1779_v54 = vunpack.i.h.bf16 %v1777_v63  ;;  %v1778_v39 = vunpack.i.l.bf16 %v1777_v63  ;;  %v1769_v38 = vunpack.i.h.bf16 %v1767_v43  ;;  %v1768_v6 = vunpack.i.l.bf16 %v1767_v43 }
 0x14c   :  { %v792_v17 = vrot.slane %v1779_v54, 4  ;;  %v848_v46 = vrot.slane %v1778_v39, 4  ;;  %v794_v18 = vrot.slane %v1769_v38, 4  ;;  %v850_v36 = vrot.slane %v1768_v6, 4 }
 0x14e   :  { %v793_v41 = vsel %vm114_vm0, %v792_v17, %v1769_v38  ;;  %v795_v40 = vsel %vm114_vm0, %v1779_v54, %v794_v18  ;;  %v849_v28 = vsel %vm114_vm0, %v848_v46, %v1768_v6  ;;  %v851_v10 = vsel %vm114_vm0, %v1778_v39, %v850_v36 }
 0x14f   :  { %v799_v19 = vperm.slane %v793_v41, %v2038_v14  ;;  %v803_v20 = vperm.slane %v795_v40, %v2038_v14  ;;  %v855_v42 = vperm.slane %v849_v28, %v2038_v14  ;;  %v859_v49 = vperm.slane %v851_v10, %v2038_v14 }
 0x151   :  { %v1125_v7 = vpop.f32.mrf.mxu1  ;;  %v804_v57 = vrot.slane %v799_v19, 4  ;;  %v807_v3 = vsel %vm114_vm0, %v799_v19, %v806_v61  ;;  %v816_v35 = vrot.slane %v803_v20, 4  ;;  %v819_v9 = vsel %vm114_vm0, %v803_v20, %v818_v8 }
 0x152   :  { %v2432_v15 = vsel %vm1207_vm2, -32767.0, %v1125_v7  ;;  %v815_v26 = vperm.slane %v807_v3, %v2049_v33  ;;  %v860_v4 = vrot.slane %v855_v42, 4  ;;  %v827_v34 = vperm.slane %v819_v9, %v2049_v33 }
 0x153   :  { %v1087_v44 = vpop.f32.mrf.mxu0  ;;  %v1228_v5 = vsel %vm1221_vm3, %v2432_v15, -inf  ;;  %v805_v12 = vsel %vm114_vm0, %v804_v57, %v787_v22  ;;  %v817_v16 = vsel %vm114_vm0, %v816_v35, %v791_v51  ;;  %v863_v30 = vsel %vm114_vm0, %v855_v42, %v862_v1 }
 0x154   :  { %v2441_v11 = vsel %vm1207_vm2, -32767.0, %v1087_v44  ;;  %1229 = vmax.xlane.f32.xlu0 %v1228_v5  ;;  %v811_v29 = vperm.slane %v805_v12, %v2049_v33  ;;  %v830_v31 = vrot.slane %v815_v26, 4  ;;  %v861_v23 = vsel %vm114_vm0, %v860_v4, %v843_v37 }
 0x155   :  { %v1222_v24 = vsel %vm1221_vm3, %v2441_v11, -inf  ;;  %v2450_v25 = vrot.slane %v827_v34, 4  ;;  %v867_v47 = vperm.slane %v861_v23, %v2049_v33  ;;  %v872_v50 = vrot.slane %v859_v49, 4 }
 0x156   :  { %1223 = vmax.xlane.f32.xlu2 %v1222_v24  ;;  %v1201_v32 = vpop.f32.mrf.mxu3  ;;  %v828_v52 = vrot.slane %v811_v29, 4  ;;  %v831_v53 = vsel %vm114_vm0, 0.0, %v830_v31  ;;  %v871_v2 = vperm.slane %v863_v30, %v2049_v33  ;;  %v875_v48 = vsel %vm114_vm0, %v859_v49, %v874_v55 }
 0x157   :  { %v2456_v59 = vsel %vm1207_vm2, -32767.0, %v1201_v32  ;;  %v835_v60 = vsel %vm114_vm0, 0.0, %v2450_v25  ;;  %v873_v58 = vsel %vm114_vm0, %v872_v50, %v847_v27  ;;  %v883_v54 = vperm.slane %v875_v48, %v2049_v33 }
 0x158   :  { %v1163_v56 = vpop.f32.mrf.mxu2  ;;  %v1240_v13 = vsel %vm1221_vm3, %v2456_v59, -inf  ;;  %v884_v39 = vrot.slane %v867_v47, 4  ;;  %v886_v43 = vrot.slane %v871_v2, 4  ;;  %v951_v38 = vrot.slane %v831_v53, 4 }
 0x159   :  { %v2468_v63 = vsel %vm1207_vm2, -32767.0, %v1163_v56  ;;  %1241 = vmax.xlane.f32.xlu1 %v1240_v13  ;;  %v1128_v51 = vpop.f32.mrf.mxu1  ;;  %v962_v6 = vrot.slane %v835_v60, 4  ;;  %v890_v27 = vrot.slane %v883_v54, 4  ;;  %v879_v17 = vperm.slane %v873_v58, %v2049_v33 }
 0x15a   :  { %v2473_v21 = vsel %vm1208_vm4, -32767.0, %v1128_v51  ;;  %v1234_v0 = vsel %vm1221_vm3, %v2468_v63, -inf  ;;  %v887_v37 = vsel %vm114_vm0, 0.0, %v886_v43  ;;  %v885_v36 = vsel %vm114_vm0, 0.0, %v884_v39 }
 0x15b   :  { %v1090_v22 = vpop.f32.mrf.mxu0  ;;  %v1231_v45 = vsel %vm1221_vm3, %v2473_v21, -inf  ;;  %v1005_v18 = vrot.slane %v887_v37, 4  ;;  %v1000_v61 = vsel %vm114_vm0, %v886_v43, %v867_v47  ;;  %v891_v41 = vsel %vm114_vm0, 0.0, %v890_v27 }
 0x15c   :  { %v2483_v46 = vsel %vm1208_vm4, -32767.0, %v1090_v22  ;;  %1235 = vmax.xlane.f32.xlu0 %v1234_v0  ;;  %v888_v40 = vrot.slane %v879_v17, 4  ;;  %v1004_v28 = vperm.slane %v1000_v61, %v2038_v14  ;;  %v1016_v19 = vrot.slane %v891_v41, 4 }
 0x15d   :  { %v1225_v8 = vsel %vm1221_vm3, %v2483_v46, -inf  ;;  %v1006_v20 = vsel %vm114_vm0, %v1005_v18, %v885_v36  ;;  %v1011_v42 = vsel %vm114_vm0, %v890_v27, %v879_v17  ;;  %v823_v7 = vperm.slane %v817_v16, %v2049_v33 }
 0x15e   :  { %1226 = vmax.xlane.f32.xlu2 %v1225_v8  ;;  %v1204_v10 = vpop.f32.mrf.mxu3  ;;  %v889_v55 = vsel %vm114_vm0, 0.0, %v888_v40  ;;  %v1010_v49 = vperm.slane %v1006_v20, %v2038_v14  ;;  %v1015_v57 = vperm.slane %v1011_v42, %v2038_v14  ;;  %v829_v5 = vsel %vm114_vm0, 0.0, %v828_v52 }
 0x15f   :  { %v2496_v1 = vsel %vm1208_vm4, -32767.0, %v1204_v10  ;;  %v1017_v44 = vsel %vm114_vm0, %v1016_v19, %v889_v55  ;;  %v832_v26 = vrot.slane %v823_v7, 4  ;;  %v946_v16 = vsel %vm114_vm0, %v830_v31, %v811_v29 }
 0x160   :  { %v1166_v3 = vpop.f32.mrf.mxu2  ;;  %v1243_v35 = vsel %vm1221_vm3, %v2496_v1, -inf  ;;  %v1021_v4 = vperm.slane %v1017_v44, %v2038_v14  ;;  %v1022_v12 = vrot.slane %v1010_v49, 4  ;;  %v950_v23 = vperm.slane %v946_v16, %v2038_v14  ;;  %v2546_v44 = vld [vmem:[#allocation7] sm:$0xff] }
 0x161   :  { %v2507_v9 = vsel %vm1208_vm4, -32767.0, %v1166_v3  ;;  %1244 = vmax.xlane.f32.xlu1 %v1243_v35  ;;  %v833_v24 = vsel %vm114_vm0, 0.0, %v832_v26  ;;  %v952_v32 = vsel %vm114_vm0, %v951_v38, %v829_v5  ;;  %v957_v50 = vsel %vm114_vm0, %v2450_v25, %v823_v7 }
 0x162   :  { %v1237_v34 = vsel %vm1221_vm3, %v2507_v9, -inf  ;;  %v1023_v30 = vsel %vm114_vm0, %v1022_v12, %v1004_v28  ;;  %v1034_v62 = vrot.slane %v1021_v4, 4  ;;  %v956_v47 = vperm.slane %v952_v32, %v2038_v14 }
 0x163   :  { %v1029_v29 = vperm.slane %v1023_v30, %v2049_v33  ;;  %v961_v31 = vperm.slane %v957_v50, %v2038_v14  ;;  %v963_v52 = vsel %vm114_vm0, %v962_v6, %v833_v24  ;;  %v1024_v53 = vrot.slane %v1004_v28, 4 }
 0x164   :  { %1232 = vmax.xlane.f32.xlu0 %v1231_v45  ;;  %v1035_v2 = vsel %vm114_vm0, %v1034_v62, %v1015_v57  ;;  %v967_v56 = vperm.slane %v963_v52, %v2038_v14  ;;  %v968_v13 = vrot.slane %v956_v47, 4  ;;  %v1036_v60 = vrot.slane %v1015_v57, 4 }
 0x165   :  { %v1041_v58 = vperm.slane %v1035_v2, %v2049_v33  ;;  %v1048_v48 = vrot.slane %v1029_v29, 4  ;;  %v1025_v25 = vsel %vm114_vm0, %v1010_v49, %v1024_v53  ;;  %v970_v51 = vrot.slane %v950_v23, 4 }
 0x166   :  { %1238 = vmax.xlane.f32.xlu2 %v1237_v34  ;;  %v969_v54 = vsel %vm114_vm0, %v968_v13, %v950_v23  ;;  %v980_v39 = vrot.slane %v967_v56, 4  ;;  %v1033_v43 = vperm.slane %v1025_v25, %v2049_v33  ;;  %v1037_v0 = vsel %vm114_vm0, %v1021_v4, %v1036_v60 }
 0x167   :  { %v1049_v38 = vsel %vm114_vm0, %v1041_v58, %v1048_v48  ;;  %v1046_v6 = vrot.slane %v1041_v58, 4  ;;  %v975_v22 = vperm.slane %v969_v54, %v2049_v33  ;;  %v1045_v45 = vperm.slane %v1037_v0, %v2049_v33 }
 0x168   :  { %1382 = vmatpush.msrb.mxu1 %v1049_v38  ;;  %v981_v37 = vsel %vm114_vm0, %v980_v39, %v961_v31  ;;  %v1052_v27 = vrot.slane %v1033_v43, 4  ;;  %v971_v17 = vsel %vm114_vm0, %v956_v47, %v970_v51  ;;  %v982_v18 = vrot.slane %v961_v31, 4 }
 0x169   :  { %v1047_v36 = vsel %vm114_vm0, %v1046_v6, %v1029_v29  ;;  %v987_v61 = vperm.slane %v981_v37, %v2049_v33  ;;  %v994_v8 = vrot.slane %v975_v22, 4  ;;  %v1050_v41 = vrot.slane %v1045_v45, 4 }
 0x16a   :  { %1353 = vmatpush.msrb.mxu0 %v1047_v36  ;;  %v1053_v40 = vsel %vm114_vm0, %v1045_v45, %v1052_v27  ;;  %v979_v28 = vperm.slane %v971_v17, %v2049_v33  ;;  %v983_v10 = vsel %vm114_vm0, %v967_v56, %v982_v18  ;;  %v726_v6 = vrot.slane %v2546_v44, 4 }
 0x16b   :  { %v995_v19 = vsel %vm114_vm0, %v987_v61, %v994_v8  ;;  %1440 = vmatpush.msrb.mxu3 %v1053_v40  ;;  %v992_v20 = vrot.slane %v987_v61, 4  ;;  %v1051_v42 = vsel %vm114_vm0, %v1050_v41, %v1033_v43  ;;  %v991_v7 = vperm.slane %v983_v10, %v2049_v33 }
 0x16c   :  { %1383 = vmatpush.msrb.mxu1 %v995_v19  ;;  %1411 = vmatpush.msrb.mxu2 %v1051_v42  ;;  %v998_v55 = vrot.slane %v979_v28, 4 }
 0x16d   :  { %v993_v49 = vsel %vm114_vm0, %v992_v20, %v975_v22  ;;  %v996_v57 = vrot.slane %v991_v7, 4 }
 0x16e   :  { %1354 = vmatpush.msrb.mxu0 %v993_v49  ;;  %v999_v3 = vsel %vm114_vm0, %v991_v7, %v998_v55 }
 0x16f   :  { %1441 = vmatpush.msrb.mxu3 %v999_v3  ;;  %v997_v35 = vsel %vm114_vm0, %v996_v57, %v979_v28 }
 0x170   :  { %1412 = vmatpush.msrb.mxu2 %v997_v35 }
 0x178   :  { %706 = vrot.lane.b32.xlu0 %v2546_v44, %s1948_s9 }
 0x17a   :  { %697 = vrot.lane.b32.xlu1 %v2546_v44, %s1947_s8 }
 0x17e   :  { %715 = vrot.lane.b32.xlu2 %v2546_v44, %s1946_s3 }
 0x1c7   :  { %v1230_v5 = vpop.xlane.xlu0 %1229 }
 0x1c8   :  { %v1248_v24 = vsub.f32 %v2432_v15, %v1230_v5 }
 0x1c9   :  { %v1224_v26 = vpop.xlane.xlu2 %1223 }
 0x1ca   :  { %v1246_v4 = vsub.f32 %v2441_v11, %v1224_v26  ;;  %v1258_v50 = vmul.f32 1.442695, %v1248_v24 }
 0x1cc   :  { %v1254_v12 = vmul.f32 1.442695, %v1246_v4  ;;  %v1242_v16 = vpop.xlane.xlu1 %1241 }
 0x1cd   :  { %v1252_v34 = vsub.f32 %v2456_v59, %v1242_v16 }
 0x1ce   :  { %1780 = vpow2.f32 %v1254_v12 }
 0x1cf   :  { %v1266_v23 = vmul.f32 1.442695, %v1252_v34  ;;  %v1236_v32 = vpop.xlane.xlu0 %1235 }
 0x1d0   :  { %v1250_v30 = vsub.f32 %v2468_v63, %v1236_v32 }
 0x1d1   :  { %1782 = vpow2.f32 %v1266_v23  ;;  %v1227_v62 = vpop.xlane.xlu2 %1226 }
 0x1d2   :  { %v1262_v47 = vmul.f32 1.442695, %v1250_v30  ;;  %v1247_v48 = vsub.f32 %v2483_v46, %v1227_v62 }
 0x1d4   :  { %v2558_v29 = vpop.eup %1780  ;;  %1784 = vpow2.f32 %v1262_v47  ;;  %v1245_v31 = vpop.xlane.xlu1 %1244  ;;  %v1256_v54 = vmul.f32 1.442695, %v1247_v48 }
 0x1d5   :  { %v1270_v11 = vsel %vm1221_vm3, %v2558_v29, 0.0  ;;  %v1253_v59 = vsub.f32 %v2496_v1, %v1245_v31  ;;  %1786 = vpow2.f32 %v1258_v50 }
 0x1d6   :  { %1271 = vadd.xlane.f32.xlu2 %v1270_v11 }
 0x1d7   :  { %v2563_v52 = vpop.eup %1782  ;;  %v1268_v15 = vmul.f32 1.442695, %v1253_v59  ;;  %v1233_v53 = vpop.xlane.xlu0 %1232 }
 0x1d8   :  { %v1249_v63 = vsub.f32 %v2473_v21, %v1233_v53  ;;  %v1288_v2 = vsel %vm1221_vm3, %v2563_v52, 0.0 }
 0x1d9   :  { %1788 = vpow2.f32 %v1268_v15  ;;  %v1239_v56 = vpop.xlane.xlu2 %1238  ;;  %1289 = vadd.xlane.f32.xlu0 %v1288_v2 }
 0x1da   :  { %v2568_v13 = vpop.eup %1784  ;;  %v1251_v60 = vsub.f32 %v2507_v9, %v1239_v56  ;;  %v1260_v58 = vmul.f32 1.442695, %v1249_v63 }
 0x1db   :  { %v1282_v1 = vsel %vm1221_vm3, %v2568_v13, 0.0  ;;  %v2574_v51 = vpop.eup %1786 }
 0x1dc   :  { %v1264_v25 = vmul.f32 1.442695, %v1251_v60  ;;  %1283 = vadd.xlane.f32.xlu1 %v1282_v1  ;;  %v1276_v39 = vsel %vm1221_vm3, %v2574_v51, 0.0 }
 0x1de   :  { %1790 = vpow2.f32 %v1264_v25 }
 0x1df   :  { %v2576_v21 = vpop.eup %1788  ;;  %1792 = vpow2.f32 %v1260_v58 }
 0x1e0   :  { %v1291_v9 = vsel %vm1221_vm3, %v2576_v21, 0.0  ;;  %1794 = vpow2.f32 %v1256_v54 }
 0x1e1   :  { %1277 = vadd.xlane.f32.xlu0 %v1276_v39  ;;  %1292 = vadd.xlane.f32.xlu2 %v1291_v9  ;;  %v716_v38 = vpop.permute.xlu2 %715 }
 0x1e2   :  { %v736_v45 = vrot.slane %v716_v38, 4 }
 0x1e4   :  { %v2582_v43 = vpop.eup %1790 }
 0x1e5   :  { %v2584_v46 = vpop.eup %1792  ;;  %v1285_v0 = vsel %vm1221_vm3, %v2582_v43, 0.0 }
 0x1e6   :  { %1286 = vadd.xlane.f32.xlu1 %v1285_v0  ;;  %v1279_v22 = vsel %vm1221_vm3, %v2584_v46, 0.0  ;;  %v2591_v37 = vpop.eup %1794 }
 0x1e7   :  { %v1273_v8 = vsel %vm1221_vm3, %v2591_v37, 0.0 }
 0x1e9   :  { %1280 = vadd.xlane.f32.xlu0 %v1279_v22 }
 0x1ea   :  { %v707_v27 = vpop.permute.xlu0 %706 }
 0x1eb   :  { %v724_v17 = vrot.slane %v707_v27, 4  ;;  %v727_v18 = vsel %vm114_vm0, %v707_v27, %v726_v6 }
 0x1ec   :  { %v735_v36 = vperm.slane %v727_v18, %v2038_v14  ;;  %v698_v61 = vpop.permute.xlu1 %697 }
 0x1ed   :  { %v725_v41 = vsel %vm114_vm0, %v724_v17, %v2546_v44  ;;  %v737_v40 = vsel %vm114_vm0, %v736_v45, %v698_v61  ;;  %v738_v28 = vrot.slane %v698_v61, 4 }
 0x1ee   :  { %1274 = vadd.xlane.f32.xlu1 %v1273_v8  ;;  %v731_v10 = vperm.slane %v725_v41, %v2038_v14  ;;  %v762_v19 = vrot.slane %v735_v36, 4  ;;  %v743_v20 = vperm.slane %v737_v40, %v2038_v14 }
 0x1ef   :  { %v739_v42 = vsel %vm114_vm0, %v716_v38, %v738_v28 }
 0x1f0   :  { %v750_v7 = vrot.slane %v731_v10, 4  ;;  %v747_v55 = vperm.slane %v739_v42, %v2038_v14  ;;  %v748_v49 = vrot.slane %v743_v20, 4 }
 0x1f2   :  { %v749_v57 = vsel %vm114_vm0, %v748_v49, %v731_v10  ;;  %v751_v3 = vsel %vm114_vm0, %v743_v20, %v750_v7  ;;  %v760_v35 = vrot.slane %v747_v55, 4  ;;  %v763_v44 = vsel %vm114_vm0, %v747_v55, %v762_v19 }
 0x1f3   :  { %v755_v5 = vperm.slane %v749_v57, %v2049_v33  ;;  %v759_v26 = vperm.slane %v751_v3, %v2049_v33  ;;  %v771_v4 = vperm.slane %v763_v44, %v2049_v33 }
 0x1f4   :  { %v761_v12 = vsel %vm114_vm0, %v760_v35, %v735_v36 }
 0x1f5   :  { %v767_v16 = vperm.slane %v761_v12, %v2049_v33  ;;  %v772_v34 = vrot.slane %v755_v5, 4  ;;  %v774_v24 = vrot.slane %v759_v26, 4  ;;  %v778_v23 = vrot.slane %v771_v4, 4 }
 0x1f7   :  { %v773_v32 = vsel %vm114_vm0, 0.0, %v772_v34  ;;  %v775_v30 = vsel %vm114_vm0, 0.0, %v774_v24  ;;  %v776_v62 = vrot.slane %v767_v16, 4  ;;  %v779_v47 = vsel %vm114_vm0, 0.0, %v778_v23 }
 0x1f8   :  { %v892_v50 = vsel %vm114_vm0, %v774_v24, %v755_v5  ;;  %v897_v31 = vrot.slane %v775_v30, 4  ;;  %v908_v11 = vrot.slane %v779_v47, 4  ;;  %v903_v59 = vsel %vm114_vm0, %v778_v23, %v767_v16 }
 0x1f9   :  { %v777_v15 = vsel %vm114_vm0, 0.0, %v776_v62  ;;  %v896_v53 = vperm.slane %v892_v50, %v2038_v14  ;;  %v907_v63 = vperm.slane %v903_v59, %v2038_v14 }
 0x1fa   :  { %v898_v2 = vsel %vm114_vm0, %v897_v31, %v773_v32  ;;  %v909_v56 = vsel %vm114_vm0, %v908_v11, %v777_v15 }
 0x1fb   :  { %v902_v60 = vperm.slane %v898_v2, %v2038_v14  ;;  %v913_v58 = vperm.slane %v909_v56, %v2038_v14  ;;  %v916_v1 = vrot.slane %v896_v53, 4  ;;  %v928_v48 = vrot.slane %v907_v63, 4 }
 0x1fd   :  { %v914_v25 = vrot.slane %v902_v60, 4  ;;  %v926_v54 = vrot.slane %v913_v58, 4  ;;  %v917_v39 = vsel %vm114_vm0, %v902_v60, %v916_v1  ;;  %v929_v9 = vsel %vm114_vm0, %v913_v58, %v928_v48 }
 0x1fe   :  { %v925_v0 = vperm.slane %v917_v39, %v2049_v33  ;;  %v937_v38 = vperm.slane %v929_v9, %v2049_v33 }
 0x1ff   :  { %v915_v6 = vsel %vm114_vm0, %v914_v25, %v896_v53  ;;  %v927_v22 = vsel %vm114_vm0, %v926_v54, %v907_v63 }
 0x200   :  { %v921_v45 = vperm.slane %v915_v6, %v2049_v33  ;;  %v933_v27 = vperm.slane %v927_v22, %v2049_v33  ;;  %v944_v17 = vrot.slane %v925_v0, 4  ;;  %v942_v18 = vrot.slane %v937_v38, 4 }
 0x202   :  { %v940_v36 = vrot.slane %v921_v45, 4  ;;  %v938_v61 = vrot.slane %v933_v27, 4  ;;  %v945_v8 = vsel %vm114_vm0, %v937_v38, %v944_v17  ;;  %v943_v41 = vsel %vm114_vm0, %v942_v18, %v925_v0 }
 0x203   :  { %1442 = vmatpush.msrb.mxu3 %v945_v8  ;;  %1413 = vmatpush.msrb.mxu2 %v943_v41 }
 0x204   :  { %v941_v40 = vsel %vm114_vm0, %v933_v27, %v940_v36  ;;  %v939_v28 = vsel %vm114_vm0, %v938_v61, %v921_v45 }
 0x205   :  { %1384 = vmatpush.msrb.mxu1 %v941_v40  ;;  %1355 = vmatpush.msrb.mxu0 %v939_v28 }
 0x249   :  { %v1272_v10 = vpop.xlane.xlu2 %1271 }
 0x24a   :  { %1796 = vrcp.f32 %v1272_v10 }
 0x24c   :  { %v1290_v19 = vpop.xlane.xlu0 %1289 }
 0x24d   :  { %1798 = vrcp.f32 %v1290_v19 }
 0x24f   :  { %v1284_v20 = vpop.xlane.xlu1 %1283 }
 0x250   :  { %v1797_v42 = vpop.eup %1796  ;;  %1800 = vrcp.f32 %v1284_v20 }
 0x251   :  { %v1302_v7 = vmul.f32 %v1797_v42, %v1272_v10 }
 0x253   :  { %v1799_v55 = vpop.eup %1798  ;;  %v1310_v49 = vsub.f32 2.0, %v1302_v7 }
 0x254   :  { %v1308_v57 = vmul.f32 %v1799_v55, %v1290_v19  ;;  %v1278_v3 = vpop.xlane.xlu0 %1277  ;;  %v1293_v35 = vpop.xlane.xlu2 %1292 }
 0x255   :  { %v1318_v44 = vmul.f32 %v1797_v42, %v1310_v49  ;;  %1802 = vrcp.f32 %v1278_v3 }
 0x256   :  { %v1801_v5 = vpop.eup %1800  ;;  %v1316_v26 = vsub.f32 2.0, %v1308_v57  ;;  %1804 = vrcp.f32 %v1293_v35 }
 0x257   :  { %v1326_v4 = vmul.f32 %v2558_v29, %v1318_v44  ;;  %v1306_v12 = vmul.f32 %v1801_v5, %v1284_v20 }
 0x258   :  { %v1324_v16 = vmul.f32 %v1799_v55, %v1316_v26 }
 0x259   :  { %v1314_v34 = vsub.f32 2.0, %v1306_v12  ;;  %1745 = vmatmul.msk.f32.vlgmr.msrb.gmra.mxu0 %vm1221_vm3, %v1326_v4  ;;  %v1287_v24 = vpop.xlane.xlu1 %1286 }
 0x25a   :  { %v1332_v23 = vmul.f32 %v2563_v52, %v1324_v16  ;;  %1806 = vrcp.f32 %v1287_v24 }
 0x25b   :  { %v1803_v32 = vpop.eup %1802  ;;  %v1322_v30 = vmul.f32 %v1801_v5, %v1314_v34 }
 0x25c   :  { %v1805_v62 = vpop.eup %1804  ;;  %v1304_v47 = vmul.f32 %v1803_v32, %v1278_v3  ;;  %v1281_v50 = vpop.xlane.xlu0 %1280  ;;  %1751 = vmatmul.msk.f32.vlgmr.msrb.gmra.mxu3 %vm1221_vm3, %v1332_v23 }
 0x25d   :  { %v1330_v31 = vmul.f32 %v2568_v13, %v1322_v30  ;;  %v1309_v11 = vmul.f32 %v1805_v62, %v1293_v35  ;;  %1808 = vrcp.f32 %v1281_v50 }
 0x25e   :  { %v1312_v29 = vsub.f32 2.0, %v1304_v47 }
 0x25f   :  { %v1317_v59 = vsub.f32 2.0, %v1309_v11  ;;  %1749 = vmatmul.msk.f32.vlgmr.msrb.gmra.mxu2 %vm1221_vm3, %v1330_v31 }
 0x260   :  { %v1807_v15 = vpop.eup %1806  ;;  %v1320_v53 = vmul.f32 %v1803_v32, %v1312_v29 }
 0x261   :  { %v1325_v63 = vmul.f32 %v1805_v62, %v1317_v59  ;;  %v1307_v52 = vmul.f32 %v1807_v15, %v1287_v24  ;;  %v1275_v2 = vpop.xlane.xlu1 %1274 }
 0x262   :  { %v1328_v56 = vmul.f32 %v2574_v51, %v1320_v53  ;;  %1810 = vrcp.f32 %v1275_v2 }
 0x263   :  { %v1809_v60 = vpop.eup %1808  ;;  %v1315_v58 = vsub.f32 2.0, %v1307_v52  ;;  %v1333_v1 = vmul.f32 %v2576_v21, %v1325_v63 }
 0x264   :  { %v1305_v48 = vmul.f32 %v1809_v60, %v1281_v50  ;;  %1747 = vmatmul.msk.f32.vlgmr.msrb.gmra.mxu1 %vm1221_vm3, %v1328_v56 }
 0x265   :  { %v1323_v13 = vmul.f32 %v1807_v15, %v1315_v58  ;;  %1752 = vmatmul.msk.f32.gmra.mxu3 %vm1221_vm3, %v1333_v1 }
 0x266   :  { %v1313_v25 = vsub.f32 2.0, %v1305_v48 }
 0x267   :  { %v1331_v54 = vmul.f32 %v2582_v43, %v1323_v13 }
 0x268   :  { %v1811_v39 = vpop.eup %1810  ;;  %v1321_v9 = vmul.f32 %v1809_v60, %v1313_v25 }
 0x269   :  { %v1303_v0 = vmul.f32 %v1811_v39, %v1275_v2  ;;  %1750 = vmatmul.msk.f32.gmra.mxu2 %vm1221_vm3, %v1331_v54 }
 0x26a   :  { %v1329_v51 = vmul.f32 %v2584_v46, %v1321_v9 }
 0x26b   :  { %v1311_v38 = vsub.f32 2.0, %v1303_v0 }
 0x26c   :  { %1748 = vmatmul.msk.f32.gmra.mxu1 %vm1221_vm3, %v1329_v51 }
 0x26d   :  { %v1319_v21 = vmul.f32 %v1811_v39, %v1311_v38 }
 0x26f   :  { %v1327_v6 = vmul.f32 %v2591_v37, %v1319_v21 }
 0x271   :  { %1746 = vmatmul.msk.f32.gmra.mxu0 %vm1221_vm3, %v1327_v6 }
 0x2d6   :  { %v1357_v22 = vpop.f32.mrf.mxu0 }
 0x2d7   :  { %v1452_v17 = vrot.slane %v1357_v22, 4 }
 0x2df   :  { %v1444_v45 = vpop.f32.mrf.mxu3 }
 0x2e0   :  { %v1462_v27 = vrot.slane %v1444_v45, 4 }
 0x2e1   :  { %v1386_v43 = vpop.f32.mrf.mxu1 }
 0x2e2   :  { %v1463_v18 = vsel %vm114_vm0, %v1462_v27, %v1386_v43  ;;  %v1464_v36 = vrot.slane %v1386_v43, 4  ;;  %v1415_v61 = vpop.f32.mrf.mxu2 }
 0x2e3   :  { %v1469_v8 = vperm.slane %v1463_v18, %v2038_v14  ;;  %v1450_v46 = vrot.slane %v1415_v61, 4  ;;  %v1453_v41 = vsel %vm114_vm0, %v1415_v61, %v1452_v17 }
 0x2e4   :  { %v1465_v40 = vsel %vm114_vm0, %v1444_v45, %v1464_v36  ;;  %v1461_v37 = vperm.slane %v1453_v41, %v2038_v14 }
 0x2e5   :  { %v1473_v28 = vperm.slane %v1465_v40, %v2038_v14  ;;  %v1451_v10 = vsel %vm114_vm0, %v1450_v46, %v1357_v22  ;;  %v1474_v19 = vrot.slane %v1469_v8, 4 }
 0x2e6   :  { %v1457_v20 = vperm.slane %v1451_v10, %v2038_v14  ;;  %v1488_v42 = vrot.slane %v1461_v37, 4 }
 0x2e7   :  { %v1486_v7 = vrot.slane %v1473_v28, 4 }
 0x2e8   :  { %v1475_v55 = vsel %vm114_vm0, %v1474_v19, %v1457_v20  ;;  %v1476_v49 = vrot.slane %v1457_v20, 4  ;;  %v1489_v57 = vsel %vm114_vm0, %v1473_v28, %v1488_v42  ;;  %v1447_v3 = vpop.f32.mrf.mxu3 }
 0x2e9   :  { %v1481_v35 = vperm.slane %v1475_v55, %v2049_v33  ;;  %v1487_v44 = vsel %vm114_vm0, %v1486_v7, %v1461_v37  ;;  %v1497_v5 = vperm.slane %v1489_v57, %v2049_v33  ;;  %v1518_v26 = vrot.slane %v1447_v3, 4  ;;  %v1389_v4 = vpop.f32.mrf.mxu1 }
 0x2ea   :  { %v1477_v12 = vsel %vm114_vm0, %v1469_v8, %v1476_v49  ;;  %v1493_v16 = vperm.slane %v1487_v44, %v2049_v33  ;;  %v1520_v34 = vrot.slane %v1389_v4, 4 }
 0x2eb   :  { %v1485_v24 = vperm.slane %v1477_v12, %v2049_v33  ;;  %v1504_v23 = vrot.slane %v1497_v5, 4  ;;  %v1519_v32 = vsel %vm114_vm0, %v1518_v26, %v1389_v4  ;;  %v1498_v30 = vrot.slane %v1481_v35, 4 }
 0x2ec   :  { %v1502_v62 = vrot.slane %v1493_v16, 4  ;;  %v1521_v47 = vsel %vm114_vm0, %v1447_v3, %v1520_v34  ;;  %v1525_v50 = vperm.slane %v1519_v32, %v2038_v14  ;;  %v1418_v31 = vpop.f32.mrf.mxu2 }
 0x2ed   :  { %v1500_v11 = vrot.slane %v1485_v24, 4  ;;  %v1505_v29 = vsel %vm114_vm0, 0.0, %v1504_v23  ;;  %v1573_v59 = vsel %vm114_vm0, %v1504_v23, %v1493_v16  ;;  %v1529_v15 = vperm.slane %v1521_v47, %v2038_v14 }
 0x2ee   :  { %v1503_v53 = vsel %vm114_vm0, 0.0, %v1502_v62  ;;  %v1577_v63 = vperm.slane %v1573_v59, %v2038_v14  ;;  %v1578_v52 = vrot.slane %v1505_v29, 4  ;;  %v1530_v2 = vrot.slane %v1525_v50, 4  ;;  %v1360_v56 = vpop.f32.mrf.mxu0 }
 0x2ef   :  { %v1501_v60 = vsel %vm114_vm0, 0.0, %v1500_v11  ;;  %v1542_v58 = vrot.slane %v1529_v15, 4  ;;  %v1506_v1 = vrot.slane %v1418_v31, 4  ;;  %v1508_v48 = vrot.slane %v1360_v56, 4 }
 0x2f0   :  { %v1579_v13 = vsel %vm114_vm0, %v1578_v52, %v1503_v53  ;;  %v1499_v25 = vsel %vm114_vm0, 0.0, %v1498_v30  ;;  %v1562_v54 = vsel %vm114_vm0, %v1500_v11, %v1481_v35  ;;  %v1567_v39 = vrot.slane %v1501_v60, 4 }
 0x2f1   :  { %v1507_v9 = vsel %vm114_vm0, %v1506_v1, %v1360_v56  ;;  %v1509_v0 = vsel %vm114_vm0, %v1418_v31, %v1508_v48  ;;  %v1566_v51 = vperm.slane %v1562_v54, %v2038_v14  ;;  %v1583_v38 = vperm.slane %v1579_v13, %v2038_v14 }
 0x2f2   :  { %v1513_v21 = vperm.slane %v1507_v9, %v2038_v14  ;;  %v1517_v6 = vperm.slane %v1509_v0, %v2038_v14  ;;  %v1568_v22 = vsel %vm114_vm0, %v1567_v39, %v1499_v25  ;;  %v1598_v45 = vrot.slane %v1577_v63, 4 }
 0x2f3   :  { %v1572_v27 = vperm.slane %v1568_v22, %v2038_v14  ;;  %v1586_v17 = vrot.slane %v1566_v51, 4  ;;  %v1596_v43 = vrot.slane %v1583_v38, 4 }
 0x2f4   :  { %v1531_v18 = vsel %vm114_vm0, %v1530_v2, %v1513_v21  ;;  %v1532_v36 = vrot.slane %v1513_v21, 4  ;;  %v1543_v61 = vsel %vm114_vm0, %v1542_v58, %v1517_v6  ;;  %v1544_v8 = vrot.slane %v1517_v6, 4 }
 0x2f5   :  { %v1537_v46 = vperm.slane %v1531_v18, %v2049_v33  ;;  %v1549_v41 = vperm.slane %v1543_v61, %v2049_v33  ;;  %v1587_v40 = vsel %vm114_vm0, %v1572_v27, %v1586_v17  ;;  %v1599_v37 = vsel %vm114_vm0, %v1583_v38, %v1598_v45 }
 0x2f6   :  { %v1533_v28 = vsel %vm114_vm0, %v1525_v50, %v1532_v36  ;;  %v1545_v10 = vsel %vm114_vm0, %v1529_v15, %v1544_v8  ;;  %v1595_v19 = vperm.slane %v1587_v40, %v2049_v33  ;;  %v1607_v20 = vperm.slane %v1599_v37, %v2049_v33 }
 0x2f7   :  { %v1541_v42 = vperm.slane %v1533_v28, %v2049_v33  ;;  %v1553_v7 = vperm.slane %v1545_v10, %v2049_v33  ;;  %v1584_v49 = vrot.slane %v1572_v27, 4  ;;  %v1597_v57 = vsel %vm114_vm0, %v1596_v43, %v1577_v63 }
 0x2f8   :  { %v1612_v55 = vrot.slane %v1607_v20, 4  ;;  %v1554_v3 = vrot.slane %v1537_v46, 4  ;;  %v1558_v44 = vrot.slane %v1549_v41, 4  ;;  %v1603_v12 = vperm.slane %v1597_v57, %v2049_v33 }
 0x2f9   :  { %v1556_v35 = vrot.slane %v1541_v42, 4  ;;  %v1560_v5 = vrot.slane %v1553_v7, 4  ;;  %v1585_v4 = vsel %vm114_vm0, %v1584_v49, %v1566_v51  ;;  %v1614_v16 = vrot.slane %v1595_v19, 4 }
 0x2fa   :  { %v1613_v26 = vsel %vm114_vm0, %v1612_v55, %v1595_v19  ;;  %v1591_v47 = vperm.slane %v1585_v4, %v2049_v33  ;;  %v1608_v50 = vrot.slane %v1603_v12, 4  ;;  %v1555_v31 = vsel %vm114_vm0, 0.0, %v1554_v3 }
 0x2fb   :  { %v1557_v34 = vsel %vm114_vm0, 0.0, %v1556_v35  ;;  %v1561_v24 = vsel %vm114_vm0, 0.0, %v1560_v5  ;;  %v1616_v23 = vsel %vm114_vm0, %v1556_v35, %v1537_v46  ;;  %v1627_v32 = vsel %vm114_vm0, %v1560_v5, %v1549_v41  ;;  %1680 = vrot.lane.b32.xlu0 %v1613_v26, %s1948_s9 }
 0x2fc   :  { %v1621_v30 = vrot.slane %v1557_v34, 4  ;;  %v1632_v62 = vrot.slane %v1561_v24, 4  ;;  %v1559_v11 = vsel %vm114_vm0, 0.0, %v1558_v44  ;;  %v1620_v29 = vperm.slane %v1616_v23, %v2038_v14 }
 0x2fd   :  { %v1631_v59 = vperm.slane %v1627_v32, %v2038_v14  ;;  %v1610_v15 = vrot.slane %v1591_v47, 4  ;;  %v1609_v52 = vsel %vm114_vm0, %v1608_v50, %v1591_v47  ;;  %v1615_v39 = vsel %vm114_vm0, %v1607_v20, %v1614_v16 }
 0x2fe   :  { %v1622_v53 = vsel %vm114_vm0, %v1621_v30, %v1555_v31  ;;  %v1633_v63 = vsel %vm114_vm0, %v1632_v62, %v1559_v11  ;;  %v1640_v60 = vrot.slane %v1620_v29, 4 }
 0x2ff   :  { %v1626_v2 = vperm.slane %v1622_v53, %v2038_v14  ;;  %v1637_v56 = vperm.slane %v1633_v63, %v2038_v14  ;;  %v1652_v58 = vrot.slane %v1631_v59, 4  ;;  %v1611_v1 = vsel %vm114_vm0, %v1603_v12, %v1610_v15 }
 0x300   :  { %1672 = vrot.lane.b32.xlu2 %v1611_v1, %s1946_s3 }
 0x301   :  { %v1641_v48 = vsel %vm114_vm0, %v1626_v2, %v1640_v60  ;;  %v1653_v13 = vsel %vm114_vm0, %v1637_v56, %v1652_v58  ;;  %v1638_v25 = vrot.slane %v1626_v2, 4  ;;  %v1650_v54 = vrot.slane %v1637_v56, 4 }
 0x302   :  { %v1661_v9 = vperm.slane %v1653_v13, %v2049_v33  ;;  %v1649_v51 = vperm.slane %v1641_v48, %v2049_v33 }
 0x303   :  { %1688 = vrot.lane.b32.xlu0 %v1615_v39, %s1947_s8  ;;  %v1639_v14 = vsel %vm114_vm0, %v1638_v25, %v1620_v29  ;;  %v1651_v0 = vsel %vm114_vm0, %v1650_v54, %v1631_v59 }
 0x304   :  { %v1666_v38 = vrot.slane %v1661_v9, 4  ;;  %v1645_v21 = vperm.slane %v1639_v14, %v2049_v33  ;;  %v1657_v6 = vperm.slane %v1651_v0, %v2049_v33  ;;  %v1668_v18 = vrot.slane %v1649_v51, 4 }
 0x306   :  { %v1667_v22 = vsel %vm114_vm0, %v1666_v38, %v1649_v51  ;;  %v1662_v45 = vrot.slane %v1657_v6, 4  ;;  %v1664_v27 = vrot.slane %v1645_v21, 4  ;;  %v1669_v36 = vsel %vm114_vm0, %v1661_v9, %v1668_v18 }
 0x308   :  { %v1665_v17 = vsel %vm114_vm0, %v1657_v6, %v1664_v27  ;;  %v1663_v43 = vsel %vm114_vm0, %v1662_v45, %v1645_v21  ;;  %1682 = vrot.lane.b32.xlu2 %v1667_v22, %s1948_s9 }
 0x309   :  { %1674 = vrot.lane.b32.xlu1 %v1665_v17, %s1946_s3 }
 0x311   :  { %1690 = vrot.lane.b32.xlu1 %v1669_v36, %s1947_s8 }
 0x35a   :  { %v1673_v8 = vpop.permute.xlu2 %1672 }
 0x35b   :  { %v1694_v33 = vsel %vm1054_vm1, %v1609_v52, %v1673_v8 }
 0x362   :  { %v1683_v10 = vpop.permute.xlu2 %1682 }
 0x36d   :  { %v1681_v61 = vpop.permute.xlu0 %1680 }
 0x36e   :  { %v1697_v46 = vsel %vm1696_vm5, %v1694_v33, %v1681_v61 }
 0x375   :  { %v1689_v41 = vpop.permute.xlu0 %1688 }
 0x376   :  { %v1700_v40 = vsel %vm1699_vm6, %v1697_v46, %v1689_v41 }
 0x377   :  { %1702 = vst [vmem:[#allocation10] sm:$0xff] %v1700_v40 }
 0x37b   :  { %v1675_v37 = vpop.permute.xlu1 %1674 }
 0x37c   :  { %v1695_v28 = vsel %vm1054_vm1, %v1663_v43, %v1675_v37 }
 0x37d   :  { %v1698_v20 = vsel %vm1696_vm5, %v1695_v28, %v1683_v10 }
 0x383   :  { %v1691_v19 = vpop.permute.xlu1 %1690 }
 0x384   :  { %v1701_v42 = vsel %vm1699_vm6, %v1698_v20, %v1691_v19 }
 0x385   :  { %1703 = vst [vmem:[#allocation10 + $0x8] sm:$0xff] %v1701_v42 }
 0x386   :  { %1716 = dma.vmem_to_hbm [thread:$0]  %s1709_s11, 256, %s1711_s14, [#allocation4], %s1941_s23, %s1941_s23, %s1942_s24  }
 0x387   :  { %1938 = dma.done.wait [#allocation4], 256  }
 0x388   :  { %1939 = vsyncadd [#allocation4], 4294967040 }
 0x389   :  { %1721 = vsyncpa [#allocation3], 1 }
 0x38a   :  { %1722 = vsyncpa [#allocation6], 1 }
 0x38b   :  { %1723 = vsyncpa [#allocation9], 1 }
 0x38c   :  { %1724 = vsyncpa [#allocation4], 1 }

// kernel: transformer_decoder_block.2
= control target key start
LH: loop header
LB: loop body
LE: loop exit
PB: predicated region body
PF: predicated region fallthrough
CT: control target
= control target key end

     0   :  { %s2055_s0 = inlined_call_operand.hbm [shape: s32[2,16,16], index: 0, kind: input, shape index: {}]   ;;  %s2056_s1 = inlined_call_operand.hbm [shape: f32[2,16,128], index: 1, kind: input, shape index: {}]   ;;  %s2057_s2 = inlined_call_operand.hbm [shape: f32[128,384], index: 2, kind: input, shape index: {}]   ;;  %s2058_s3 = inlined_call_operand.hbm [shape: f32[1,384], index: 3, kind: input, shape index: {}]   ;;  %s2059_s4 = inlined_call_operand.hbm [shape: f32[128,128], index: 4, kind: input, shape index: {}]   ;;  %s2060_s5 = inlined_call_operand.vmem [shape: f32[1,128], index: 5, kind: input, shape index: {}]   ;;  %s2061_s6 = inlined_call_operand.vmem [shape: f32[1,128], index: 6, kind: input, shape index: {}]   ;;  %s2062_s7 = inlined_call_operand.hbm [shape: f32[1,128], index: 7, kind: input, shape index: {}]   ;;  %s2063_s8 = inlined_call_operand.vmem [shape: f32[2,16,128], index: 8, kind: output, shape index: {}]  }
   0x1   :  { %2068 = sst [smem:[#allocation17_spill]] %s2055_s0 }
   0x2   :  { %2069 = sst [smem:[#allocation18_spill]] %s2057_s2 }
   0x3   :  { %2070 = sst [smem:[#allocation19_spill]] %s2058_s3 }
   0x4   :  { %13 = vsyncpa [#allocation3], 0 }
   0x5   :  { %15 = vsyncpa [#allocation3 + $0x1], 0 }
   0x6   :  { %16 = vsyncpa [#allocation5], 0 }
   0x7   :  { %18 = vsyncpa [#allocation5 + $0x1], 0 }
   0x8   :  { %19 = vsyncpa [#allocation8], 0 }
   0x9   :  { %20 = vsyncpa [#allocation11], 0  ;;  %s1730_s27 = smov 0   ;;  %s1732_s28 = smov 0  }
   0xa   :  { %s1734_s29 = smov 0   ;;  %s1736_s30 = smov 0  }
   0xb LB: > { %s1749_s9 = sadd.s32 4294967295, %s1671_s30   ;;  %p46_p0 = scmp.ne.s32.totalorder %s1663_s28, %s1659_s27  ;;  %s1671_s30 = sphi %s1736_s30, %s2083_s30   ;;  %s1667_s29 = sphi %s1734_s29, %s2082_s29   ;;  %s1663_s28 = sphi %s1732_s28, %s2081_s28   ;;  %s1659_s27 = sphi %s1730_s27, %s2080_s27  }
   0xc   : > { %p47_p1 = scmp.eq.s32.totalorder %s1749_s9, 0  ;;  %p1242_p2 = scmp.ge.s32.totalorder %s1671_s30, 1 }
   0xd   : > { %p235_p3 = scmp.lt.s32.totalorder %s1671_s30, 3  ;;  %s2072_s2 = sld [smem:[#allocation18_spill]] }
   0xe   : > { %p1757_p4 = por %p47_p1, %p46_p0  ;;  %s1673_s15 = smov [#allocation6]  }
   0xf   : > { %p1764_p5 = pnand %p1242_p2, %p235_p3  ;;  %s248_s16 = sshll.u32 %s1673_s15, 4  ;;  %s249_s16 = int_to_ptr.vmem [resolvable:$true] %s248_s16 }
  0x10   : > { %s2075_s3 = sld [smem:[#allocation19_spill]]  ;;  %s1674_s21 = smov 384  }
  0x11   : > { %p1312_p6 = pneg %p1764_p5  ;;  %s1675_s22 = smov 24  }
  0x12   : > { %s1676_s23 = smov [#allocation7]   ;;  %s272_s27 = sshll.u32 %s2059_s4, 4  ;;  %s273_s27 = int_to_ptr.hbm [resolvable:$true] %s272_s27 }
  0x13   : > { %s246_s13 = sshll.u32 %s2072_s2, 4  ;;  %p1772_p7 = pnand %p1312_p6, %p47_p1  ;;  %s247_s13 = int_to_ptr.hbm [resolvable:$true] %s246_s13 }
  0x14   : > { %s263_s24 = sshll.u32 %s1676_s23, 4  ;;  %s1677_s11 = smov [#allocation9]   ;;  %s264_s24 = int_to_ptr.vmem [resolvable:$true] %s263_s24 }
  0x15   : > { %1315 = dma.hbm_to_vmem [thread:$0]  (!%p1772_p7), %s247_s13, 6144, %s249_s16, [#allocation5], %s1674_s21, %s1674_s21, %s1675_s22  }
  0x16   : > { %s261_s20 = sshll.u32 %s2075_s3, 4  ;;  %s274_s12 = sshll.u32 %s1677_s11, 4  ;;  %s262_s20 = int_to_ptr.hbm [resolvable:$true] %s261_s20  ;;  %s275_s12 = int_to_ptr.vmem [resolvable:$true] %s274_s12 }
  0x17   : > { %1318 = dma.hbm_to_vmem [thread:$0]  (!%p1772_p7), %s262_s20, 48, %s264_s24, [#allocation8]  }
  0x18   : > { %s293_s16 = sshll.u32 %s2062_s7, 4  ;;  %s2064_s18 = smov 128   ;;  %s294_s16 = int_to_ptr.hbm [resolvable:$true] %s293_s16 }
  0x19   : > { %s2066_s19 = smov 8   ;;  %s1680_s20 = smov [#allocation10]  }
  0x1a   : > { %1321 = dma.hbm_to_vmem [thread:$0]  (!%p1772_p7), %s273_s27, 2048, %s275_s12, [#allocation8], %s2064_s18, %s2064_s18, %s2066_s19  }
  0x1b   : > { %s295_s21 = sshll.u32 %s1680_s20, 4  ;;  %s1797_s22 = sadd.s32 1, %s1671_s30   ;;  %s296_s21 = int_to_ptr.vmem [resolvable:$true] %s295_s21 }
  0x1c   : > { %1324 = dma.hbm_to_vmem [thread:$0]  (!%p1772_p7), %s294_s16, 16, %s296_s21, [#allocation11]  }
  0x1d   : > { %s33_s23 = sadd.s32 1, %s1667_s29  ;;  %s30_s24 = ssub.s32 %s1671_s30, %s1797_s22 }
  0x1e   : > { %p40_p8 = scmp.ne.s32.totalorder %s1667_s29, %s1663_s28  ;;  %p31_p9 = scmp.eq.s32.totalorder %s30_s24, 0 }
  0x1f   : > { %p41_p10 = scmp.eq.s32.totalorder %s1671_s30, 0  ;;  %p1336_p11 = scmp.lt.s32.totalorder %s1671_s30, 2 }
  0x20   : > { %s306_s25 = sand.u32 1, %s1667_s29   ;;  %s1289_s11 = sshll.u32 %s1671_s30, 4 }
  0x21   : > { %s1808_s26 = scalar_select %p31_p9, %s1667_s29, %s33_s23  }
  0x22   : > { %p42_p12 = por %p41_p10, %p40_p8  ;;  %s1248_s27 = sshll.u32 %s306_s25, 4 }
  0x23   : > { %s2076_s0 = sld [smem:[#allocation17_spill]]  ;;  %s310_s16 = scalar_lea.vmem [#allocation2], %s1248_s27 }
  0x24   : > { %s318_s20 = sshll.u32 %s310_s16, 4  ;;  %p1814_p13 = pnand %p1336_p11, %p42_p12  ;;  %s319_s20 = int_to_ptr.vmem [resolvable:$true] %s318_s20 }
  0x25   : > { %s337_s23 = scalar_lea.hbm %s2056_s1, %s1289_s11  ;;  %s332_s19 = scalar_lea.vmem [#allocation4], %s1248_s27 }
  0x26   : > { %s1821_s2 = sshll.u32 %s332_s19, 4  ;;  %s338_s12 = sshll.u32 %s337_s23, 4  ;;  %s339_s12 = int_to_ptr.hbm [resolvable:$true] %s338_s12  ;;  %s341_s2 = int_to_ptr.vmem [resolvable:$true] %s1821_s2 }
  0x27   : > { %s307_s13 = scalar_lea.sflag [#allocation3], %s306_s25  ;;  %p1565_p2 = pneg %p1814_p13 }
  0x29   : > { %s315_s17 = scalar_lea.hbm %s2076_s0, %s1289_s11  ;;  %s1568_s24 = scalar_lea.hbm %s2076_s0, 32 }
  0x2a   : > { %s316_s15 = sshll.u32 %s315_s17, 4  ;;  %s317_s15 = int_to_ptr.hbm [resolvable:$true] %s316_s15 }
  0x2b   : > { %s1561_s17 = sshra.s32 %s317_s15, 4  ;;  %s1562_s17 = int_to_ptr.hbm [resolvable:$true] %s1561_s17 }
  0x2c   : > { %s1563_s16 = scalar_lea.hbm %s1562_s17, 16  ;;  %p1569_p7 = scmp.lt.s32.totalorder %s1562_s17, %s2076_s0 }
  0x2d   : > { %p1564_p0 = scmp.ne.s32.totalorder %s1562_s17, %s1563_s16  ;;  %p1570_p8 = scmp.lt.s32.totalorder %s1568_s24, %s1563_s16 }
  0x2f   : > { %p1566_p3 = pnand %p1565_p2, %p1564_p0  ;;  %p1571_p9 = por %p1570_p8, %p1569_p7 }
  0x31   : > { %p1567_p6 = pneg %p1566_p3 }
  0x33   : > { %p1572_p10 = pnand %p1571_p9, %p1567_p6 }
  0x35   : > { %1575 = shalt.err (!%p1572_p10)
}
  0x36   : > { %s2078_s19 = smov 8   ;;  %s2079_s25 = smov 128  }
  0x37   : > { %1328 = dma.hbm_to_vmem [thread:$0]  (!%p1814_p13), %s317_s15, 256, %s319_s20, %s307_s13, %s2079_s25, %s2079_s25, %s2078_s19  }
  0x38   : > { %s328_s3 = sand.u32 1, %s1671_s30   ;;  %s1591_s18 = sshra.s32 %s339_s12, 4  ;;  %s1592_s18 = int_to_ptr.hbm [resolvable:$true] %s1591_s18 }
  0x39   : > { %s329_s23 = scalar_lea.sflag [#allocation5], %s328_s3  ;;  %s1593_s17 = scalar_lea.hbm %s1592_s18, 16 }
  0x3a   : > { %p1594_p11 = scmp.ne.s32.totalorder %s1592_s18, %s1593_s17  ;;  %s1598_s11 = scalar_lea.hbm %s2056_s1, 32 }
  0x3b   : > { %p1599_p3 = scmp.lt.s32.totalorder %s1592_s18, %s2056_s1  ;;  %p1600_p6 = scmp.lt.s32.totalorder %s1598_s11, %s1593_s17 }
  0x3c   : > { %p1596_p12 = pnand %p1594_p11, %p1565_p2 }
  0x3d   : > { %p1601_p7 = por %p1600_p6, %p1599_p3 }
  0x3e   : > { %p1597_p0 = pneg %p1596_p12 }
  0x40   : > { %p1602_p8 = pnand %p1601_p7, %p1597_p0 }
  0x42   : > { %1605 = shalt.err (!%p1602_p8)
}
  0x43   : > { %1331 = dma.hbm_to_vmem [thread:$0]  (!%p1814_p13), %s339_s12, 256, %s341_s2, %s329_s23, %s2079_s25, %s2079_s25, %s2078_s19  }
  0x44   : > { %352 = sbr.rel (%p1764_p5) target bundleno = 1741 (0x6cd), region = 52  ;;  %s354_s30 = sand.u32 (!%p1764_p5), 1, %s1663_s28  }
  0x45   : > { %s1858_s15 = sshll.u32 (!%p1764_p5), %s354_s30, 4  ;;  %s355_s0 = scalar_lea.sflag (!%p1764_p5), [#allocation3], %s354_s30 }
  0x46   : > { %s358_s20 = scalar_lea.vmem (!%p1764_p5), [#allocation2], %s1858_s15 }
  0x49   : > { %1638 = dma.done.wait (%p1757_p4), %s355_s0, 256  }
  0x4a   : > { %1640 = vsyncadd (%p1757_p4), %s355_s0, 4294967040  ;;  %s364_s2 = sand.u32 1, %s1749_s9   ;;  %s368_s14 = scalar_lea.vmem [#allocation4], %s1858_s15 }
  0x4b   : > { %s365_s21 = scalar_lea.sflag [#allocation5], %s364_s2 }
  0x4c   : > { %1642 = dma.done.wait (%p1757_p4), %s365_s21, 256  }
  0x4d   : > { %1644 = vsyncadd (%p1757_p4), %s365_s21, 4294967040 }
  0x4e   : > { %1646 = dma.done.wait (%p47_p1), [#allocation5], 6144  }
  0x4f   : > { %1648 = vsyncadd (%p47_p1), [#allocation5], 4294961152 }
  0x50   : > { %1650 = dma.done.wait (%p47_p1), [#allocation8], 2096  }
  0x51   : > { %1652 = vsyncadd (%p47_p1), [#allocation8], 4294965200 }
  0x52   : > { %1654 = dma.done.wait (%p47_p1), [#allocation11], 16  }
  0x53   : > { %1656 = vsyncadd (%p47_p1), [#allocation11], 4294967280  ;;  %v480_v0 = vld [vmem:[#allocation6 + $0x170] sm:$0xff]  ;;  %v477_v1 = vld [vmem:[#allocation6 + $0x158] sm:$0xff]  ;;  %vm565_vm0 = vcmask 261120   ;;  %s1681_s10 = smov 64  }
  0x54   : > { %513 = vmatpush.msra.mxu1 %v480_v0  ;;  %v474_v2 = vld [vmem:[#allocation6 + $0x140] sm:$0xff]  ;;  %v479_v3 = vld [vmem:[#allocation6 + $0x168] sm:$0xff]  ;;  %v476_v4 = vld [vmem:[#allocation6 + $0x150] sm:$0xff]  ;;  %s1682_s12 = smov 96   ;;  %s1683_s13 = smov 32   ;;  %vm603_vm2 = vcmask 130048  }
  0x55   : > { %490 = vmatpush.msra.mxu0 %v479_v3  ;;  %v471_v5 = vld [vmem:[#allocation6 + $0x128] sm:$0xff]  ;;  %v473_v6 = vld [vmem:[#allocation6 + $0x138] sm:$0xff]  ;;  %v468_v7 = vld [vmem:[#allocation6 + $0x110] sm:$0xff]  ;;  %vm1001_vm4 = vcmask 523264   ;;  %vm1004_vm5 = vcmask 785408   ;;  %p427_p1 = scmp.lt.s32.totalorder %s1749_s9, 1 }
  0x56   : > { %514 = vmatpush.msra.mxu1 %v477_v1  ;;  %v470_v8 = vld [vmem:[#allocation6 + $0x120] sm:$0xff]  ;;  %v465_v9 = vld [vmem:[#allocation6 + $0xf8] sm:$0xff]  ;;  %v467_v10 = vld [vmem:[#allocation6 + $0x108] sm:$0xff] }
  0x57   : > { %491 = vmatpush.msra.mxu0 %v476_v4  ;;  %v462_v11 = vld [vmem:[#allocation6 + $0xe0] sm:$0xff]  ;;  %v464_v12 = vld [vmem:[#allocation6 + $0xf0] sm:$0xff]  ;;  %v481_v13 = vld [vmem:[#allocation6 + $0x178] sm:$0xff]  ;;  %s2085_s9 = smov (!%p427_p1, %s1749_s9), 1 }
  0x58   : > { %515 = vmatpush.msra.mxu1 %v474_v2  ;;  %v478_v14 = vld [vmem:[#allocation6 + $0x160] sm:$0xff]  ;;  %v459_v15 = vld [vmem:[#allocation6 + $0xc8] sm:$0xff]  ;;  %v461_v16 = vld [vmem:[#allocation6 + $0xd8] sm:$0xff]  ;;  %536 = vmatpush.msra.mxu2 %v481_v13  ;;  %s1291_s18 = sshll.u32 %s2085_s9, 4 }
  0x59   : > { %492 = vmatpush.msra.mxu0 %v473_v6  ;;  %v475_v17 = vld [vmem:[#allocation6 + $0x148] sm:$0xff]  ;;  %v456_v18 = vld [vmem:[#allocation6 + $0xb0] sm:$0xff]  ;;  %v458_v19 = vld [vmem:[#allocation6 + $0xc0] sm:$0xff]  ;;  %s431_s24 = scalar_lea.vmem %s2063_s8, %s1291_s18 }
  0x5a   : > { %516 = vmatpush.msra.mxu1 %v471_v5  ;;  %537 = vmatpush.msra.mxu2 %v478_v14  ;;  %v472_v20 = vld [vmem:[#allocation6 + $0x130] sm:$0xff]  ;;  %v453_v21 = vld [vmem:[#allocation6 + $0x98] sm:$0xff]  ;;  %v455_v22 = vld [vmem:[#allocation6 + $0xa8] sm:$0xff] }
  0x5b   : > { %493 = vmatpush.msra.mxu0 %v470_v8  ;;  %v469_v23 = vld [vmem:[#allocation6 + $0x118] sm:$0xff]  ;;  %v450_v24 = vld [vmem:[#allocation6 + $0x80] sm:$0xff]  ;;  %v452_v25 = vld [vmem:[#allocation6 + $0x90] sm:$0xff] }
  0x5c   : > { %517 = vmatpush.msra.mxu1 %v468_v7  ;;  %538 = vmatpush.msra.mxu2 %v475_v17  ;;  %v466_v26 = vld [vmem:[#allocation6 + $0x100] sm:$0xff]  ;;  %v447_v27 = vld [vmem:[#allocation6 + $0x68] sm:$0xff]  ;;  %v449_v28 = vld [vmem:[#allocation6 + $0x78] sm:$0xff] }
  0x5d   : > { %494 = vmatpush.msra.mxu0 %v467_v10  ;;  %v463_v29 = vld [vmem:[#allocation6 + $0xe8] sm:$0xff]  ;;  %v444_v30 = vld [vmem:[#allocation6 + $0x50] sm:$0xff]  ;;  %v446_v31 = vld [vmem:[#allocation6 + $0x60] sm:$0xff] }
  0x5e   : > { %518 = vmatpush.msra.mxu1 %v465_v9  ;;  %539 = vmatpush.msra.mxu2 %v472_v20  ;;  %v460_v32 = vld [vmem:[#allocation6 + $0xd0] sm:$0xff]  ;;  %v441_v33 = vld [vmem:[#allocation6 + $0x38] sm:$0xff]  ;;  %v443_v34 = vld [vmem:[#allocation6 + $0x48] sm:$0xff] }
  0x5f   : > { %495 = vmatpush.msra.mxu0 %v464_v12  ;;  %v457_v35 = vld [vmem:[#allocation6 + $0xb8] sm:$0xff]  ;;  %v438_v36 = vld [vmem:[#allocation6 + $0x20] sm:$0xff]  ;;  %v440_v37 = vld [vmem:[#allocation6 + $0x30] sm:$0xff] }
  0x60   : > { %519 = vmatpush.msra.mxu1 %v462_v11  ;;  %540 = vmatpush.msra.mxu2 %v469_v23  ;;  %v454_v38 = vld [vmem:[#allocation6 + $0xa0] sm:$0xff]  ;;  %v435_v39 = vld [vmem:[#allocation6 + $0x8] sm:$0xff]  ;;  %v437_v40 = vld [vmem:[#allocation6 + $0x18] sm:$0xff] }
  0x61   : > { %496 = vmatpush.msra.mxu0 %v461_v16  ;;  %v1885_v41 = vld [vmem:[%s368_s14] sm:$0xff]  ;;  %v451_v42 = vld [vmem:[#allocation6 + $0x88] sm:$0xff]  ;;  %v445_v45 = vld [vmem:[#allocation6 + $0x58] sm:$0xff] }
  0x62   : > { %520 = vmatpush.msra.mxu1 %v459_v15  ;;  %541 = vmatpush.msra.mxu2 %v466_v26  ;;  %v434_v43 = vld [vmem:[#allocation6] sm:$0xff]  ;;  %v448_v44 = vld [vmem:[#allocation6 + $0x70] sm:$0xff]  ;;  %v1891_v47 = vld [vmem:[%s368_s14 + $0x8] sm:$0xff] }
  0x63   : > { %497 = vmatpush.msra.mxu0 %v458_v19  ;;  %v442_v46 = vld [vmem:[#allocation6 + $0x40] sm:$0xff]  ;;  %v439_v48 = vld [vmem:[#allocation6 + $0x28] sm:$0xff]  ;;  %v436_v49 = vld [vmem:[#allocation6 + $0x10] sm:$0xff] }
  0x64   : > { %521 = vmatpush.msra.mxu1 %v456_v18  ;;  %542 = vmatpush.msra.mxu2 %v463_v29  ;;  %v482_v51 = vld [vmem:[#allocation7] sm:$0x7]  ;;  %v1936_v14 = vld [vmem:[%s358_s20 + $0x8] sm:$0xff] }
  0x65   : > { %498 = vmatpush.msra.mxu0 %v455_v22  ;;  %v485_v53 = vperm.slane %v482_v51, 1  ;;  %v484_v54 = vperm.slane %v482_v51, 0  ;;  %v486_v0 = vperm.slane %v482_v51, 2  ;;  %v1928_v10 = vld [vmem:[%s358_s20] sm:$0xff]  ;;  %vm562_vm3 = vcmp.eq.s32.totalorder %v1936_v14, 0 }
  0x66   : > { %522 = vmatpush.msra.mxu1 %v453_v21  ;;  %543 = vmatpush.msra.mxu2 %v460_v32  ;;  %vm561_vm1 = vcmp.eq.s32.totalorder %v1928_v10, 0 }
  0x67   : > { %499 = vmatpush.msra.mxu0 %v452_v25 }
  0x68   : > { %523 = vmatpush.msra.mxu1 %v450_v24  ;;  %544 = vmatpush.msra.mxu2 %v457_v35 }
  0x69   : > { %500 = vmatpush.msra.mxu0 %v449_v28 }
  0x6a   : > { %524 = vmatpush.msra.mxu1 %v447_v27  ;;  %545 = vmatpush.msra.mxu2 %v454_v38 }
  0x6b   : > { %501 = vmatpush.msra.mxu0 %v446_v31 }
  0x6c   : > { %525 = vmatpush.msra.mxu1 %v444_v30  ;;  %546 = vmatpush.msra.mxu2 %v451_v42 }
  0x6d   : > { %502 = vmatpush.msra.mxu0 %v443_v34 }
  0x6e   : > { %526 = vmatpush.msra.mxu1 %v441_v33  ;;  %547 = vmatpush.msra.mxu2 %v448_v44 }
  0x6f   : > { %503 = vmatpush.msra.mxu0 %v440_v37 }
  0x70   : > { %527 = vmatpush.msra.mxu1 %v438_v36  ;;  %548 = vmatpush.msra.mxu2 %v445_v45 }
  0x71   : > { %504 = vmatpush.msra.mxu0 %v437_v40 }
  0x72   : > { %528 = vmatpush.msra.mxu1 %v435_v39  ;;  %549 = vmatpush.msra.mxu2 %v442_v46 }
  0x73   : > { %529 = vmatmul.f32.vlgmr.msra.gmra.mxu1 %v1885_v41  ;;  %505 = vmatpush.msra.mxu0 %v434_v43 }
  0x74   : > { %506 = vmatmul.f32.vlgmr.msra.gmra.mxu0 %v1885_v41  ;;  %550 = vmatpush.msra.mxu2 %v439_v48 }
  0x76   : > { %551 = vmatpush.msra.mxu2 %v436_v49 }
  0x77   : > { %552 = vmatmul.f32.vlgmr.msra.gmra.mxu2 %v1885_v41 }
  0x7b   : > { %532 = vmatmul.f32.gmra.mxu1 %v1891_v47 }
  0x7c   : > { %509 = vmatmul.f32.gmra.mxu0 %v1891_v47 }
  0x7f   : > { %555 = vmatmul.f32.gmra.mxu2 %v1891_v47 }
  0xf0   : > { %v530_v50 = vpop.f32.mrf.mxu1 }
  0xf1   : > { %v507_v52 = vpop.f32.mrf.mxu0  ;;  %v531_v58 = vadd.f32 %v530_v50, %v485_v53 }
  0xf2   : > { %v508_v57 = vadd.f32 %v507_v52, %v484_v54 }
  0xf4   : > { %v1900_v59 = vmul.f32 0.17677669, %v508_v57 }
  0xf8   : > { %v533_v55 = vpop.f32.mrf.mxu1 }
  0xf9   : > { %v534_v56 = vadd.f32 %v533_v55, %v485_v53  ;;  %v510_v60 = vpop.f32.mrf.mxu0 }
  0xfa   : > { %v511_v61 = vadd.f32 %v510_v60, %v484_v54  ;;  %v553_v63 = vpop.f32.mrf.mxu2 }
  0xfb   : > { %773 = vrot.lane.b32.xlu1 %v534_v56, %s1681_s10  ;;  %667 = vrot.lane.b32.xlu2 %v534_v56, %s1682_s12  ;;  %v1909_v2 = vadd.f32 %v553_v63, %v486_v0 }
  0xfc   : > { %1263 = vmatpush.xpose.msk.msra.mxu3 %vm565_vm0, %v534_v56  ;;  %v564_v62 = vmul.f32 0.17677669, %v511_v61 }
 0x100   : > { %1264 = vmatpush.xpose.msk.msra.mxu3 %vm565_vm0, %v531_v58 }
 0x102   : > { %v556_v1 = vpop.f32.mrf.mxu2 }
 0x103   : > { %1265 = vmatmul.msk.f32.vlgmr.msra.gmra.mxu3 %vm565_vm0, %v1900_v59  ;;  %665 = vrot.lane.b32.xlu2 %v531_v58, %s1682_s12  ;;  %v1911_v3 = vadd.f32 %v556_v1, %v486_v0 }
 0x105   : > { %652 = vmatpush.msrb.mxu3 %v1911_v3 }
 0x107   : > { %653 = vmatpush.msrb.mxu3 %v1909_v2 }
 0x10b   : > { %1266 = vmatmul.msk.f32.gmra.mxu3 %vm565_vm0, %v564_v62  ;;  %771 = vrot.lane.b32.xlu2 %v531_v58, %s1681_s10 }
 0x113   : > { %663 = vrot.lane.b32.xlu2 %v564_v62, %s1682_s12 }
 0x11b   : > { %767 = vrot.lane.b32.xlu2 %v1900_v59, %s1681_s10 }
 0x123   : > { %875 = vrot.lane.b32.xlu2 %v531_v58, %s1683_s13 }
 0x12b   : > { %873 = vrot.lane.b32.xlu2 %v564_v62, %s1683_s13 }
 0x155   : > { %v668_v4 = vpop.permute.xlu2 %667 }
 0x156   : > { %1269 = vmatpush.xpose.msk.msra.mxu3 %vm565_vm0, %v668_v4 }
 0x15d   : > { %v666_v5 = vpop.permute.xlu2 %665 }
 0x15e   : > { %1270 = vmatpush.xpose.msk.msra.mxu3 %vm565_vm0, %v666_v5 }
 0x165   : > { %v772_v6 = vpop.permute.xlu2 %771 }
 0x16d   : > { %v774_v7 = vpop.permute.xlu1 %773  ;;  %v1921_v8 = vpop.permute.xlu2 %663 }
 0x16e   : > { %1275 = vmatpush.xpose.msk.msrb.mxu2 %vm565_vm0, %v774_v7 }
 0x172   : > { %1276 = vmatpush.xpose.msk.msrb.mxu2 %vm565_vm0, %v772_v6 }
 0x175   : > { %v768_v9 = vpop.permute.xlu2 %767 }
 0x176   : > { %1277 = vmatmul.msk.f32.vlgmr.msrb.gmra.mxu2 %vm565_vm0, %v768_v9 }
 0x17d   : > { %v876_v34 = vpop.permute.xlu2 %875 }
 0x185   : > { %v874_v35 = vpop.permute.xlu2 %873 }
 0x186   : > { %v595_v11 = vpop.f32.mrf.mxu3 }
 0x187   : > { %v601_v12 = vsel %vm561_vm1, -32767.0, %v595_v11 }
 0x188   : > { %v604_v13 = vsel %vm603_vm2, %v601_v12, -inf }
 0x189   : > { %605 = vmax.xlane.f32.xlu0 %v604_v13 }
 0x18e   : > { %v598_v15 = vpop.f32.mrf.mxu3 }
 0x18f   : > { %v602_v16 = vsel %vm562_vm3, -32767.0, %v598_v15 }
 0x190   : > { %v607_v17 = vsel %vm603_vm2, %v602_v16, -inf }
 0x191   : > { %608 = vmax.xlane.f32.xlu0 %v607_v17 }
 0x1a5   : > { %661 = vrot.lane.b32.xlu0 %v1900_v59, %s1682_s12 }
 0x1ad   : > { %877 = vrot.lane.b32.xlu0 %v534_v56, %s1683_s13 }
 0x1b5   : > { %769 = vrot.lane.b32.xlu0 %v564_v62, %s1681_s10 }
 0x1f9   : > { %v800_v18 = vpop.f32.mrf.mxu2 }
 0x1fa   : > { %v806_v19 = vsel %vm561_vm1, -32767.0, %v800_v18 }
 0x1fb   : > { %v808_v20 = vsel %vm603_vm2, %v806_v19, -inf }
 0x1fc   : > { %v606_v21 = vpop.xlane.xlu0 %605  ;;  %809 = vmax.xlane.f32.xlu2 %v808_v20 }
 0x1fd   : > { %v610_v22 = vsub.f32 %v601_v12, %v606_v21 }
 0x1ff   : > { %v612_v23 = vmul.f32 1.442695, %v610_v22 }
 0x201   : > { %1403 = vpow2.f32 %v612_v23 }
 0x204   : > { %v609_v24 = vpop.xlane.xlu0 %608 }
 0x205   : > { %v611_v25 = vsub.f32 %v602_v16, %v609_v24 }
 0x207   : > { %v1404_v26 = vpop.eup %1403  ;;  %v614_v27 = vmul.f32 1.442695, %v611_v25 }
 0x208   : > { %v616_v28 = vsel %vm603_vm2, %v1404_v26, 0.0 }
 0x209   : > { %1405 = vpow2.f32 %v614_v27  ;;  %617 = vadd.xlane.f32.xlu1 %v616_v28 }
 0x20f   : > { %v1406_v29 = vpop.eup %1405 }
 0x210   : > { %v619_v30 = vsel %vm603_vm2, %v1406_v29, 0.0 }
 0x211   : > { %620 = vadd.xlane.f32.xlu1 %v619_v30 }
 0x217   : > { %v662_v31 = vpop.permute.xlu0 %661 }
 0x21f   : > { %v878_v32 = vpop.permute.xlu0 %877 }
 0x227   : > { %v770_v33 = vpop.permute.xlu0 %769 }
 0x228   : > { %1278 = vmatmul.msk.f32.gmra.mxu2 %vm565_vm0, %v770_v33 }
 0x22a   : > { %871 = vrot.lane.b32.xlu1 %v1900_v59, %s1683_s13 }
 0x26f   : > { %v810_v36 = vpop.xlane.xlu2 %809 }
 0x270   : > { %v814_v37 = vsub.f32 %v806_v19, %v810_v36 }
 0x272   : > { %v816_v38 = vmul.f32 1.442695, %v814_v37  ;;  %v1385_v37 = vpack.i.bf16 %v1909_v2, %v1911_v3 }
 0x274   : > { %1407 = vpow2.f32 %v816_v38 }
 0x27a   : > { %v1954_v39 = vpop.eup %1407 }
 0x27b   : > { %v820_v40 = vsel %vm603_vm2, %v1954_v39, 0.0 }
 0x27c   : > { %v618_v42 = vpop.xlane.xlu1 %617  ;;  %821 = vadd.xlane.f32.xlu2 %v820_v40 }
 0x27d   : > { %1409 = vrcp.f32 %v618_v42 }
 0x283   : > { %v1410_v43 = vpop.eup %1409 }
 0x284   : > { %v624_v44 = vmul.f32 %v1410_v43, %v618_v42  ;;  %v621_v45 = vpop.xlane.xlu1 %620 }
 0x285   : > { %1411 = vrcp.f32 %v621_v45 }
 0x286   : > { %v626_v46 = vsub.f32 2.0, %v624_v44 }
 0x288   : > { %v628_v48 = vmul.f32 %v1410_v43, %v626_v46 }
 0x28a   : > { %v630_v49 = vmul.f32 %v1404_v26, %v628_v48 }
 0x28b   : > { %v1412_v50 = vpop.eup %1411 }
 0x28c   : > { %v625_v51 = vmul.f32 %v1412_v50, %v621_v45  ;;  %1267 = vmatmul.msk.f32.vlgmr.msrb.gmra.mxu3 %vm603_vm2, %v630_v49 }
 0x28d   : > { %1281 = vmatpush.xpose.msk.msrb.mxu3 %vm565_vm0, %v878_v32 }
 0x28e   : > { %v627_v52 = vsub.f32 2.0, %v625_v51 }
 0x290   : > { %v629_v53 = vmul.f32 %v1412_v50, %v627_v52 }
 0x291   : > { %1282 = vmatpush.xpose.msk.msrb.mxu3 %vm565_vm0, %v876_v34 }
 0x292   : > { %v631_v54 = vmul.f32 %v1406_v29, %v629_v53 }
 0x294   : > { %1268 = vmatmul.msk.f32.gmra.mxu3 %vm603_vm2, %v631_v54 }
 0x29c   : > { %1271 = vmatmul.msk.f32.vlgmr.msra.gmra.mxu3 %vm565_vm0, %v662_v31  ;;  %v872_v55 = vpop.permute.xlu1 %871 }
 0x2a4   : > { %1272 = vmatmul.msk.f32.gmra.mxu3 %vm565_vm0, %v1921_v8 }
 0x2ab   : > { %v803_v0 = vpop.f32.mrf.mxu2 }
 0x2ac   : > { %1283 = vmatmul.msk.f32.vlgmr.msrb.gmra.mxu3 %vm565_vm0, %v872_v55  ;;  %v807_v1 = vsel %vm562_vm3, -32767.0, %v803_v0 }
 0x2ad   : > { %v811_v7 = vsel %vm603_vm2, %v807_v1, -inf }
 0x2b4   : > { %1284 = vmatmul.msk.f32.gmra.mxu3 %vm565_vm0, %v874_v35 }
 0x2ef   : > { %v822_v20 = vpop.xlane.xlu2 %821 }
 0x30f   : > { %v1967_v56 = vpop.f32.mrf.mxu3 }
 0x317   : > { %v1969_v57 = vpop.f32.mrf.mxu3 }
 0x31f   : > { %v694_v58 = vpop.f32.mrf.mxu3 }
 0x320   : > { %v700_v59 = vsel %vm561_vm1, -32767.0, %v694_v58 }
 0x321   : > { %v702_v60 = vsel %vm603_vm2, %v700_v59, -inf }
 0x322   : > { %703 = vmax.xlane.f32.xlu1 %v702_v60 }
 0x327   : > { %v697_v61 = vpop.f32.mrf.mxu3 }
 0x328   : > { %v701_v62 = vsel %vm562_vm3, -32767.0, %v697_v61 }
 0x329   : > { %v705_v63 = vsel %vm603_vm2, %v701_v62, -inf }
 0x32a   : > { %706 = vmax.xlane.f32.xlu0 %v705_v63 }
 0x32f   : > { %v904_v4 = vpop.f32.mrf.mxu3 }
 0x330   : > { %v910_v5 = vsel %vm561_vm1, -32767.0, %v904_v4 }
 0x331   : > { %v912_v6 = vsel %vm603_vm2, %v910_v5, -inf }
 0x332   : > { %913 = vmax.xlane.f32.xlu1 %v912_v6  ;;  %812 = vmax.xlane.f32.xlu0 %v811_v7 }
 0x337   : > { %v907_v8 = vpop.f32.mrf.mxu3 }
 0x338   : > { %v911_v9 = vsel %vm562_vm3, -32767.0, %v907_v8 }
 0x339   : > { %v915_v11 = vsel %vm603_vm2, %v911_v9, -inf }
 0x33a   : > { %916 = vmax.xlane.f32.xlu2 %v915_v11 }
 0x395   : > { %v704_v12 = vpop.xlane.xlu1 %703 }
 0x396   : > { %v708_v13 = vsub.f32 %v700_v59, %v704_v12 }
 0x398   : > { %v710_v15 = vmul.f32 1.442695, %v708_v13 }
 0x39a   : > { %1413 = vpow2.f32 %v710_v15 }
 0x39d   : > { %v707_v16 = vpop.xlane.xlu0 %706 }
 0x39e   : > { %v709_v10 = vsub.f32 %v701_v62, %v707_v16 }
 0x3a0   : > { %v1414_v17 = vpop.eup %1413  ;;  %v712_v18 = vmul.f32 1.442695, %v709_v10 }
 0x3a1   : > { %v714_v19 = vsel %vm603_vm2, %v1414_v17, 0.0 }
 0x3a2   : > { %1415 = vpow2.f32 %v712_v18  ;;  %715 = vadd.xlane.f32.xlu1 %v714_v19 }
 0x3a5   : > { %v914_v21 = vpop.xlane.xlu1 %913  ;;  %v813_v22 = vpop.xlane.xlu0 %812 }
 0x3a6   : > { %v918_v14 = vsub.f32 %v910_v5, %v914_v21  ;;  %v815_v23 = vsub.f32 %v807_v1, %v813_v22 }
 0x3a8   : > { %v1987_v24 = vpop.eup %1415  ;;  %v920_v25 = vmul.f32 1.442695, %v918_v14  ;;  %v818_v26 = vmul.f32 1.442695, %v815_v23  ;;  %v1022_v14 = vld [vmem:[#allocation9 + $0x78] sm:$0xff]  ;;  %v1021_v23 = vld [vmem:[#allocation9 + $0x70] sm:$0xff] }
 0x3a9   : > { %v717_v27 = vsel %vm603_vm2, %v1987_v24, 0.0  ;;  %1027 = vmatpush.msrb.mxu1 %v1022_v14 }
 0x3aa   : > { %1417 = vpow2.f32 %v920_v25  ;;  %718 = vadd.xlane.f32.xlu0 %v717_v27  ;;  %v1019_v25 = vld [vmem:[#allocation9 + $0x60] sm:$0xff]  ;;  %v1018_v27 = vld [vmem:[#allocation9 + $0x58] sm:$0xff] }
 0x3ab   : > { %1419 = vpow2.f32 %v818_v26  ;;  %1028 = vmatpush.msrb.mxu1 %v1021_v23 }
 0x3ad   : > { %v917_v28 = vpop.xlane.xlu2 %916 }
 0x3ae   : > { %v919_v29 = vsub.f32 %v911_v9, %v917_v28  ;;  %v1017_v28 = vld [vmem:[#allocation9 + $0x50] sm:$0xff] }
 0x3b0   : > { %v1991_v30 = vpop.eup %1417  ;;  %v922_v31 = vmul.f32 1.442695, %v919_v29 }
 0x3b1   : > { %v1993_v32 = vpop.eup %1419  ;;  %v924_v33 = vsel %vm603_vm2, %v1991_v30, 0.0 }
 0x3b2   : > { %1421 = vpow2.f32 %v922_v31  ;;  %925 = vadd.xlane.f32.xlu0 %v924_v33  ;;  %v823_v34 = vsel %vm603_vm2, %v1993_v32, 0.0 }
 0x3b3   : > { %824 = vadd.xlane.f32.xlu2 %v823_v34  ;;  %v1016_v34 = vld [vmem:[#allocation9 + $0x48] sm:$0xff] }
 0x3b8   : > { %v1999_v35 = vpop.eup %1421 }
 0x3b9   : > { %v927_v36 = vsel %vm603_vm2, %v1999_v35, 0.0 }
 0x3bb   : > { %928 = vadd.xlane.f32.xlu2 %v927_v36  ;;  %1386 = vrot.lane.b32.xlu1 %v1385_v37, %s1682_s12  ;;  %v1014_v36 = vld [vmem:[#allocation9 + $0x38] sm:$0xff] }
 0x3c6   : > { %1391 = vrot.lane.b32.xlu0 %v1385_v37, %s1681_s10 }
 0x3d3   : > { %1396 = vrot.lane.b32.xlu2 %v1385_v37, %s1683_s13  ;;  %v1013_v37 = vld [vmem:[#allocation9 + $0x30] sm:$0xff] }
 0x415   : > { %v716_v38 = vpop.xlane.xlu1 %715 }
 0x416   : > { %1423 = vrcp.f32 %v716_v38 }
 0x41c   : > { %v1424_v42 = vpop.eup %1423 }
 0x41d   : > { %v719_v40 = vpop.xlane.xlu0 %718  ;;  %v722_v43 = vmul.f32 %v1424_v42, %v716_v38  ;;  %v1012_v38 = vld [vmem:[#allocation9 + $0x28] sm:$0xff] }
 0x41e   : > { %1425 = vrcp.f32 %v719_v40 }
 0x41f   : > { %1427 = vrcp.f32 %v822_v20  ;;  %v724_v45 = vsub.f32 2.0, %v722_v43  ;;  %v1009_v43 = vld [vmem:[#allocation9 + $0x10] sm:$0xff] }
 0x421   : > { %v726_v2 = vmul.f32 %v1424_v42, %v724_v45  ;;  %v1010_v42 = vld [vmem:[#allocation9 + $0x18] sm:$0xff]  ;;  %v1007_v45 = vld [vmem:[#allocation9] sm:$0xff] }
 0x423   : > { %v728_v55 = vmul.f32 %v1414_v17, %v726_v2 }
 0x424   : > { %v1426_v48 = vpop.eup %1425 }
 0x425   : > { %v926_v46 = vpop.xlane.xlu0 %925  ;;  %v1428_v49 = vpop.eup %1427  ;;  %v723_v50 = vmul.f32 %v1426_v48, %v719_v40  ;;  %v1011_v40 = vld [vmem:[#allocation9 + $0x20] sm:$0xff] }
 0x426   : > { %v825_v44 = vpop.xlane.xlu2 %824  ;;  %1429 = vrcp.f32 %v926_v46  ;;  %v828_v53 = vmul.f32 %v1428_v49, %v822_v20 }
 0x427   : > { %1431 = vrcp.f32 %v825_v44  ;;  %v725_v58 = vsub.f32 2.0, %v723_v50 }
 0x428   : > { %v830_v60 = vsub.f32 2.0, %v828_v53 }
 0x429   : > { %v727_v62 = vmul.f32 %v1426_v48, %v725_v58 }
 0x42a   : > { %v832_v4 = vmul.f32 %v1428_v49, %v830_v60 }
 0x42b   : > { %v729_v11 = vmul.f32 %v1987_v24, %v727_v62  ;;  %v1020_v24 = vld [vmem:[#allocation9 + $0x68] sm:$0xff] }
 0x42c   : > { %v1430_v59 = vpop.eup %1429  ;;  %v834_v15 = vmul.f32 %v1954_v39, %v832_v4  ;;  %1029 = vmatpush.msrb.mxu1 %v1020_v24 }
 0x42d   : > { %v1387_v3 = vpop.permute.xlu1 %1386  ;;  %v1432_v61 = vpop.eup %1431  ;;  %v932_v63 = vmul.f32 %v1430_v59, %v926_v46 }
 0x42e   : > { %v929_v51 = vpop.xlane.xlu2 %928  ;;  %v1388_v52 = vunpack.i.l.bf16 %v1387_v3  ;;  %v1389_v54 = vunpack.i.h.bf16 %v1387_v3  ;;  %v829_v5 = vmul.f32 %v1432_v61, %v825_v44  ;;  %1030 = vmatpush.msrb.mxu1 %v1019_v25  ;;  %v1008_v44 = vld [vmem:[#allocation9 + $0x8] sm:$0xff] }
 0x42f   : > { %1433 = vrcp.f32 %v929_v51  ;;  %v934_v9 = vsub.f32 2.0, %v932_v63 }
 0x430   : > { %758 = vmatpush.msrb.mxu0 %v1388_v52  ;;  %v831_v16 = vsub.f32 2.0, %v829_v5  ;;  %1031 = vmatpush.msrb.mxu1 %v1018_v27  ;;  %v1401_v27 = vld [vmem:[%s2061_s6] ss:$0 sm:$0xff] }
 0x431   : > { %v936_v10 = vmul.f32 %v1430_v59, %v934_v9  ;;  %v1400_v59 = vld [vmem:[%s2060_s5] ss:$0 sm:$0xff] }
 0x432   : > { %759 = vmatpush.msrb.mxu0 %v1389_v54  ;;  %v833_v18 = vmul.f32 %v1432_v61, %v831_v16  ;;  %1032 = vmatpush.msrb.mxu1 %v1017_v28 }
 0x433   : > { %1273 = vmatmul.msk.f32.vlgmr.msrb.gmra.mxu0 %vm603_vm2, %v728_v55  ;;  %v938_v19 = vmul.f32 %v1991_v30, %v936_v10 }
 0x434   : > { %v835_v21 = vmul.f32 %v1993_v32, %v833_v18  ;;  %1033 = vmatpush.msrb.mxu1 %v1016_v34 }
 0x435   : > { %v1434_v12 = vpop.eup %1433 }
 0x436   : > { %v1397_v0 = vpop.permute.xlu2 %1396  ;;  %v933_v17 = vmul.f32 %v1434_v12, %v929_v51 }
 0x437   : > { %v1398_v1 = vunpack.i.l.bf16 %v1397_v0  ;;  %v1399_v7 = vunpack.i.h.bf16 %v1397_v0 }
 0x438   : > { %v1392_v6 = vpop.permute.xlu0 %1391  ;;  %v935_v20 = vsub.f32 2.0, %v933_v17 }
 0x439   : > { %966 = vmatpush.msra.mxu0 %v1398_v1  ;;  %v1393_v8 = vunpack.i.l.bf16 %v1392_v6  ;;  %v1394_v13 = vunpack.i.h.bf16 %v1392_v6 }
 0x43a   : > { %v937_v22 = vmul.f32 %v1434_v12, %v935_v20 }
 0x43b   : > { %967 = vmatpush.msra.mxu0 %v1399_v7  ;;  %862 = vmatpush.msra.mxu2 %v1393_v8 }
 0x43c   : > { %1274 = vmatmul.msk.f32.gmra.mxu0 %vm603_vm2, %v729_v11  ;;  %v939_v39 = vmul.f32 %v1999_v35, %v937_v22  ;;  %v1015_v35 = vld [vmem:[#allocation9 + $0x40] sm:$0xff] }
 0x43d   : > { %863 = vmatpush.msra.mxu2 %v1394_v13  ;;  %1034 = vmatpush.msrb.mxu1 %v1015_v35 }
 0x43e   : > { %1279 = vmatmul.msk.f32.vlgmr.msra.gmra.mxu2 %vm603_vm2, %v834_v15 }
 0x43f   : > { %1035 = vmatpush.msrb.mxu1 %v1014_v36 }
 0x441   : > { %1036 = vmatpush.msrb.mxu1 %v1013_v37 }
 0x443   : > { %1037 = vmatpush.msrb.mxu1 %v1012_v38 }
 0x444   : > { %1285 = vmatmul.msk.f32.vlgmr.msra.gmra.mxu0 %vm603_vm2, %v938_v19 }
 0x445   : > { %1038 = vmatpush.msrb.mxu1 %v1011_v40 }
 0x446   : > { %1280 = vmatmul.msk.f32.gmra.mxu2 %vm603_vm2, %v835_v21 }
 0x447   : > { %1039 = vmatpush.msrb.mxu1 %v1010_v42 }
 0x449   : > { %1040 = vmatpush.msrb.mxu1 %v1009_v43 }
 0x44b   : > { %1041 = vmatpush.msrb.mxu1 %v1008_v44 }
 0x44c   : > { %1286 = vmatmul.msk.f32.gmra.mxu0 %vm603_vm2, %v939_v39 }
 0x44d   : > { %1042 = vmatpush.msrb.mxu1 %v1007_v45 }
 0x4b0   : > { %v761_v26 = vpop.f32.mrf.mxu0 }
 0x4b1   : > { %977 = vrot.lane.b32.xlu1 %v761_v26, %s1683_s13 }
 0x4b9   : > { %v764_v29 = vpop.f32.mrf.mxu0 }
 0x4c1   : > { %v969_v30 = vpop.f32.mrf.mxu0  ;;  %v865_v31 = vpop.f32.mrf.mxu2 }
 0x4c2   : > { %993 = vrot.lane.b32.xlu1 %v969_v30, %s1682_s12  ;;  %985 = vrot.lane.b32.xlu0 %v865_v31, %s1681_s10  ;;  %v1402_v30 = vld [vmem:[#allocation10] ss:$0 sm:$0xff] }
 0x4c9   : > { %v972_v32 = vpop.f32.mrf.mxu0  ;;  %v868_v33 = vpop.f32.mrf.mxu2 }
 0x4ca   : > { %995 = vrot.lane.b32.xlu2 %v972_v32, %s1682_s12  ;;  %979 = vrot.lane.b32.xlu0 %v764_v29, %s1683_s13 }
 0x4cb   : > { %987 = vrot.lane.b32.xlu1 %v868_v33, %s1681_s10 }
 0x523   : > { %v978_v46 = vpop.permute.xlu1 %977 }
 0x524   : > { %v999_v48 = vsel %vm565_vm0, %v1967_v56, %v978_v46  ;;  %v996_v54 = vpop.permute.xlu2 %995 }
 0x534   : > { %v994_v49 = vpop.permute.xlu1 %993  ;;  %v986_v2 = vpop.permute.xlu0 %985 }
 0x535   : > { %v1002_v3 = vsel %vm1001_vm4, %v999_v48, %v986_v2 }
 0x536   : > { %v1005_v50 = vsel %vm1004_vm5, %v1002_v3, %v994_v49 }
 0x537   : > { %1043 = vmatmul.f32.vlgmr.msrb.gmra.mxu1 %v1005_v50 }
 0x53c   : > { %v980_v51 = vpop.permute.xlu0 %979 }
 0x53d   : > { %v1000_v52 = vsel %vm565_vm0, %v1969_v57, %v980_v51  ;;  %v988_v53 = vpop.permute.xlu1 %987  ;;  %v1684_v57 = vmov 128.0  }
 0x53e   : > { %v1003_v55 = vsel %vm1001_vm4, %v1000_v52, %v988_v53  ;;  %1435 = vrcp.f32 %v1684_v57 }
 0x53f   : > { %v1006_v58 = vsel %vm1004_vm5, %v1003_v55, %v996_v54 }
 0x540   : > { %1046 = vmatmul.f32.gmra.mxu1 %v1006_v58 }
 0x544   : > { %v1436_v1 = vpop.eup %1435 }
 0x545   : > { %v1059_v4 = vmul.f32 128.0, %v1436_v1  ;;  %vm1063_vm6 = vweird.f32 %v1436_v1 }
 0x547   : > { %v1060_v5 = vsub.f32 1.0, %v1059_v4 }
 0x549   : > { %v1061_v6 = vmul.f32 %v1436_v1, %v1060_v5 }
 0x54b   : > { %v1062_v7 = vadd.f32 %v1436_v1, %v1061_v6 }
 0x54d   : > { %v1064_v8 = vsel %vm1063_vm6, %v1436_v1, %v1062_v7 }
 0x5b4   : > { %v1044_v60 = vpop.f32.mrf.mxu1 }
 0x5b5   : > { %v1045_v56 = vadd.f32 %v1400_v59, %v1044_v60 }
 0x5b7   : > { %v1052_v61 = vadd.f32 %v1045_v56, %v1885_v41 }
 0x5b9   : > { %1054 = vadd.xlane.f32.xlu0 %v1052_v61 }
 0x5bd   : > { %v1047_v62 = vpop.f32.mrf.mxu1 }
 0x5be   : > { %v1048_v63 = vadd.f32 %v1400_v59, %v1047_v62 }
 0x5c0   : > { %v1053_v0 = vadd.f32 %v1048_v63, %v1891_v47 }
 0x5c2   : > { %1056 = vadd.xlane.f32.xlu1 %v1053_v0 }
 0x62c   : > { %v1055_v9 = vpop.xlane.xlu0 %1054 }
 0x62d   : > { %v1065_v11 = vmul.f32 %v1064_v8, %v1055_v9 }
 0x62f   : > { %v1067_v12 = vsub.f32 %v1052_v61, %v1065_v11 }
 0x631   : > { %v1069_v13 = vmul.f32 %v1067_v12, %v1067_v12 }
 0x633   : > { %1071 = vadd.xlane.f32.xlu2 %v1069_v13 }
 0x635   : > { %v1057_v41 = vpop.xlane.xlu1 %1056 }
 0x636   : > { %v1066_v15 = vmul.f32 %v1064_v8, %v1057_v41 }
 0x638   : > { %v1068_v16 = vsub.f32 %v1053_v0, %v1066_v15 }
 0x63a   : > { %v1070_v47 = vmul.f32 %v1068_v16, %v1068_v16 }
 0x63c   : > { %1073 = vadd.xlane.f32.xlu0 %v1070_v47 }
 0x6a6   : > { %v1072_v10 = vpop.xlane.xlu2 %1071 }
 0x6a7   : > { %v1075_v17 = vmul.f32 %v1072_v10, %v1064_v8 }
 0x6a9   : > { %v1077_v18 = vadd.f32 1e-05, %v1075_v17 }
 0x6ab   : > { %1437 = vrsqrt.f32 %v1077_v18  ;;  %vm1085_vm8 = vweird.f32 %v1077_v18 }
 0x6af   : > { %v1074_v19 = vpop.xlane.xlu0 %1073 }
 0x6b0   : > { %v1076_v20 = vmul.f32 %v1074_v19, %v1064_v8 }
 0x6b1   : > { %v1438_v21 = vpop.eup %1437 }
 0x6b2   : > { %v1080_v22 = vmul.f32 %v1438_v21, %v1077_v18  ;;  %v1078_v39 = vadd.f32 1e-05, %v1076_v20  ;;  %vm1086_vm7 = vweird.f32 %v1438_v21 }
 0x6b3   : > { %vm1087_vm9 = vmor %vm1085_vm8, %vm1086_vm7 }
 0x6b4   : > { %v1081_v14 = vmul.f32 %v1438_v21, %v1080_v22  ;;  %1439 = vrsqrt.f32 %v1078_v39  ;;  %vm1095_vm11 = vweird.f32 %v1078_v39 }
 0x6b6   : > { %v1082_v23 = vmul.f32 0.5, %v1081_v14 }
 0x6b8   : > { %v1083_v24 = vsub.f32 1.5, %v1082_v23 }
 0x6ba   : > { %v1440_v25 = vpop.eup %1439  ;;  %v1084_v26 = vmul.f32 %v1438_v21, %v1083_v24 }
 0x6bb   : > { %v1090_v28 = vmul.f32 %v1440_v25, %v1078_v39  ;;  %vm1096_vm10 = vweird.f32 %v1440_v25 }
 0x6bc   : > { %v1088_v29 = vsel %vm1087_vm9, %v1438_v21, %v1084_v26  ;;  %vm1097_vm12 = vmor %vm1095_vm11, %vm1096_vm10 }
 0x6bd   : > { %v1099_v31 = vmul.f32 %v1088_v29, %v1067_v12  ;;  %v1091_v32 = vmul.f32 %v1440_v25, %v1090_v28 }
 0x6bf   : > { %v1104_v33 = vmul.f32 %v1401_v27, %v1099_v31  ;;  %v1092_v34 = vmul.f32 0.5, %v1091_v32 }
 0x6c1   : > { %v1109_v35 = vadd.f32 %v1402_v30, %v1104_v33  ;;  %v1093_v36 = vsub.f32 1.5, %v1092_v34 }
 0x6c3   : > { %1111 = vst [vmem:[%s431_s24] sm:$0xff] %v1109_v35  ;;  %v1094_v37 = vmul.f32 %v1440_v25, %v1093_v36 }
 0x6c5   : > { %v1098_v38 = vsel %vm1097_vm12, %v1440_v25, %v1094_v37 }
 0x6c6   : > { %v1100_v40 = vmul.f32 %v1098_v38, %v1068_v16 }
 0x6c8   : > { %v1105_v42 = vmul.f32 %v1401_v27, %v1100_v40 }
 0x6ca   : > { %v1110_v43 = vadd.f32 %v1402_v30, %v1105_v42 }
 0x6cc   : > { %1112 = vst [vmem:[%s431_s24 + $0x8] sm:$0xff] %v1110_v43 }
 0x6cd PF: > { %p23_p4 = scmp.ge.s32.totalorder %s1797_s22, 4   ;;  %s2080_s27 = smov %s1663_s28 }
 0x6ce   : > { %s2081_s28 = smov %s1667_s29  ;;  %s2082_s29 = smov %s1808_s26 }
 0x6cf   : > { %s2083_s30 = smov %s1797_s22  ;;  %25 = sbr.rel (!%p23_p4) target bundleno = 11 (0xb), region = 121 }
 0x6d4   :  { %1134 = vsyncpa [#allocation3], 1 }
 0x6d5   :  { %1136 = vsyncpa [#allocation3 + $0x1], 1 }
 0x6d6   :  { %1137 = vsyncpa [#allocation5], 1 }
 0x6d7   :  { %1139 = vsyncpa [#allocation5 + $0x1], 1 }
 0x6d8   :  { %1140 = vsyncpa [#allocation8], 1 }
 0x6d9   :  { %1141 = vsyncpa [#allocation11], 1 }

// kernel: transformer_decoder_block.3
= control target key start
LH: loop header
LB: loop body
LE: loop exit
PB: predicated region body
PF: predicated region fallthrough
CT: control target
= control target key end

     0   :  { %s3482_s0 = inlined_call_operand.hbm [shape: s32[2,16,24], index: 0, kind: input, shape index: {}]   ;;  %s3483_s1 = inlined_call_operand.vmem [shape: f32[2,16,128], index: 1, kind: input, shape index: {}]   ;;  %s3484_s2 = inlined_call_operand.hbm [shape: f32[2,24,128], index: 2, kind: input, shape index: {}]   ;;  %s3485_s3 = inlined_call_operand.hbm [shape: f32[2,24,128], index: 3, kind: input, shape index: {}]   ;;  %s3486_s4 = inlined_call_operand.hbm [shape: f32[128,128], index: 4, kind: input, shape index: {}]   ;;  %s3487_s5 = inlined_call_operand.vmem [shape: f32[1,128], index: 5, kind: input, shape index: {}]   ;;  %s3488_s6 = inlined_call_operand.hbm [shape: f32[128,128], index: 6, kind: input, shape index: {}]   ;;  %s3489_s7 = inlined_call_operand.vmem [shape: f32[1,128], index: 7, kind: input, shape index: {}]   ;;  %s3490_s8 = inlined_call_operand.hbm [shape: f32[128,128], index: 8, kind: input, shape index: {}]   ;;  %s3491_s9 = inlined_call_operand.vmem [shape: f32[1,128], index: 9, kind: input, shape index: {}]   ;;  %s3492_s10 = inlined_call_operand.hbm [shape: f32[128,128], index: 10, kind: input, shape index: {}]   ;;  %s3493_s11 = inlined_call_operand.vmem [shape: f32[1,128], index: 11, kind: input, shape index: {}]   ;;  %s3494_s12 = inlined_call_operand.vmem [shape: f32[1,128], index: 12, kind: input, shape index: {}]   ;;  %s3495_s13 = inlined_call_operand.vmem [shape: f32[1,128], index: 13, kind: input, shape index: {}]   ;;  %s3496_s14 = inlined_call_operand.vmem [shape: f32[1,128], index: 14, kind: input, shape index: {}]   ;;  %s3497_s15 = inlined_call_operand.vmem [shape: f32[1,128], index: 15, kind: input, shape index: {}]   ;;  %s3498_s16 = inlined_call_operand.hbm [shape: f32[128,512], index: 16, kind: input, shape index: {}]   ;;  %s3499_s17 = inlined_call_operand.vmem [shape: f32[1,512], index: 17, kind: input, shape index: {}]   ;;  %s3500_s18 = inlined_call_operand.hbm [shape: f32[512,128], index: 18, kind: input, shape index: {}]   ;;  %s3501_s19 = inlined_call_operand.vmem [shape: f32[1,128], index: 19, kind: input, shape index: {}]   ;;  %s3502_s20 = inlined_call_operand.hbm [shape: f32[2,16,128], index: 20, kind: output, shape index: {}]  }
   0x1   :  { %3521 = sst [smem:[#allocation30_spill]] %s3482_s0 }
   0x2   :  { %3522 = sst [smem:[#allocation31_spill]] %s3483_s1 }
   0x3   :  { %3523 = sst [smem:[#allocation32_spill]] %s3484_s2 }
   0x4   :  { %3524 = sst [smem:[#allocation33_spill]] %s3485_s3 }
   0x5   :  { %3525 = sst [smem:[#allocation34_spill]] %s3486_s4 }
   0x6   :  { %3526 = sst [smem:[#allocation35_spill]] %s3488_s6 }
   0x7   :  { %3527 = sst [smem:[#allocation36_spill]] %s3490_s8 }
   0x8   :  { %3528 = sst [smem:[#allocation37_spill]] %s3492_s10 }
   0x9   :  { %3529 = sst [smem:[#allocation38_spill]] %s3495_s13 }
   0xa   :  { %3530 = sst [smem:[#allocation39_spill]] %s3496_s14 }
   0xb   :  { %3531 = sst [smem:[#allocation40_spill]] %s3497_s15 }
   0xc   :  { %3532 = sst [smem:[#allocation41_spill]] %s3498_s16 }
   0xd   :  { %3533 = sst [smem:[#allocation42_spill]] %s3499_s17 }
   0xe   :  { %3534 = sst [smem:[#allocation43_spill]] %s3500_s18 }
   0xf   :  { %3535 = sst [smem:[#allocation44_spill]] %s3501_s19 }
  0x10   :  { %3536 = sst [smem:[#allocation45_spill]] %s3502_s20 }
  0x11   :  { %25 = vsyncpa [#allocation3], 0 }
  0x12   :  { %27 = vsyncpa [#allocation3 + $0x1], 0 }
  0x13   :  { %28 = vsyncpa [#allocation6], 0 }
  0x14   :  { %30 = vsyncpa [#allocation6 + $0x1], 0 }
  0x15   :  { %31 = vsyncpa [#allocation9], 0 }
  0x16   :  { %32 = vsyncpa [#allocation12], 0 }
  0x17   :  { %33 = vsyncpa [#allocation15], 0 }
  0x18   :  { %34 = vsyncpa [#allocation4], 0 }
  0x19   :  { %36 = vsyncpa [#allocation4 + $0x1], 0  ;;  %s2975_s1 = smov 0   ;;  %s2977_s22 = smov 0  }
  0x1a   :  { %s2979_s23 = smov 0   ;;  %s2981_s24 = smov 0  }
  0x1b LB: > { %3537 = sst [smem:[#allocation24_spill]] %s2840_s1  ;;  %s2999_s27 = sadd.s32 4294967295, %s2852_s24   ;;  %s2852_s24 = sphi %s2981_s24, %s3580_s24   ;;  %s2848_s23 = sphi %s2979_s23, %s3582_s23   ;;  %s2844_s22 = sphi %s2977_s22, %s3584_s22   ;;  %s2840_s1 = sphi %s2975_s1, %s3583_s1  }
  0x1c   : > { %3538 = sst [smem:[#allocation25_spill]] %s2848_s23  ;;  %p2226_p0 = scmp.ge.s32.totalorder %s2852_s24, 1 }
  0x1d   : > { %s3539_s3 = sld [smem:[#allocation34_spill]]  ;;  %p3518_p1 = scmp.eq.s32.totalorder %s2999_s27, 0 }
  0x1e   : > { %p513_p2 = scmp.lt.s32.totalorder %s2852_s24, 3  ;;  %s2854_s4 = smov [#allocation8]  }
  0x1f   : > { %s526_s29 = sshll.u32 %s2854_s4, 4  ;;  %s3541_s8 = sld [smem:[#allocation36_spill]]  ;;  %s527_s29 = int_to_ptr.vmem [resolvable:$true] %s526_s29 }
  0x20   : > { %p3004_p3 = pnand %p2226_p0, %p513_p2  ;;  %s3543_s16 = sld [smem:[#allocation41_spill]] }
  0x21   : > { %s2855_s20 = smov [#allocation11]   ;;  %s3507_s30 = smov 128  }
  0x22   : > { %p2323_p4 = pneg %p3004_p3  ;;  %s560_s15 = sshll.u32 %s2855_s20, 4  ;;  %s561_s15 = int_to_ptr.vmem [resolvable:$true] %s560_s15 }
  0x23   : > { %s524_s26 = sshll.u32 %s3539_s3, 4  ;;  %s3509_s0 = smov 8   ;;  %s525_s26 = int_to_ptr.hbm [resolvable:$true] %s524_s26 }
  0x24   : > { %p3016_p6 = pnand %p2323_p4, %p3518_p1  ;;  %s2858_s20 = smov [#allocation14]  }
  0x25   : > { %s558_s21 = sshll.u32 %s3541_s8, 4  ;;  %s606_s25 = sshll.u32 %s2858_s20, 4  ;;  %s559_s21 = int_to_ptr.hbm [resolvable:$true] %s558_s21  ;;  %s607_s25 = int_to_ptr.vmem [resolvable:$true] %s606_s25 }
  0x26   : > { %s604_s4 = sshll.u32 %s3543_s16, 4  ;;  %s2859_s3 = smov 512   ;;  %s605_s4 = int_to_ptr.hbm [resolvable:$true] %s604_s4 }
  0x27   : > { %2326 = dma.hbm_to_vmem [thread:$0]  (!%p3016_p6), %s525_s26, 2048, %s527_s29, [#allocation9], %s3507_s30, %s3507_s30, %s3509_s0  }
  0x28   : > { %2332 = dma.hbm_to_vmem [thread:$0]  (!%p3016_p6), %s559_s21, 2048, %s561_s15, [#allocation12], %s3507_s30, %s3507_s30, %s3509_s0  }
  0x29   : > { %s2860_s8 = smov 32   ;;  %s2225_s26 = sadd.s32 4294967294, %s2852_s24  }
  0x2a   : > { %2338 = dma.hbm_to_vmem [thread:$0]  (!%p3016_p6), %s605_s4, 8192, %s607_s25, [#allocation15], %s2859_s3, %s2859_s3, %s2860_s8  }
  0x2b   : > { %s3037_s29 = sadd.s32 1, %s2852_s24   ;;  %s49_s16 = sadd.s32 1, %s2848_s23 }
  0x2c   : > { %3544 = sst [smem:[#allocation26_spill]] %s3037_s29  ;;  %s46_s14 = ssub.s32 %s2852_s24, %s3037_s29 }
  0x2d   : > { %p56_p7 = scmp.ne.s32.totalorder %s2848_s23, %s2844_s22  ;;  %p47_p8 = scmp.eq.s32.totalorder %s46_s14, 0 }
  0x2e   : > { %p57_p9 = scmp.eq.s32.totalorder %s2852_s24, 0  ;;  %p62_p10 = scmp.ne.s32.totalorder %s2844_s22, %s2840_s1 }
  0x2f   : > { %p500_p11 = scmp.eq.s32.totalorder %s2999_s27, 1  ;;  %p506_p2 = scmp.eq.s32.totalorder %s2225_s26, 1 }
  0x30   : > { %s3049_s15 = scalar_select %p47_p8, %s2848_s23, %s49_s16  }
  0x31   : > { %p58_p12 = por %p57_p9, %p56_p7  ;;  %p3053_p13 = por %p3518_p1, %p62_p10 }
  0x32   : > { %3545 = sst [smem:[#allocation27_spill]] %s3049_s15  ;;  %p3057_p0 = por %p500_p11, %p56_p7 }
  0x33   : > { %p2362_p4 = scmp.lt.s32.totalorder %s2852_s24, 2  ;;  %s3063_s14 = sand.u32 1, %s2848_s23  }
  0x34   : > { %s3547_s21 = scalar_select %p3057_p0, 1, 0 }
  0x35   : > { %p3065_p5 = por %p506_p2, %p62_p10  ;;  %s670_s16 = sand.u32 1, %s2852_s24  }
  0x36   : > { %3548 = sst [smem:[#allocation28_spill]] %s3547_s21  ;;  %p3070_p8 = pnand %p2362_p4, %p58_p12 }
  0x37   : > { %s3549_s4 = scalar_select %p3065_p5, 1, 0 }
  0x38   : > { %s3519_s25 = smul.u32 24, %s3063_s14  ;;  %s3552_s6 = sld [smem:[#allocation35_spill]] }
  0x39   : > { %3550 = sst [smem:[#allocation29_spill]] %s3549_s4  ;;  %s3520_s0 = smul.u32 24, %s2852_s24 }
  0x3a   : > { %s3553_s29 = sld [smem:[#allocation32_spill]]  ;;  %s674_s1 = scalar_lea.vmem [#allocation5], %s3519_s25 }
  0x3b   : > { %s682_s21 = sshll.u32 %s674_s1, 4  ;;  %s3088_s17 = scalar_lea.sflag [#allocation6], %s670_s16  ;;  %s683_s21 = int_to_ptr.vmem [resolvable:$true] %s682_s21 }
  0x3c   : > { %p2594_p9 = pneg %p3070_p8 }
  0x3e   : > { %s541_s26 = sshll.u32 %s3552_s6, 4  ;;  %s3079_s26 = int_to_ptr.hbm [resolvable:$true] %s541_s26 }
  0x40   : > { %s679_s4 = scalar_lea.hbm %s3553_s29, %s3520_s0  ;;  %s2597_s3 = scalar_lea.hbm %s3553_s29, 48 }
  0x41   : > { %s680_s19 = sshll.u32 %s679_s4, 4  ;;  %s681_s19 = int_to_ptr.hbm [resolvable:$true] %s680_s19 }
  0x42   : > { %s2590_s13 = sshra.s32 %s681_s19, 4  ;;  %s2591_s13 = int_to_ptr.hbm [resolvable:$true] %s2590_s13 }
  0x43   : > { %s2592_s30 = scalar_lea.hbm %s2591_s13, 24  ;;  %p2598_p12 = scmp.lt.s32.totalorder %s2591_s13, %s3553_s29 }
  0x44   : > { %p2593_p7 = scmp.ne.s32.totalorder %s2591_s13, %s2592_s30  ;;  %p2599_p2 = scmp.lt.s32.totalorder %s2597_s3, %s2592_s30 }
  0x46   : > { %p2595_p10 = pnand %p2594_p9, %p2593_p7  ;;  %p2600_p4 = por %p2599_p2, %p2598_p12 }
  0x48   : > { %p2596_p11 = pneg %p2595_p10 }
  0x4a   : > { %p2601_p1 = pnand %p2600_p4, %p2596_p11 }
  0x4c   : > { %2604 = shalt.err (!%p2601_p1)
}
  0x4d   : > { %s3554_s16 = smov 8   ;;  %s3555_s25 = smov 128  }
  0x4e   : > { %2348 = dma.hbm_to_vmem [thread:$0]  (!%p3070_p8), %s681_s19, 384, %s683_s21, %s3088_s17, %s3555_s25, %s3555_s25, %s3554_s16  }
  0x4f   : > { %s2861_s23 = smov [#allocation10]   ;;  %s3556_s10 = sld [smem:[#allocation37_spill]] }
  0x50   : > { %s543_s15 = sshll.u32 %s2861_s23, 4  ;;  %s3557_s18 = sld [smem:[#allocation43_spill]]  ;;  %s544_s15 = int_to_ptr.vmem [resolvable:$true] %s543_s15 }
  0x51   : > { %2329 = dma.hbm_to_vmem [thread:$0]  (!%p3016_p6), %s3079_s26, 2048, %s544_s15, [#allocation9], %s3555_s25, %s3555_s25, %s3554_s16  }
  0x52   : > { %s2862_s21 = smov [#allocation13]   ;;  %s2863_s23 = smov [#allocation16]  }
  0x53   : > { %s577_s0 = sshll.u32 %s2862_s21, 4  ;;  %s623_s1 = sshll.u32 %s2863_s23, 4  ;;  %s578_s0 = int_to_ptr.vmem [resolvable:$true] %s577_s0  ;;  %s624_s1 = int_to_ptr.vmem [resolvable:$true] %s623_s1 }
  0x54   : > { %s2234_s13 = sshll.u32 %s3063_s14, 4  ;;  %s2283_s26 = sshll.u32 %s2852_s24, 4 }
  0x55   : > { %s575_s30 = sshll.u32 %s3556_s10, 4  ;;  %s3558_s4 = sld [smem:[#allocation30_spill]]  ;;  %s576_s30 = int_to_ptr.hbm [resolvable:$true] %s575_s30 }
  0x56   : > { %s621_s19 = sshll.u32 %s3557_s18, 4  ;;  %s644_s6 = scalar_lea.vmem [#allocation2], %s2234_s13  ;;  %s622_s19 = int_to_ptr.hbm [resolvable:$true] %s621_s19 }
  0x57   : > { %2335 = dma.hbm_to_vmem [thread:$0]  (!%p3016_p6), %s576_s30, 2048, %s578_s0, [#allocation12], %s3555_s25, %s3555_s25, %s3554_s16  }
  0x58   : > { %2341 = dma.hbm_to_vmem [thread:$0]  (!%p3016_p6), %s622_s19, 8192, %s624_s1, [#allocation15], %s3555_s25, %s3555_s25, %s3554_s16  }
  0x59   : > { %s652_s10 = sshll.u32 %s644_s6, 4  ;;  %s641_s0 = scalar_lea.sflag [#allocation3], %s3063_s14  ;;  %s653_s10 = int_to_ptr.vmem [resolvable:$true] %s652_s10 }
  0x5b   : > { %s649_s21 = scalar_lea.hbm %s3558_s4, %s2283_s26  ;;  %s2717_s1 = scalar_lea.hbm %s3558_s4, 32 }
  0x5c   : > { %s650_s18 = sshll.u32 %s649_s21, 4  ;;  %s651_s18 = int_to_ptr.hbm [resolvable:$true] %s650_s18 }
  0x5d   : > { %s2710_s30 = sshra.s32 %s651_s18, 4  ;;  %s2711_s30 = int_to_ptr.hbm [resolvable:$true] %s2710_s30 }
  0x5e   : > { %s2712_s23 = scalar_lea.hbm %s2711_s30, 16  ;;  %p2718_p6 = scmp.lt.s32.totalorder %s2711_s30, %s3558_s4 }
  0x5f   : > { %p2713_p1 = scmp.ne.s32.totalorder %s2711_s30, %s2712_s23  ;;  %p2719_p11 = scmp.lt.s32.totalorder %s2717_s1, %s2712_s23 }
  0x61   : > { %p2715_p7 = pnand %p2713_p1, %p2594_p9  ;;  %p2720_p12 = por %p2719_p11, %p2718_p6 }
  0x63   : > { %p2716_p10 = pneg %p2715_p7 }
  0x65   : > { %p2721_p2 = pnand %p2720_p12, %p2716_p10 }
  0x67   : > { %2724 = shalt.err (!%p2721_p2)
}
  0x68   : > { %2345 = dma.hbm_to_vmem [thread:$0]  (!%p3070_p8), %s651_s18, 256, %s653_s10, %s641_s0, %s3555_s25, %s3555_s25, %s3554_s16  }
  0x69   : > { %s3559_s6 = smul.u32 24, %s2852_s24  ;;  %s3560_s21 = sld [smem:[#allocation33_spill]] }
  0x6a   : > { %s3561_s19 = smul.u32 24, %s3063_s14 }
  0x6c   : > { %s696_s30 = scalar_lea.vmem [#allocation7], %s3561_s19 }
  0x6d   : > { %s704_s23 = sshll.u32 %s696_s30, 4  ;;  %s705_s23 = int_to_ptr.vmem [resolvable:$true] %s704_s23 }
  0x6f   : > { %s701_s2 = scalar_lea.hbm %s3560_s21, %s3559_s6  ;;  %s2747_s0 = scalar_lea.hbm %s3560_s21, 48 }
  0x70   : > { %s702_s1 = sshll.u32 %s701_s2, 4  ;;  %s703_s1 = int_to_ptr.hbm [resolvable:$true] %s702_s1 }
  0x71   : > { %s2740_s15 = sshra.s32 %s703_s1, 4  ;;  %s2741_s15 = int_to_ptr.hbm [resolvable:$true] %s2740_s15 }
  0x72   : > { %s2742_s26 = scalar_lea.hbm %s2741_s15, 24  ;;  %p2748_p10 = scmp.lt.s32.totalorder %s2741_s15, %s3560_s21 }
  0x73   : > { %p2743_p4 = scmp.ne.s32.totalorder %s2741_s15, %s2742_s26  ;;  %p2749_p6 = scmp.lt.s32.totalorder %s2747_s0, %s2742_s26 }
  0x75   : > { %p2745_p1 = pnand %p2743_p4, %p2594_p9  ;;  %p2750_p11 = por %p2749_p6, %p2748_p10 }
  0x77   : > { %p2746_p7 = pneg %p2745_p1 }
  0x79   : > { %p2751_p12 = pnand %p2750_p11, %p2746_p7 }
  0x7b   : > { %2754 = shalt.err (!%p2751_p12)
}
  0x7c   : > { %2351 = dma.hbm_to_vmem [thread:$0]  (!%p3070_p8), %s703_s1, 384, %s705_s23, %s3088_s17, %s3555_s25, %s3555_s25, %s3554_s16  }
  0x7d   : > { %716 = sbr.rel (%p3004_p3) target bundleno = 2407 (0x967), region = 100  ;;  %s3174_s14 = sand.u32 (!%p3004_p3), 1, %s2844_s22  }
  0x7e   : > { %s2240_s3 = sshll.u32 (!%p3004_p3), %s3174_s14, 4  ;;  %s719_s2 = scalar_lea.sflag (!%p3004_p3), [#allocation3], %s3174_s14 }
  0x7f   : > { %s3180_s19 = scalar_lea.vmem (!%p3004_p3), [#allocation2], %s2240_s3 }
  0x82   : > { %2815 = dma.done.wait (%p3053_p13), %s719_s2, 256  }
  0x83   : > { %2817 = vsyncadd (%p3053_p13), %s719_s2, 4294967040  ;;  %s728_s17 = sand.u32 1, %s2999_s27   ;;  %s2290_s28 = smul.u32 24, %s3174_s14 }
  0x84   : > { %s729_s20 = scalar_lea.sflag [#allocation6], %s728_s17 }
  0x85   : > { %s3188_s25 = scalar_lea.vmem [#allocation5], %s2290_s28 }
  0x86   : > { %2819 = dma.done.wait (%p3053_p13), %s729_s20, 768  }
  0x87   : > { %2821 = vsyncadd (%p3053_p13), %s729_s20, 4294966528  ;;  %s3194_s16 = scalar_lea.vmem [#allocation7], %s2290_s28  ;;  %p3562_p3 = scmp.eq.s32.totalorder %s2999_s27, 0 }
  0x89   : > { %2823 = dma.done.wait (%p3562_p3), [#allocation9], 4096   ;;  %p3563_p8 = pmov %p3562_p3 }
  0x8a   : > { %p3564_p9 = pmov %p3562_p3 }
  0x8b   : > { %2825 = vsyncadd (%p3563_p8), [#allocation9], 4294963200 }
  0x8c   : > { %2827 = dma.done.wait (%p3564_p9), [#allocation12], 4096   ;;  %p3565_p2 = pmov %p3562_p3 }
  0x8e   : > { %2829 = vsyncadd (%p3565_p2), [#allocation12], 4294963200  ;;  %p3566_p4 = pmov %p3565_p2 }
  0x8f   : > { %p3567_p1 = pmov %p3565_p2 }
  0x90   : > { %2831 = dma.done.wait (%p3566_p4), [#allocation15], 16384  }
  0x91   : > { %2833 = vsyncadd (%p3567_p1), [#allocation15], 4294950912  ;;  %v913_v0 = vld [vmem:[#allocation10 + $0x78] sm:$0xff]  ;;  %v912_v1 = vld [vmem:[#allocation10 + $0x70] sm:$0xff]  ;;  %p845_p13 = scmp.lt.s32.totalorder %s2999_s27, 1  ;;  %s3568_s15 = sld [smem:[#allocation31_spill]] }
  0x92   : > { %918 = vmatpush.msra.mxu1 %v913_v0  ;;  %v911_v2 = vld [vmem:[#allocation10 + $0x68] sm:$0xff]  ;;  %v910_v3 = vld [vmem:[#allocation10 + $0x60] sm:$0xff]  ;;  %v867_v4 = vld [vmem:[#allocation8 + $0x78] sm:$0xff]  ;;  %vm999_vm0 = vcmask 261120   ;;  %s2864_s6 = smov 64   ;;  %s2865_s2 = smov 96  }
  0x93   : > { %872 = vmatpush.msra.mxu0 %v867_v4  ;;  %v866_v5 = vld [vmem:[#allocation8 + $0x70] sm:$0xff]  ;;  %v909_v6 = vld [vmem:[#allocation10 + $0x58] sm:$0xff]  ;;  %v865_v7 = vld [vmem:[#allocation8 + $0x68] sm:$0xff]  ;;  %s846_s8 = scalar_select %p845_p13, %s2999_s27, 1  ;;  %vm1040_vm2 = vcmask 195584   ;;  %vm1460_vm4 = vcmask 523264  }
  0x94   : > { %919 = vmatpush.msra.mxu1 %v912_v1  ;;  %v908_v8 = vld [vmem:[#allocation10 + $0x50] sm:$0xff]  ;;  %v864_v9 = vld [vmem:[#allocation8 + $0x60] sm:$0xff]  ;;  %v907_v10 = vld [vmem:[#allocation10 + $0x48] sm:$0xff]  ;;  %s2866_s17 = smov 32   ;;  %vm1463_vm5 = vcmask 785408   ;;  %s3569_s1 = sld [smem:[#allocation38_spill]] }
  0x95   : > { %873 = vmatpush.msra.mxu0 %v866_v5  ;;  %v863_v11 = vld [vmem:[#allocation8 + $0x58] sm:$0xff]  ;;  %v906_v12 = vld [vmem:[#allocation10 + $0x40] sm:$0xff]  ;;  %v862_v13 = vld [vmem:[#allocation8 + $0x50] sm:$0xff]  ;;  %s2284_s30 = sshll.u32 %s846_s8, 4  ;;  %s3570_s10 = sld [smem:[#allocation42_spill]] }
  0x96   : > { %920 = vmatpush.msra.mxu1 %v911_v2  ;;  %v905_v14 = vld [vmem:[#allocation10 + $0x38] sm:$0xff]  ;;  %v861_v15 = vld [vmem:[#allocation8 + $0x48] sm:$0xff]  ;;  %v904_v16 = vld [vmem:[#allocation10 + $0x30] sm:$0xff]  ;;  %s3571_s13 = sld [smem:[#allocation44_spill]] }
  0x97   : > { %874 = vmatpush.msra.mxu0 %v865_v7  ;;  %v860_v17 = vld [vmem:[#allocation8 + $0x40] sm:$0xff]  ;;  %v903_v18 = vld [vmem:[#allocation10 + $0x28] sm:$0xff]  ;;  %v859_v19 = vld [vmem:[#allocation8 + $0x38] sm:$0xff]  ;;  %s849_s26 = scalar_lea.vmem %s3568_s15, %s2284_s30  ;;  %s3574_s23 = sld [smem:[#allocation45_spill]] }
  0x98   : > { %921 = vmatpush.msra.mxu1 %v910_v3  ;;  %v962_v20 = vld [vmem:[#allocation11 + $0x78] sm:$0xff]  ;;  %v961_v21 = vld [vmem:[#allocation11 + $0x70] sm:$0xff]  ;;  %v902_v22 = vld [vmem:[#allocation10 + $0x20] sm:$0xff] }
  0x99   : > { %875 = vmatpush.msra.mxu0 %v864_v9  ;;  %v858_v23 = vld [vmem:[#allocation8 + $0x30] sm:$0xff]  ;;  %967 = vmatpush.msra.mxu2 %v962_v20  ;;  %v960_v24 = vld [vmem:[#allocation11 + $0x68] sm:$0xff]  ;;  %v901_v25 = vld [vmem:[#allocation10 + $0x18] sm:$0xff] }
  0x9a   : > { %922 = vmatpush.msra.mxu1 %v909_v6  ;;  %v857_v26 = vld [vmem:[#allocation8 + $0x28] sm:$0xff]  ;;  %v959_v27 = vld [vmem:[#allocation11 + $0x60] sm:$0xff]  ;;  %v900_v28 = vld [vmem:[#allocation10 + $0x10] sm:$0xff] }
  0x9b   : > { %876 = vmatpush.msra.mxu0 %v863_v11  ;;  %968 = vmatpush.msra.mxu2 %v961_v21  ;;  %v856_v29 = vld [vmem:[#allocation8 + $0x20] sm:$0xff]  ;;  %v958_v30 = vld [vmem:[#allocation11 + $0x58] sm:$0xff]  ;;  %v899_v31 = vld [vmem:[#allocation10 + $0x8] sm:$0xff] }
  0x9c   : > { %923 = vmatpush.msra.mxu1 %v908_v8  ;;  %v855_v32 = vld [vmem:[#allocation8 + $0x18] sm:$0xff]  ;;  %v957_v33 = vld [vmem:[#allocation11 + $0x50] sm:$0xff]  ;;  %v898_v34 = vld [vmem:[#allocation10] sm:$0xff] }
  0x9d   : > { %877 = vmatpush.msra.mxu0 %v862_v13  ;;  %969 = vmatpush.msra.mxu2 %v960_v24  ;;  %v854_v35 = vld [vmem:[#allocation8 + $0x10] sm:$0xff]  ;;  %v895_v36 = vld [vmem:[%s3188_s25] sm:$0xff]  ;;  %v956_v37 = vld [vmem:[#allocation11 + $0x48] sm:$0xff]  ;;  %s3575_s15 = smov %s3574_s23 }
  0x9e   : > { %924 = vmatpush.msra.mxu1 %v907_v10  ;;  %v853_v38 = vld [vmem:[#allocation8 + $0x8] sm:$0xff]  ;;  %v955_v39 = vld [vmem:[#allocation11 + $0x40] sm:$0xff]  ;;  %v954_v42 = vld [vmem:[#allocation11 + $0x38] sm:$0xff] }
  0x9f   : > { %878 = vmatpush.msra.mxu0 %v861_v15  ;;  %970 = vmatpush.msra.mxu2 %v959_v27  ;;  %v852_v40 = vld [vmem:[#allocation8] sm:$0xff]  ;;  %v953_v43 = vld [vmem:[#allocation11 + $0x30] sm:$0xff]  ;;  %v952_v45 = vld [vmem:[#allocation11 + $0x28] sm:$0xff] }
  0xa0   : > { %925 = vmatpush.msra.mxu1 %v906_v12  ;;  %v3214_v41 = vld [vmem:[%s849_s26] sm:$0xff]  ;;  %v3218_v47 = vld [vmem:[%s849_s26 + $0x8] sm:$0xff]  ;;  %v950_v48 = vld [vmem:[#allocation11 + $0x18] sm:$0xff] }
  0xa1   : > { %879 = vmatpush.msra.mxu0 %v860_v17  ;;  %971 = vmatpush.msra.mxu2 %v958_v30  ;;  %v896_v44 = vld [vmem:[%s3188_s25 + $0x8] sm:$0xff]  ;;  %v949_v49 = vld [vmem:[#allocation11 + $0x10] sm:$0xff]  ;;  %v946_v55 = vld [vmem:[%s3194_s16 + $0x10] sm:$0xff] }
  0xa2   : > { %926 = vmatpush.msra.mxu1 %v905_v14  ;;  %v951_v46 = vld [vmem:[#allocation11 + $0x20] sm:$0xff]  ;;  %v897_v50 = vld [vmem:[%s3188_s25 + $0x10] sm:$0xff]  ;;  %v945_v54 = vld [vmem:[%s3194_s16 + $0x8] sm:$0xff]  ;;  %s844_s25 = scalar_lea.vmem [#allocation17], %s2240_s3 }
  0xa3   : > { %880 = vmatpush.msra.mxu0 %v859_v19  ;;  %972 = vmatpush.msra.mxu2 %v957_v33  ;;  %v948_v51 = vld [vmem:[#allocation11 + $0x8] sm:$0xff]  ;;  %v947_v52 = vld [vmem:[#allocation11] sm:$0xff]  ;;  %s2037_s26 = sshll.u32 %s844_s25, 4  ;;  %s2038_s26 = int_to_ptr.vmem [resolvable:$true] %s2037_s26 }
  0xa4   : > { %927 = vmatpush.msra.mxu1 %v904_v16  ;;  %v944_v53 = vld [vmem:[%s3194_s16] sm:$0xff]  ;;  %v2433_v58 = vld [vmem:[%s3489_s7] ss:$0 sm:$0xff]  ;;  %s2285_s16 = sshll.u32 %s2999_s27, 4  ;;  %s2025_s27 = scalar_lea.sflag [#allocation4], %s3174_s14 }
  0xa5   : > { %881 = vmatpush.msra.mxu0 %v858_v23  ;;  %973 = vmatpush.msra.mxu2 %v956_v37  ;;  %v2434_v59 = vld [vmem:[%s3487_s5] ss:$0 sm:$0xff]  ;;  %s2036_s3 = scalar_lea.hbm %s3574_s23, %s2285_s16 }
  0xa6   : > { %928 = vmatpush.msra.mxu1 %v903_v18  ;;  %v2435_v8 = vld [vmem:[%s3491_s9] ss:$0 sm:$0xff] }
  0xa7   : > { %882 = vmatpush.msra.mxu0 %v857_v26  ;;  %974 = vmatpush.msra.mxu2 %v955_v39  ;;  %v3270_v18 = vld [vmem:[%s3180_s19] sm:$0xff] }
  0xa8   : > { %929 = vmatpush.msra.mxu1 %v902_v22  ;;  %vm995_vm1 = vcmp.eq.s32.totalorder %v3270_v18, 0  ;;  %v3277_v22 = vld [vmem:[%s3180_s19 + $0x8] sm:$0xff]  ;;  %s3573_s19 = sld [smem:[#allocation40_spill]] }
  0xa9   : > { %883 = vmatpush.msra.mxu0 %v856_v29  ;;  %975 = vmatpush.msra.mxu2 %v954_v42  ;;  %vm996_vm3 = vcmp.eq.s32.totalorder %v3277_v22, 0 }
  0xaa   : > { %930 = vmatpush.msra.mxu1 %v901_v25 }
  0xab   : > { %884 = vmatpush.msra.mxu0 %v855_v32  ;;  %976 = vmatpush.msra.mxu2 %v953_v43 }
  0xac   : > { %931 = vmatpush.msra.mxu1 %v900_v28 }
  0xad   : > { %885 = vmatpush.msra.mxu0 %v854_v35  ;;  %977 = vmatpush.msra.mxu2 %v952_v45 }
  0xae   : > { %932 = vmatpush.msra.mxu1 %v899_v31 }
  0xaf   : > { %886 = vmatpush.msra.mxu0 %v853_v38  ;;  %978 = vmatpush.msra.mxu2 %v951_v46 }
  0xb0   : > { %933 = vmatpush.msra.mxu1 %v898_v34 }
  0xb1   : > { %934 = vmatmul.f32.vlgmr.msra.gmra.mxu1 %v895_v36  ;;  %887 = vmatpush.msra.mxu0 %v852_v40 }
  0xb2   : > { %888 = vmatmul.f32.vlgmr.msra.gmra.mxu0 %v3214_v41  ;;  %979 = vmatpush.msra.mxu2 %v950_v48 }
  0xb4   : > { %980 = vmatpush.msra.mxu2 %v949_v49 }
  0xb6   : > { %981 = vmatpush.msra.mxu2 %v948_v51 }
  0xb8   : > { %982 = vmatpush.msra.mxu2 %v947_v52 }
  0xb9   : > { %937 = vmatmul.f32.gmra.mxu1 %v896_v44  ;;  %983 = vmatmul.f32.vlgmr.msra.gmra.mxu2 %v944_v53 }
  0xba   : > { %891 = vmatmul.f32.gmra.mxu0 %v3218_v47 }
  0xc1   : > { %940 = vmatmul.f32.gmra.mxu1 %v897_v50  ;;  %986 = vmatmul.f32.gmra.mxu2 %v945_v54 }
  0xc9   : > { %989 = vmatmul.f32.gmra.mxu2 %v946_v55 }
 0x12e   : > { %v935_v56 = vpop.f32.mrf.mxu1 }
 0x12f   : > { %v889_v61 = vpop.f32.mrf.mxu0  ;;  %v936_v2 = vadd.f32 %v2433_v58, %v935_v56 }
 0x130   : > { %v890_v63 = vadd.f32 %v2434_v59, %v889_v61 }
 0x132   : > { %v3234_v1 = vmul.f32 0.17677669, %v890_v63 }
 0x136   : > { %v938_v57 = vpop.f32.mrf.mxu1 }
 0x137   : > { %v939_v0 = vadd.f32 %v2433_v58, %v938_v57  ;;  %v892_v3 = vpop.f32.mrf.mxu0 }
 0x138   : > { %v893_v4 = vadd.f32 %v2434_v59, %v892_v3 }
 0x13a   : > { %v998_v5 = vmul.f32 0.17677669, %v893_v4 }
 0x13c   : > { %v984_v6 = vpop.f32.mrf.mxu2 }
 0x13d   : > { %v3256_v12 = vadd.f32 %v2435_v8, %v984_v6 }
 0x13e   : > { %v941_v60 = vpop.f32.mrf.mxu1 }
 0x13f   : > { %v942_v62 = vadd.f32 %v2433_v58, %v941_v60 }
 0x141   : > { %1220 = vrot.lane.b32.xlu1 %v942_v62, %s2864_s6  ;;  %1106 = vrot.lane.b32.xlu2 %v942_v62, %s2865_s2 }
 0x142   : > { %2250 = vmatpush.xpose.msk.msra.mxu3 %vm999_vm0, %v942_v62 }
 0x144   : > { %v987_v7 = vpop.f32.mrf.mxu2 }
 0x145   : > { %v3252_v10 = vadd.f32 %v2435_v8, %v987_v7 }
 0x146   : > { %2251 = vmatpush.xpose.msk.msra.mxu3 %vm999_vm0, %v939_v0 }
 0x149   : > { %1104 = vrot.lane.b32.xlu2 %v939_v0, %s2865_s2  ;;  %1212 = vrot.lane.b32.xlu1 %v3234_v1, %s2864_s6 }
 0x14a   : > { %2252 = vmatpush.xpose.msk.msra.mxu3 %vm999_vm0, %v936_v2 }
 0x14c   : > { %v990_v9 = vpop.f32.mrf.mxu2 }
 0x14d   : > { %2253 = vmatmul.msk.f32.vlgmr.msra.gmra.mxu3 %vm999_vm0, %v3234_v1  ;;  %v3254_v11 = vadd.f32 %v2435_v8, %v990_v9 }
 0x14f   : > { %1088 = vmatpush.msrb.mxu3 %v3254_v11 }
 0x151   : > { %1098 = vrot.lane.b32.xlu2 %v3234_v1, %s2865_s2  ;;  %1089 = vmatpush.msrb.mxu3 %v3252_v10 }
 0x153   : > { %1090 = vmatpush.msrb.mxu3 %v3256_v12 }
 0x155   : > { %2254 = vmatmul.msk.f32.gmra.mxu3 %vm999_vm0, %v998_v5 }
 0x159   : > { %1218 = vrot.lane.b32.xlu2 %v939_v0, %s2864_s6 }
 0x161   : > { %1331 = vrot.lane.b32.xlu2 %v942_v62, %s2866_s17 }
 0x169   : > { %1100 = vrot.lane.b32.xlu2 %v998_v5, %s2865_s2 }
 0x171   : > { %1327 = vrot.lane.b32.xlu2 %v936_v2, %s2866_s17 }
 0x179   : > { %1325 = vrot.lane.b32.xlu2 %v998_v5, %s2866_s17 }
 0x19b   : > { %v1107_v13 = vpop.permute.xlu2 %1106 }
 0x19c   : > { %2257 = vmatpush.xpose.msk.msra.mxu3 %vm999_vm0, %v1107_v13 }
 0x1a3   : > { %v1105_v14 = vpop.permute.xlu2 %1104 }
 0x1a4   : > { %2258 = vmatpush.xpose.msk.msra.mxu3 %vm999_vm0, %v1105_v14 }
 0x1ab   : > { %v3265_v15 = vpop.permute.xlu2 %1098 }
 0x1b3   : > { %v1221_v16 = vpop.permute.xlu1 %1220  ;;  %v1219_v17 = vpop.permute.xlu2 %1218 }
 0x1b4   : > { %2264 = vmatpush.xpose.msk.msrb.mxu2 %vm999_vm0, %v1221_v16 }
 0x1b8   : > { %2265 = vmatpush.xpose.msk.msrb.mxu2 %vm999_vm0, %v1219_v17 }
 0x1bb   : > { %v1213_v38 = vpop.permute.xlu1 %1212  ;;  %v1332_v43 = vpop.permute.xlu2 %1331 }
 0x1c3   : > { %v1101_v50 = vpop.permute.xlu2 %1100 }
 0x1cb   : > { %v1328_v57 = vpop.permute.xlu2 %1327 }
 0x1d0   : > { %v1032_v19 = vpop.f32.mrf.mxu3 }
 0x1d1   : > { %v1038_v20 = vsel %vm995_vm1, -32767.0, %v1032_v19 }
 0x1d2   : > { %v1041_v21 = vsel %vm1040_vm2, %v1038_v20, -inf }
 0x1d3   : > { %1042 = vmax.xlane.f32.xlu0 %v1041_v21  ;;  %v1326_v62 = vpop.permute.xlu2 %1325 }
 0x1d8   : > { %v1035_v23 = vpop.f32.mrf.mxu3 }
 0x1d9   : > { %v1039_v24 = vsel %vm996_vm3, -32767.0, %v1035_v23 }
 0x1da   : > { %v1044_v25 = vsel %vm1040_vm2, %v1039_v24, -inf }
 0x1db   : > { %1045 = vmax.xlane.f32.xlu0 %v1044_v25 }
 0x1ef   : > { %1102 = vrot.lane.b32.xlu0 %v936_v2, %s2865_s2 }
 0x1f7   : > { %1216 = vrot.lane.b32.xlu0 %v936_v2, %s2864_s6 }
 0x1ff   : > { %1329 = vrot.lane.b32.xlu0 %v939_v0, %s2866_s17 }
 0x207   : > { %1214 = vrot.lane.b32.xlu0 %v998_v5, %s2864_s6 }
 0x246   : > { %v1043_v26 = vpop.xlane.xlu0 %1042 }
 0x247   : > { %v1047_v27 = vsub.f32 %v1038_v20, %v1043_v26 }
 0x249   : > { %v1049_v28 = vmul.f32 1.442695, %v1047_v27 }
 0x24b   : > { %2442 = vpow2.f32 %v1049_v28 }
 0x24e   : > { %v1046_v29 = vpop.xlane.xlu0 %1045 }
 0x24f   : > { %v1048_v30 = vsub.f32 %v1039_v24, %v1046_v29 }
 0x251   : > { %v2443_v31 = vpop.eup %2442  ;;  %v1051_v32 = vmul.f32 1.442695, %v1048_v30 }
 0x252   : > { %v1053_v33 = vsel %vm1040_vm2, %v2443_v31, 0.0 }
 0x253   : > { %2444 = vpow2.f32 %v1051_v32  ;;  %1054 = vadd.xlane.f32.xlu1 %v1053_v33 }
 0x259   : > { %v2445_v34 = vpop.eup %2444 }
 0x25a   : > { %v1056_v35 = vsel %vm1040_vm2, %v2445_v34, 0.0 }
 0x25b   : > { %1057 = vadd.xlane.f32.xlu1 %v1056_v35 }
 0x261   : > { %v1103_v36 = vpop.permute.xlu0 %1102 }
 0x262   : > { %2259 = vmatpush.xpose.msk.msra.mxu3 %vm999_vm0, %v1103_v36 }
 0x269   : > { %v1217_v37 = vpop.permute.xlu0 %1216 }
 0x26a   : > { %2266 = vmatpush.xpose.msk.msrb.mxu2 %vm999_vm0, %v1217_v37 }
 0x26d   : > { %2267 = vmatmul.msk.f32.vlgmr.msrb.gmra.mxu2 %vm999_vm0, %v1213_v38 }
 0x271   : > { %v1330_v39 = vpop.permute.xlu0 %1329 }
 0x274   : > { %1323 = vrot.lane.b32.xlu1 %v3234_v1, %s2866_s17 }
 0x279   : > { %v1215_v40 = vpop.permute.xlu0 %1214 }
 0x27a   : > { %2268 = vmatmul.msk.f32.gmra.mxu2 %vm999_vm0, %v1215_v40 }
 0x2c6   : > { %v1055_v42 = vpop.xlane.xlu1 %1054 }
 0x2c7   : > { %2446 = vrcp.f32 %v1055_v42 }
 0x2cd   : > { %v2447_v44 = vpop.eup %2446 }
 0x2ce   : > { %v1061_v45 = vmul.f32 %v2447_v44, %v1055_v42  ;;  %v1058_v46 = vpop.xlane.xlu1 %1057 }
 0x2cf   : > { %2448 = vrcp.f32 %v1058_v46 }
 0x2d0   : > { %v1063_v48 = vsub.f32 2.0, %v1061_v45  ;;  %v2418_v45 = vpack.i.bf16 %v3252_v10, %v3254_v11 }
 0x2d2   : > { %v1065_v49 = vmul.f32 %v2447_v44, %v1063_v48 }
 0x2d4   : > { %v1067_v51 = vmul.f32 %v2443_v31, %v1065_v49 }
 0x2d5   : > { %v2449_v52 = vpop.eup %2448 }
 0x2d6   : > { %v1062_v53 = vmul.f32 %v2449_v52, %v1058_v46  ;;  %2255 = vmatmul.msk.f32.vlgmr.msrb.gmra.mxu3 %vm1040_vm2, %v1067_v51 }
 0x2d7   : > { %2271 = vmatpush.xpose.msk.msrb.mxu3 %vm999_vm0, %v1332_v43 }
 0x2d8   : > { %v1064_v54 = vsub.f32 2.0, %v1062_v53 }
 0x2da   : > { %v1066_v55 = vmul.f32 %v2449_v52, %v1064_v54 }
 0x2db   : > { %2272 = vmatpush.xpose.msk.msrb.mxu3 %vm999_vm0, %v1330_v39 }
 0x2dc   : > { %v1068_v56 = vmul.f32 %v2445_v34, %v1066_v55 }
 0x2de   : > { %2256 = vmatmul.msk.f32.gmra.mxu3 %vm1040_vm2, %v1068_v56 }
 0x2df   : > { %2273 = vmatpush.xpose.msk.msrb.mxu3 %vm999_vm0, %v1328_v57 }
 0x2e6   : > { %2260 = vmatmul.msk.f32.vlgmr.msra.gmra.mxu3 %vm999_vm0, %v3265_v15  ;;  %v1324_v61 = vpop.permute.xlu1 %1323 }
 0x2ee   : > { %2261 = vmatmul.msk.f32.gmra.mxu3 %vm999_vm0, %v1101_v50 }
 0x2f0   : > { %v1249_v58 = vpop.f32.mrf.mxu2 }
 0x2f1   : > { %v1255_v59 = vsel %vm995_vm1, -32767.0, %v1249_v58 }
 0x2f2   : > { %v1257_v60 = vsel %vm1040_vm2, %v1255_v59, -inf }
 0x2f3   : > { %1258 = vmax.xlane.f32.xlu2 %v1257_v60 }
 0x2f6   : > { %2274 = vmatmul.msk.f32.vlgmr.msrb.gmra.mxu3 %vm999_vm0, %v1324_v61 }
 0x2fd   : > { %v1252_v63 = vpop.f32.mrf.mxu2 }
 0x2fe   : > { %v1256_v0 = vsel %vm996_vm3, -32767.0, %v1252_v63  ;;  %2275 = vmatmul.msk.f32.gmra.mxu3 %vm999_vm0, %v1326_v62 }
 0x2ff   : > { %v1260_v1 = vsel %vm1040_vm2, %v1256_v0, -inf }
 0x300   : > { %1261 = vmax.xlane.f32.xlu0 %v1260_v1 }
 0x359   : > { %v3311_v2 = vpop.f32.mrf.mxu3 }
 0x361   : > { %v3313_v3 = vpop.f32.mrf.mxu3 }
 0x366   : > { %v1259_v4 = vpop.xlane.xlu2 %1258 }
 0x367   : > { %v1263_v5 = vsub.f32 %v1255_v59, %v1259_v4 }
 0x369   : > { %v1265_v6 = vmul.f32 1.442695, %v1263_v5  ;;  %v1135_v7 = vpop.f32.mrf.mxu3 }
 0x36a   : > { %v1141_v8 = vsel %vm995_vm1, -32767.0, %v1135_v7 }
 0x36b   : > { %2450 = vpow2.f32 %v1265_v6  ;;  %v1143_v9 = vsel %vm1040_vm2, %v1141_v8, -inf }
 0x36c   : > { %1144 = vmax.xlane.f32.xlu1 %v1143_v9 }
 0x371   : > { %v3318_v13 = vpop.eup %2450  ;;  %v1138_v14 = vpop.f32.mrf.mxu3 }
 0x372   : > { %v1142_v15 = vsel %vm996_vm3, -32767.0, %v1138_v14  ;;  %v1269_v16 = vsel %vm1040_vm2, %v3318_v13, 0.0 }
 0x373   : > { %1270 = vadd.xlane.f32.xlu2 %v1269_v16  ;;  %v1146_v17 = vsel %vm1040_vm2, %v1142_v15, -inf  ;;  %v1262_v19 = vpop.xlane.xlu0 %1261 }
 0x374   : > { %1147 = vmax.xlane.f32.xlu0 %v1146_v17  ;;  %v1264_v21 = vsub.f32 %v1256_v0, %v1262_v19 }
 0x376   : > { %v1267_v25 = vmul.f32 1.442695, %v1264_v21 }
 0x378   : > { %2452 = vpow2.f32 %v1267_v25 }
 0x379   : > { %v1360_v20 = vpop.f32.mrf.mxu3 }
 0x37a   : > { %v1366_v23 = vsel %vm995_vm1, -32767.0, %v1360_v20 }
 0x37b   : > { %v1368_v24 = vsel %vm1040_vm2, %v1366_v23, -inf }
 0x37c   : > { %1369 = vmax.xlane.f32.xlu1 %v1368_v24 }
 0x37e   : > { %v3331_v29 = vpop.eup %2452 }
 0x37f   : > { %v1272_v18 = vsel %vm1040_vm2, %v3331_v29, 0.0 }
 0x381   : > { %v1363_v26 = vpop.f32.mrf.mxu3 }
 0x382   : > { %v1367_v27 = vsel %vm996_vm3, -32767.0, %v1363_v26 }
 0x383   : > { %v1371_v28 = vsel %vm1040_vm2, %v1367_v27, -inf }
 0x384   : > { %1372 = vmax.xlane.f32.xlu2 %v1371_v28 }
 0x388   : > { %1174 = vrot.lane.b32.xlu0 %v3256_v12, %s2865_s2 }
 0x38c   : > { %1273 = vadd.xlane.f32.xlu2 %v1272_v18 }
 0x3df   : > { %v1145_v30 = vpop.xlane.xlu1 %1144 }
 0x3e0   : > { %v1149_v31 = vsub.f32 %v1141_v8, %v1145_v30 }
 0x3e2   : > { %v1151_v32 = vmul.f32 1.442695, %v1149_v31 }
 0x3e4   : > { %2454 = vpow2.f32 %v1151_v32 }
 0x3e6   : > { %v1271_v46 = vpop.xlane.xlu2 %1270 }
 0x3e7   : > { %v1148_v33 = vpop.xlane.xlu0 %1147 }
 0x3e8   : > { %v1150_v34 = vsub.f32 %v1142_v15, %v1148_v33 }
 0x3ea   : > { %v3337_v22 = vpop.eup %2454  ;;  %v1153_v35 = vmul.f32 1.442695, %v1150_v34 }
 0x3eb   : > { %v1155_v36 = vsel %vm1040_vm2, %v3337_v22, 0.0 }
 0x3ec   : > { %2456 = vpow2.f32 %v1153_v35  ;;  %1156 = vadd.xlane.f32.xlu1 %v1155_v36 }
 0x3ef   : > { %v1370_v37 = vpop.xlane.xlu1 %1369 }
 0x3f0   : > { %v1374_v38 = vsub.f32 %v1366_v23, %v1370_v37 }
 0x3f2   : > { %v3341_v39 = vpop.eup %2456  ;;  %v1376_v40 = vmul.f32 1.442695, %v1374_v38 }
 0x3f3   : > { %v1158_v42 = vsel %vm1040_vm2, %v3341_v39, 0.0 }
 0x3f4   : > { %2458 = vpow2.f32 %v1376_v40  ;;  %1159 = vadd.xlane.f32.xlu0 %v1158_v42 }
 0x3f7   : > { %v1373_v48 = vpop.xlane.xlu2 %1372 }
 0x3f8   : > { %v1375_v49 = vsub.f32 %v1367_v27, %v1373_v48  ;;  %v1479_v48 = vld [vmem:[#allocation13 + $0x68] sm:$0xff] }
 0x3fa   : > { %v3345_v43 = vpop.eup %2458  ;;  %v1378_v50 = vmul.f32 1.442695, %v1375_v49  ;;  %v1175_v11 = vpop.permute.xlu0 %1174  ;;  %v1478_v49 = vld [vmem:[#allocation13 + $0x60] sm:$0xff] }
 0x3fb   : > { %v1380_v44 = vsel %vm1040_vm2, %v3345_v43, 0.0 }
 0x3fc   : > { %1381 = vadd.xlane.f32.xlu2 %v1380_v44  ;;  %2460 = vpow2.f32 %v1378_v50  ;;  %v1477_v50 = vld [vmem:[#allocation13 + $0x58] sm:$0xff] }
 0x3fd   : > { %2462 = vrcp.f32 %v1271_v46 }
 0x3ff   : > { %v1274_v53 = vpop.xlane.xlu2 %1273 }
 0x402   : > { %v3358_v51 = vpop.eup %2460 }
 0x403   : > { %v1383_v10 = vsel %vm1040_vm2, %v3358_v51, 0.0  ;;  %v2463_v54 = vpop.eup %2462 }
 0x404   : > { %v1277_v57 = vmul.f32 %v2463_v54, %v1271_v46  ;;  %v1480_v46 = vld [vmem:[#allocation13 + $0x70] sm:$0xff] }
 0x405   : > { %2419 = vrot.lane.b32.xlu1 %v2418_v45, %s2865_s2 }
 0x406   : > { %v1279_v60 = vsub.f32 2.0, %v1277_v57  ;;  %v1467_v57 = vld [vmem:[#allocation13 + $0x8] sm:$0xff] }
 0x408   : > { %1285 = vrot.lane.b32.xlu0 %v3256_v12, %s2864_s6  ;;  %v1281_v5 = vmul.f32 %v2463_v54, %v1279_v60  ;;  %v1471_v54 = vld [vmem:[#allocation13 + $0x28] sm:$0xff] }
 0x40a   : > { %v1283_v16 = vmul.f32 %v3318_v13, %v1281_v5 }
 0x410   : > { %2429 = vrot.lane.b32.xlu0 %v2418_v45, %s2866_s17 }
 0x414   : > { %2424 = vrot.lane.b32.xlu2 %v2418_v45, %s2864_s6  ;;  %v1481_v45 = vld [vmem:[#allocation13 + $0x78] sm:$0xff] }
 0x415   : > { %1486 = vmatpush.msrb.mxu1 %v1481_v45  ;;  %v1622_v45 = vld [vmem:[#allocation14 + $0x190] sm:$0xff] }
 0x417   : > { %1487 = vmatpush.msrb.mxu1 %v1480_v46  ;;  %v1623_v46 = vld [vmem:[#allocation14 + $0x198] sm:$0xff] }
 0x418   : > { %1396 = vrot.lane.b32.xlu0 %v3256_v12, %s2866_s17 }
 0x419   : > { %1488 = vmatpush.msrb.mxu1 %v1479_v48  ;;  %v1616_v48 = vld [vmem:[#allocation14 + $0x160] sm:$0xff] }
 0x41b   : > { %1489 = vmatpush.msrb.mxu1 %v1478_v49  ;;  %v1617_v49 = vld [vmem:[#allocation14 + $0x168] sm:$0xff] }
 0x41d   : > { %1490 = vmatpush.msrb.mxu1 %v1477_v50  ;;  %v1618_v50 = vld [vmem:[#allocation14 + $0x170] sm:$0xff] }
 0x42f   : > { %1384 = vadd.xlane.f32.xlu1 %v1383_v10  ;;  %v1475_v10 = vld [vmem:[#allocation13 + $0x48] sm:$0xff] }
 0x45f   : > { %v1157_v52 = vpop.xlane.xlu1 %1156 }
 0x460   : > { %2464 = vrcp.f32 %v1157_v52 }
 0x461   : > { %2466 = vrcp.f32 %v1274_v53 }
 0x466   : > { %v2465_v56 = vpop.eup %2464 }
 0x467   : > { %v1160_v55 = vpop.xlane.xlu0 %1159  ;;  %v1163_v58 = vmul.f32 %v2465_v56, %v1157_v52  ;;  %v2467_v59 = vpop.eup %2466  ;;  %v1473_v52 = vld [vmem:[#allocation13 + $0x38] sm:$0xff] }
 0x468   : > { %2468 = vrcp.f32 %v1160_v55  ;;  %v1278_v6 = vmul.f32 %v2467_v59, %v1274_v53  ;;  %v1472_v53 = vld [vmem:[#allocation13 + $0x30] sm:$0xff] }
 0x469   : > { %v1165_v61 = vsub.f32 2.0, %v1163_v58  ;;  %v1466_v58 = vld [vmem:[#allocation13] sm:$0xff] }
 0x46a   : > { %v1280_v17 = vsub.f32 2.0, %v1278_v6 }
 0x46b   : > { %v1167_v7 = vmul.f32 %v2465_v56, %v1165_v61  ;;  %v1469_v56 = vld [vmem:[#allocation13 + $0x18] sm:$0xff] }
 0x46c   : > { %v1282_v23 = vmul.f32 %v2467_v59, %v1280_v17 }
 0x46d   : > { %v1169_v19 = vmul.f32 %v3337_v22, %v1167_v7 }
 0x46e   : > { %v2469_v62 = vpop.eup %2468  ;;  %v1284_v18 = vmul.f32 %v3331_v29, %v1282_v23 }
 0x46f   : > { %v1382_v12 = vpop.xlane.xlu2 %1381  ;;  %v1164_v8 = vmul.f32 %v2469_v62, %v1160_v55  ;;  %v1470_v55 = vld [vmem:[#allocation13 + $0x20] sm:$0xff] }
 0x470   : > { %2470 = vrcp.f32 %v1382_v12 }
 0x471   : > { %v1166_v20 = vsub.f32 2.0, %v1164_v8 }
 0x473   : > { %v1168_v24 = vmul.f32 %v2469_v62, %v1166_v20 }
 0x475   : > { %v1170_v13 = vmul.f32 %v3341_v39, %v1168_v24 }
 0x476   : > { %v2471_v21 = vpop.eup %2470 }
 0x477   : > { %v2420_v63 = vpop.permute.xlu1 %2419  ;;  %v2425_v0 = vpop.permute.xlu2 %2424  ;;  %v1388_v25 = vmul.f32 %v2471_v21, %v1382_v12  ;;  %v1468_v12 = vld [vmem:[#allocation13 + $0x10] sm:$0xff] }
 0x478   : > { %v2426_v1 = vunpack.i.l.bf16 %v2425_v0  ;;  %v2421_v4 = vunpack.i.l.bf16 %v2420_v63  ;;  %v2427_v9 = vunpack.i.h.bf16 %v2425_v0  ;;  %v2422_v15 = vunpack.i.h.bf16 %v2420_v63 }
 0x479   : > { %v1390_v28 = vsub.f32 2.0, %v1388_v25 }
 0x47a   : > { %1202 = vmatpush.msrb.mxu0 %v2421_v4  ;;  %1313 = vmatpush.msra.mxu2 %v2426_v1  ;;  %v1286_v14 = vpop.permute.xlu0 %1285 }
 0x47b   : > { %v1392_v31 = vmul.f32 %v2471_v21, %v1390_v28 }
 0x47c   : > { %1203 = vmatpush.msrb.mxu0 %v2422_v15  ;;  %1314 = vmatpush.msra.mxu2 %v2427_v9  ;;  %v2436_v9 = vld [vmem:[%s3493_s11] ss:$0 sm:$0xff] }
 0x47d   : > { %v1394_v33 = vmul.f32 %v3345_v43, %v1392_v31  ;;  %v1635_v31 = vld [vmem:[#allocation14 + $0x1f8] sm:$0xff] }
 0x47e   : > { %1204 = vmatpush.msrb.mxu0 %v1175_v11  ;;  %1315 = vmatpush.msra.mxu2 %v1286_v14  ;;  %v1474_v11 = vld [vmem:[#allocation13 + $0x40] sm:$0xff] }
 0x47f   : > { %2262 = vmatmul.msk.f32.vlgmr.msrb.gmra.mxu0 %vm1040_vm2, %v1169_v19  ;;  %2269 = vmatmul.msk.f32.vlgmr.msra.gmra.mxu2 %vm1040_vm2, %v1283_v16 }
 0x482   : > { %v2430_v26 = vpop.permute.xlu0 %2429 }
 0x483   : > { %v2431_v27 = vunpack.i.l.bf16 %v2430_v26  ;;  %v2432_v30 = vunpack.i.h.bf16 %v2430_v26 }
 0x485   : > { %1424 = vmatpush.msra.mxu0 %v2431_v27 }
 0x487   : > { %2263 = vmatmul.msk.f32.gmra.mxu0 %vm1040_vm2, %v1170_v13  ;;  %2270 = vmatmul.msk.f32.gmra.mxu2 %vm1040_vm2, %v1284_v18  ;;  %v1633_v18 = vld [vmem:[#allocation14 + $0x1e8] sm:$0xff] }
 0x488   : > { %1425 = vmatpush.msra.mxu0 %v2432_v30  ;;  %v1634_v30 = vld [vmem:[#allocation14 + $0x1f0] sm:$0xff]  ;;  %1669 = vmatpush.msra.mxu3 %v1633_v18  ;;  %v1579_v18 = vld [vmem:[#allocation14 + $0x38] sm:$0xff] }
 0x48a   : > { %v1397_v32 = vpop.permute.xlu0 %1396 }
 0x48b   : > { %1426 = vmatpush.msra.mxu0 %v1397_v32  ;;  %v1628_v32 = vld [vmem:[#allocation14 + $0x1c0] sm:$0xff] }
 0x48d   : > { %1692 = vmatpush.msrb.mxu0 %v1634_v30  ;;  %v1572_v30 = vld [vmem:[#allocation14] sm:$0xff] }
 0x48f   : > { %2276 = vmatmul.msk.f32.vlgmr.msra.gmra.mxu0 %vm1040_vm2, %v1394_v33  ;;  %v1629_v33 = vld [vmem:[#allocation14 + $0x1c8] sm:$0xff] }
 0x490   : > { %1670 = vmatpush.msra.mxu3 %v1629_v33  ;;  %v1575_v33 = vld [vmem:[#allocation14 + $0x18] sm:$0xff] }
 0x4a2   : > { %v1385_v34 = vpop.xlane.xlu1 %1384 }
 0x4a3   : > { %2472 = vrcp.f32 %v1385_v34 }
 0x4a9   : > { %v2473_v22 = vpop.eup %2472 }
 0x4aa   : > { %v1389_v35 = vmul.f32 %v2473_v22, %v1385_v34  ;;  %v1630_v34 = vld [vmem:[#allocation14 + $0x1d0] sm:$0xff] }
 0x4ab   : > { %1693 = vmatpush.msrb.mxu0 %v1630_v34 }
 0x4ac   : > { %v1391_v36 = vsub.f32 2.0, %v1389_v35 }
 0x4ae   : > { %v1393_v37 = vmul.f32 %v2473_v22, %v1391_v36  ;;  %v1631_v22 = vld [vmem:[#allocation14 + $0x1d8] sm:$0xff] }
 0x4b0   : > { %v1395_v29 = vmul.f32 %v3358_v51, %v1393_v37  ;;  %v1476_v51 = vld [vmem:[#allocation13 + $0x50] sm:$0xff] }
 0x4b1   : > { %1491 = vmatpush.msrb.mxu1 %v1476_v51  ;;  %v1619_v51 = vld [vmem:[#allocation14 + $0x178] sm:$0xff] }
 0x4b2   : > { %2277 = vmatmul.msk.f32.gmra.mxu0 %vm1040_vm2, %v1395_v29 }
 0x4b3   : > { %1492 = vmatpush.msrb.mxu1 %v1475_v10  ;;  %v1612_v10 = vld [vmem:[#allocation14 + $0x140] sm:$0xff] }
 0x4b5   : > { %1493 = vmatpush.msrb.mxu1 %v1474_v11  ;;  %v1613_v11 = vld [vmem:[#allocation14 + $0x148] sm:$0xff] }
 0x4b7   : > { %1494 = vmatpush.msrb.mxu1 %v1473_v52  ;;  %v1614_v52 = vld [vmem:[#allocation14 + $0x150] sm:$0xff] }
 0x4b9   : > { %1495 = vmatpush.msrb.mxu1 %v1472_v53  ;;  %v1615_v53 = vld [vmem:[#allocation14 + $0x158] sm:$0xff] }
 0x4bb   : > { %1496 = vmatpush.msrb.mxu1 %v1471_v54  ;;  %v1608_v54 = vld [vmem:[#allocation14 + $0x120] sm:$0xff] }
 0x4bd   : > { %1497 = vmatpush.msrb.mxu1 %v1470_v55  ;;  %v1609_v55 = vld [vmem:[#allocation14 + $0x128] sm:$0xff] }
 0x4bf   : > { %1498 = vmatpush.msrb.mxu1 %v1469_v56  ;;  %v1610_v56 = vld [vmem:[#allocation14 + $0x130] sm:$0xff] }
 0x4c1   : > { %1499 = vmatpush.msrb.mxu1 %v1468_v12  ;;  %v1611_v12 = vld [vmem:[#allocation14 + $0x138] sm:$0xff] }
 0x4c3   : > { %1500 = vmatpush.msrb.mxu1 %v1467_v57  ;;  %v1604_v57 = vld [vmem:[#allocation14 + $0x100] sm:$0xff] }
 0x4c5   : > { %1501 = vmatpush.msrb.mxu1 %v1466_v58  ;;  %v1605_v58 = vld [vmem:[#allocation14 + $0x108] sm:$0xff] }
 0x4c7   : > { %1715 = vmatpush.msra.mxu1 %v1635_v31  ;;  %v1573_v31 = vld [vmem:[#allocation14 + $0x8] sm:$0xff] }
 0x4c9   : > { %1716 = vmatpush.msra.mxu1 %v1631_v22 }
 0x4fc   : > { %v1206_v38 = vpop.f32.mrf.mxu0 }
 0x4fd   : > { %1436 = vrot.lane.b32.xlu2 %v1206_v38, %s2866_s17  ;;  %v1624_v38 = vld [vmem:[#allocation14 + $0x1a0] sm:$0xff] }
 0x502   : > { %v1317_v39 = vpop.f32.mrf.mxu2 }
 0x503   : > { %1444 = vrot.lane.b32.xlu0 %v1317_v39, %s2864_s6  ;;  %v1625_v39 = vld [vmem:[#allocation14 + $0x1a8] sm:$0xff] }
 0x504   : > { %v1209_v40 = vpop.f32.mrf.mxu0  ;;  %1671 = vmatpush.msra.mxu3 %v1625_v39 }
 0x50a   : > { %v1320_v43 = vpop.f32.mrf.mxu2 }
 0x50b   : > { %1438 = vrot.lane.b32.xlu0 %v1209_v40, %s2866_s17  ;;  %v1626_v40 = vld [vmem:[#allocation14 + $0x1b0] sm:$0xff]  ;;  %s3572_s17 = sld [smem:[#allocation39_spill]] }
 0x50c   : > { %v1428_v42 = vpop.f32.mrf.mxu0  ;;  %1694 = vmatpush.msrb.mxu0 %v1626_v40 }
 0x50d   : > { %1452 = vrot.lane.b32.xlu2 %v1428_v42, %s2865_s2  ;;  %v1627_v42 = vld [vmem:[#allocation14 + $0x1b8] sm:$0xff] }
 0x50e   : > { %1717 = vmatpush.msra.mxu1 %v1627_v42  ;;  %1695 = vmatpush.msrb.mxu0 %v1622_v45 }
 0x510   : > { %1718 = vmatpush.msra.mxu1 %v1623_v46  ;;  %1696 = vmatpush.msrb.mxu0 %v1618_v50  ;;  %v2438_v46 = vld [vmem:[%s3569_s1] ss:$0 sm:$0xff]  ;;  %v1857_v50 = vld [vmem:[#allocation16 + $0x178] sm:$0xff] }
 0x512   : > { %1719 = vmatpush.msra.mxu1 %v1619_v51  ;;  %1697 = vmatpush.msrb.mxu0 %v1614_v52  ;;  %v1873_v51 = vld [vmem:[#allocation16 + $0x1f8] sm:$0xff] }
 0x514   : > { %1720 = vmatpush.msra.mxu1 %v1615_v53  ;;  %1698 = vmatpush.msrb.mxu0 %v1610_v56  ;;  %v1871_v53 = vld [vmem:[#allocation16 + $0x1e8] sm:$0xff] }
 0x515   : > { %1446 = vrot.lane.b32.xlu2 %v1320_v43, %s2864_s6  ;;  %v1620_v43 = vld [vmem:[#allocation14 + $0x180] sm:$0xff] }
 0x516   : > { %1721 = vmatpush.msra.mxu1 %v1611_v12  ;;  %v1854_v12 = vld [vmem:[#allocation16 + $0x160] sm:$0xff] }
 0x52f   : > { %v1431_v44 = vpop.f32.mrf.mxu0 }
 0x530   : > { %1454 = vrot.lane.b32.xlu0 %v1431_v44, %s2865_s2  ;;  %v1621_v44 = vld [vmem:[#allocation14 + $0x188] sm:$0xff]  ;;  %s2790_s2 = scalar_lea.hbm %s3575_s15, 32 }
 0x531   : > { %1672 = vmatpush.msra.mxu3 %v1621_v44 }
 0x533   : > { %1673 = vmatpush.msra.mxu3 %v1617_v49 }
 0x535   : > { %1674 = vmatpush.msra.mxu3 %v1613_v11  ;;  %v1855_v11 = vld [vmem:[#allocation16 + $0x168] sm:$0xff] }
 0x537   : > { %1675 = vmatpush.msra.mxu3 %v1609_v55  ;;  %v1841_v55 = vld [vmem:[#allocation16 + $0xf8] sm:$0xff] }
 0x539   : > { %1676 = vmatpush.msra.mxu3 %v1605_v58 }
 0x557   : > { %v1437_v59 = vpop.permute.xlu2 %1436 }
 0x558   : > { %v1458_v60 = vsel %vm999_vm0, %v3311_v2, %v1437_v59  ;;  %v1606_v59 = vld [vmem:[#allocation14 + $0x110] sm:$0xff] }
 0x559   : > { %1699 = vmatpush.msrb.mxu0 %v1606_v59 }
 0x567   : > { %v1453_v62 = vpop.permute.xlu2 %1452 }
 0x56f   : > { %v1447_v5 = vpop.permute.xlu2 %1446 }
 0x575   : > { %v1445_v61 = vpop.permute.xlu0 %1444 }
 0x576   : > { %v1461_v63 = vsel %vm1460_vm4, %v1458_v60, %v1445_v61  ;;  %v1607_v60 = vld [vmem:[#allocation14 + $0x118] sm:$0xff]  ;;  %v1600_v61 = vld [vmem:[#allocation14 + $0xe0] sm:$0xff] }
 0x577   : > { %v1464_v0 = vsel %vm1463_vm5, %v1461_v63, %v1453_v62  ;;  %1722 = vmatpush.msra.mxu1 %v1607_v60  ;;  %v1601_v62 = vld [vmem:[#allocation14 + $0xe8] sm:$0xff]  ;;  %v1602_v63 = vld [vmem:[#allocation14 + $0xf0] sm:$0xff] }
 0x578   : > { %1502 = vmatmul.f32.vlgmr.msrb.gmra.mxu1 %v1464_v0  ;;  %1677 = vmatpush.msra.mxu3 %v1601_v62  ;;  %v1603_v0 = vld [vmem:[#allocation14 + $0xf8] sm:$0xff] }
 0x579   : > { %1700 = vmatpush.msrb.mxu0 %v1602_v63  ;;  %1723 = vmatpush.msra.mxu1 %v1603_v0 }
 0x57d   : > { %v1439_v1 = vpop.permute.xlu0 %1438 }
 0x57e   : > { %v1459_v4 = vsel %vm999_vm0, %v3313_v3, %v1439_v1  ;;  %v2867_v3 = vmov 128.0   ;;  %v1596_v1 = vld [vmem:[#allocation14 + $0xc0] sm:$0xff] }
 0x57f   : > { %v1462_v7 = vsel %vm1460_vm4, %v1459_v4, %v1447_v5  ;;  %2474 = vrcp.f32 %v2867_v3  ;;  %v1597_v4 = vld [vmem:[#allocation14 + $0xc8] sm:$0xff]  ;;  %v1598_v5 = vld [vmem:[#allocation14 + $0xd0] sm:$0xff] }
 0x580   : > { %1678 = vmatpush.msra.mxu3 %v1597_v4  ;;  %1701 = vmatpush.msrb.mxu0 %v1598_v5  ;;  %v1585_v3 = vld [vmem:[#allocation14 + $0x68] sm:$0xff] }
 0x585   : > { %v2475_v20 = vpop.eup %2474 }
 0x586   : > { %v1520_v21 = vmul.f32 128.0, %v2475_v20  ;;  %vm1524_vm6 = vweird.f32 %v2475_v20 }
 0x588   : > { %v1521_v23 = vsub.f32 1.0, %v1520_v21  ;;  %v1587_v21 = vld [vmem:[#allocation14 + $0x78] sm:$0xff] }
 0x58a   : > { %v1522_v24 = vmul.f32 %v2475_v20, %v1521_v23  ;;  %v1580_v23 = vld [vmem:[#allocation14 + $0x40] sm:$0xff] }
 0x58c   : > { %v1523_v25 = vadd.f32 %v2475_v20, %v1522_v24  ;;  %v1581_v24 = vld [vmem:[#allocation14 + $0x48] sm:$0xff] }
 0x58e   : > { %v3389_v26 = vsel %vm1524_vm6, %v2475_v20, %v1523_v25  ;;  %v1586_v20 = vld [vmem:[#allocation14 + $0x70] sm:$0xff] }
 0x58f   : > { %v1582_v25 = vld [vmem:[#allocation14 + $0x50] sm:$0xff] }
 0x5a2   : > { %v1455_v6 = vpop.permute.xlu0 %1454 }
 0x5a3   : > { %v1465_v8 = vsel %vm1463_vm5, %v1462_v7, %v1455_v6  ;;  %v1599_v6 = vld [vmem:[#allocation14 + $0xd8] sm:$0xff]  ;;  %v1592_v7 = vld [vmem:[#allocation14 + $0xa0] sm:$0xff] }
 0x5a4   : > { %1505 = vmatmul.f32.gmra.mxu1 %v1465_v8  ;;  %v1593_v8 = vld [vmem:[#allocation14 + $0xa8] sm:$0xff] }
 0x5a5   : > { %1724 = vmatpush.msra.mxu1 %v1599_v6  ;;  %1679 = vmatpush.msra.mxu3 %v1593_v8  ;;  %v1840_v8 = vld [vmem:[#allocation16 + $0xf0] sm:$0xff] }
 0x5f5   : > { %v1503_v14 = vpop.f32.mrf.mxu1 }
 0x5f6   : > { %v1504_v2 = vadd.f32 %v2436_v9, %v1503_v14  ;;  %v1595_v14 = vld [vmem:[#allocation14 + $0xb8] sm:$0xff] }
 0x5f7   : > { %1725 = vmatpush.msra.mxu1 %v1595_v14  ;;  %v1869_v14 = vld [vmem:[#allocation16 + $0x1d8] sm:$0xff] }
 0x5f8   : > { %v1513_v15 = vadd.f32 %v1504_v2, %v3214_v41  ;;  %v1588_v2 = vld [vmem:[#allocation14 + $0x80] sm:$0xff] }
 0x5fa   : > { %1515 = vadd.xlane.f32.xlu1 %v1513_v15 }
 0x621   : > { %v1506_v16 = vpop.f32.mrf.mxu1 }
 0x622   : > { %v1507_v17 = vadd.f32 %v2436_v9, %v1506_v16  ;;  %v1594_v9 = vld [vmem:[#allocation14 + $0xb0] sm:$0xff] }
 0x623   : > { %1702 = vmatpush.msrb.mxu0 %v1594_v9  ;;  %v1590_v16 = vld [vmem:[#allocation14 + $0x90] sm:$0xff]  ;;  %v1853_v9 = vld [vmem:[#allocation16 + $0x158] sm:$0xff] }
 0x624   : > { %v1514_v19 = vadd.f32 %v1507_v17, %v3218_v47  ;;  %v1632_v47 = vld [vmem:[#allocation14 + $0x1e0] sm:$0xff]  ;;  %v1591_v17 = vld [vmem:[#allocation14 + $0x98] sm:$0xff] }
 0x625   : > { %1646 = vmatpush.msrb.mxu2 %v1632_v47  ;;  %1703 = vmatpush.msrb.mxu0 %v1590_v16  ;;  %v1578_v47 = vld [vmem:[#allocation14 + $0x30] sm:$0xff] }
 0x626   : > { %1517 = vadd.xlane.f32.xlu2 %v1514_v19  ;;  %1726 = vmatpush.msra.mxu1 %v1591_v17  ;;  %v1868_v16 = vld [vmem:[#allocation16 + $0x1d0] sm:$0xff]  ;;  %v1822_v17 = vld [vmem:[#allocation16 + $0x60] sm:$0xff] }
 0x627   : > { %1647 = vmatpush.msrb.mxu2 %v1628_v32  ;;  %1704 = vmatpush.msrb.mxu0 %v1586_v20  ;;  %v1574_v32 = vld [vmem:[#allocation14 + $0x10] sm:$0xff]  ;;  %v1867_v20 = vld [vmem:[#allocation16 + $0x1c8] sm:$0xff] }
 0x628   : > { %1727 = vmatpush.msra.mxu1 %v1587_v21  ;;  %v1821_v21 = vld [vmem:[#allocation16 + $0x58] sm:$0xff] }
 0x629   : > { %1648 = vmatpush.msrb.mxu2 %v1624_v38  ;;  %1705 = vmatpush.msrb.mxu0 %v1582_v25  ;;  %v1866_v25 = vld [vmem:[#allocation16 + $0x1c0] sm:$0xff] }
 0x62b   : > { %1649 = vmatpush.msrb.mxu2 %v1620_v43  ;;  %1706 = vmatpush.msrb.mxu0 %v1578_v47  ;;  %v2437_v43 = vld [vmem:[%s3494_s12] ss:$0 sm:$0xff]  ;;  %v1865_v47 = vld [vmem:[#allocation16 + $0x1b8] sm:$0xff] }
 0x62d   : > { %1650 = vmatpush.msrb.mxu2 %v1616_v48  ;;  %1707 = vmatpush.msrb.mxu0 %v1574_v32  ;;  %v1864_v32 = vld [vmem:[#allocation16 + $0x1b0] sm:$0xff] }
 0x62f   : > { %1651 = vmatpush.msrb.mxu2 %v1612_v10  ;;  %v1856_v10 = vld [vmem:[#allocation16 + $0x170] sm:$0xff]  ;;  %1924 = vmatpush.msra.mxu0 %v1857_v50 }
 0x630   : > { %v1860_v50 = vld [vmem:[#allocation16 + $0x190] sm:$0xff] }
 0x631   : > { %1652 = vmatpush.msrb.mxu2 %v1608_v54  ;;  %v1825_v54 = vld [vmem:[#allocation16 + $0x78] sm:$0xff]  ;;  %1925 = vmatpush.msra.mxu0 %v1856_v10  ;;  %v1830_v10 = vld [vmem:[#allocation16 + $0xa0] sm:$0xff] }
 0x633   : > { %1653 = vmatpush.msrb.mxu2 %v1604_v57  ;;  %v1870_v57 = vld [vmem:[#allocation16 + $0x1e0] sm:$0xff]  ;;  %1926 = vmatpush.msra.mxu0 %v1855_v11  ;;  %v1859_v11 = vld [vmem:[#allocation16 + $0x188] sm:$0xff] }
 0x635   : > { %1654 = vmatpush.msrb.mxu2 %v1600_v61  ;;  %1927 = vmatpush.msra.mxu0 %v1854_v12  ;;  %v1828_v12 = vld [vmem:[#allocation16 + $0x90] sm:$0xff] }
 0x637   : > { %1655 = vmatpush.msrb.mxu2 %v1596_v1  ;;  %1928 = vmatpush.msra.mxu0 %v1853_v9 }
 0x639   : > { %1656 = vmatpush.msrb.mxu2 %v1592_v7  ;;  %v1824_v7 = vld [vmem:[#allocation16 + $0x70] sm:$0xff] }
 0x63b   : > { %1657 = vmatpush.msrb.mxu2 %v1588_v2  ;;  %v1839_v2 = vld [vmem:[#allocation16 + $0xe8] sm:$0xff] }
 0x66d   : > { %v1516_v27 = vpop.xlane.xlu1 %1515 }
 0x66e   : > { %v1526_v28 = vmul.f32 %v3389_v26, %v1516_v27  ;;  %v1583_v27 = vld [vmem:[#allocation14 + $0x58] sm:$0xff] }
 0x66f   : > { %1728 = vmatpush.msra.mxu1 %v1583_v27  ;;  %v1820_v27 = vld [vmem:[#allocation16 + $0x50] sm:$0xff] }
 0x670   : > { %v3392_v41 = vsub.f32 %v1513_v15, %v1526_v28  ;;  %v1589_v15 = vld [vmem:[#allocation14 + $0x88] sm:$0xff]  ;;  %v1576_v28 = vld [vmem:[#allocation14 + $0x20] sm:$0xff] }
 0x671   : > { %1680 = vmatpush.msra.mxu3 %v1589_v15  ;;  %1729 = vmatpush.msra.mxu1 %v1579_v18  ;;  %v1852_v15 = vld [vmem:[#allocation16 + $0x150] sm:$0xff]  ;;  %v1819_v18 = vld [vmem:[#allocation16 + $0x48] sm:$0xff] }
 0x672   : > { %v1530_v13 = vmul.f32 %v3392_v41, %v3392_v41  ;;  %1929 = vmatpush.msra.mxu0 %v1852_v15 }
 0x673   : > { %1681 = vmatpush.msra.mxu3 %v1585_v3  ;;  %1730 = vmatpush.msra.mxu1 %v1575_v33  ;;  %v1851_v3 = vld [vmem:[#allocation16 + $0x148] sm:$0xff]  ;;  %v1818_v33 = vld [vmem:[#allocation16 + $0x40] sm:$0xff] }
 0x674   : > { %1532 = vadd.xlane.f32.xlu0 %v1530_v13  ;;  %v1577_v13 = vld [vmem:[#allocation14 + $0x28] sm:$0xff]  ;;  %1930 = vmatpush.msra.mxu0 %v1851_v3 }
 0x675   : > { %1682 = vmatpush.msra.mxu3 %v1581_v24  ;;  %1947 = vmatpush.msrb.mxu1 %v1873_v51  ;;  %v1850_v24 = vld [vmem:[#allocation16 + $0x140] sm:$0xff] }
 0x676   : > { %1931 = vmatpush.msra.mxu0 %v1850_v24  ;;  %v1814_v51 = vld [vmem:[#allocation16 + $0x20] sm:$0xff] }
 0x677   : > { %1683 = vmatpush.msra.mxu3 %v1577_v13  ;;  %v1849_v13 = vld [vmem:[#allocation16 + $0x138] sm:$0xff] }
 0x678   : > { %1932 = vmatpush.msra.mxu0 %v1849_v13 }
 0x679   : > { %1684 = vmatpush.msra.mxu3 %v1573_v31  ;;  %v1848_v31 = vld [vmem:[#allocation16 + $0x130] sm:$0xff] }
 0x67a   : > { %1933 = vmatpush.msra.mxu0 %v1848_v31 }
 0x67b   : > { %1901 = vmatpush.msrb.mxu3 %v1841_v55  ;;  %v1858_v55 = vld [vmem:[#allocation16 + $0x180] sm:$0xff] }
 0x67d   : > { %1902 = vmatpush.msrb.mxu3 %v1840_v8 }
 0x67f   : > { %1903 = vmatpush.msrb.mxu3 %v1839_v2 }
 0x699   : > { %v1518_v35 = vpop.xlane.xlu2 %1517 }
 0x69a   : > { %v1527_v36 = vmul.f32 %v3389_v26, %v1518_v35 }
 0x69c   : > { %v3397_v37 = vsub.f32 %v1514_v19, %v1527_v36  ;;  %v1584_v19 = vld [vmem:[#allocation14 + $0x60] sm:$0xff] }
 0x69d   : > { %1658 = vmatpush.msrb.mxu2 %v1584_v19  ;;  %v1838_v19 = vld [vmem:[#allocation16 + $0xe0] sm:$0xff] }
 0x69e   : > { %v1531_v29 = vmul.f32 %v3397_v37, %v3397_v37  ;;  %1904 = vmatpush.msrb.mxu3 %v1838_v19 }
 0x69f   : > { %1659 = vmatpush.msrb.mxu2 %v1580_v23  ;;  %v1837_v23 = vld [vmem:[#allocation16 + $0xd8] sm:$0xff] }
 0x6a0   : > { %1534 = vadd.xlane.f32.xlu1 %v1531_v29  ;;  %1905 = vmatpush.msrb.mxu3 %v1837_v23 }
 0x6a1   : > { %1660 = vmatpush.msrb.mxu2 %v1576_v28  ;;  %v1836_v28 = vld [vmem:[#allocation16 + $0xd0] sm:$0xff] }
 0x6a2   : > { %1906 = vmatpush.msrb.mxu3 %v1836_v28 }
 0x6a3   : > { %1661 = vmatpush.msrb.mxu2 %v1572_v30  ;;  %v1835_v30 = vld [vmem:[#allocation16 + $0xc8] sm:$0xff] }
 0x6a4   : > { %1907 = vmatpush.msrb.mxu3 %v1835_v30 }
 0x6a5   : > { %1878 = vmatpush.msra.mxu2 %v1825_v54  ;;  %v1842_v54 = vld [vmem:[#allocation16 + $0x100] sm:$0xff] }
 0x6a7   : > { %1879 = vmatpush.msra.mxu2 %v1824_v7 }
 0x6e7   : > { %v1533_v34 = vpop.xlane.xlu0 %1532 }
 0x6e8   : > { %v1536_v22 = vmul.f32 %v1533_v34, %v3389_v26  ;;  %v1834_v34 = vld [vmem:[#allocation16 + $0xc0] sm:$0xff] }
 0x6e9   : > { %1908 = vmatpush.msrb.mxu3 %v1834_v34 }
 0x6ea   : > { %v1538_v35 = vadd.f32 1e-05, %v1536_v22  ;;  %v1847_v22 = vld [vmem:[#allocation16 + $0x128] sm:$0xff] }
 0x6eb   : > { %1934 = vmatpush.msra.mxu0 %v1847_v22 }
 0x6ec   : > { %2476 = vrsqrt.f32 %v1538_v35  ;;  %vm1546_vm8 = vweird.f32 %v1538_v35 }
 0x6f2   : > { %v2477_v36 = vpop.eup %2476 }
 0x6f3   : > { %v1541_v29 = vmul.f32 %v2477_v36, %v1538_v35  ;;  %vm1547_vm7 = vweird.f32 %v2477_v36  ;;  %v1863_v35 = vld [vmem:[#allocation16 + $0x1a8] sm:$0xff] }
 0x6f4   : > { %vm1548_vm9 = vmor %vm1546_vm8, %vm1547_vm7 }
 0x6f5   : > { %v1542_v38 = vmul.f32 %v2477_v36, %v1541_v29  ;;  %v1833_v29 = vld [vmem:[#allocation16 + $0xb8] sm:$0xff] }
 0x6f6   : > { %1909 = vmatpush.msrb.mxu3 %v1833_v29 }
 0x6f7   : > { %v1543_v39 = vmul.f32 0.5, %v1542_v38  ;;  %v1846_v38 = vld [vmem:[#allocation16 + $0x120] sm:$0xff] }
 0x6f8   : > { %1935 = vmatpush.msra.mxu0 %v1846_v38 }
 0x6f9   : > { %v1544_v40 = vsub.f32 1.5, %v1543_v39  ;;  %v1862_v39 = vld [vmem:[#allocation16 + $0x1a0] sm:$0xff] }
 0x6fb   : > { %v1545_v42 = vmul.f32 %v2477_v36, %v1544_v40  ;;  %v1816_v40 = vld [vmem:[#allocation16 + $0x30] sm:$0xff] }
 0x6fd   : > { %v1549_v44 = vsel %vm1548_vm9, %v2477_v36, %v1545_v42  ;;  %v1817_v36 = vld [vmem:[#allocation16 + $0x38] sm:$0xff]  ;;  %v1832_v42 = vld [vmem:[#allocation16 + $0xb0] sm:$0xff] }
 0x6fe   : > { %v1560_v45 = vmul.f32 %v1549_v44, %v3392_v41  ;;  %v1872_v41 = vld [vmem:[#allocation16 + $0x1f0] sm:$0xff]  ;;  %v1861_v44 = vld [vmem:[#allocation16 + $0x198] sm:$0xff]  ;;  %1910 = vmatpush.msrb.mxu3 %v1832_v42 }
 0x6ff   : > { %1948 = vmatpush.msrb.mxu1 %v1872_v41  ;;  %v1843_v41 = vld [vmem:[#allocation16 + $0x108] sm:$0xff] }
 0x700   : > { %v1565_v48 = vmul.f32 %v2437_v43, %v1560_v45  ;;  %v1815_v45 = vld [vmem:[#allocation16 + $0x28] sm:$0xff] }
 0x701   : > { %1949 = vmatpush.msrb.mxu1 %v1871_v53  ;;  %v1829_v53 = vld [vmem:[#allocation16 + $0x98] sm:$0xff] }
 0x702   : > { %v3409_v49 = vadd.f32 %v2438_v46, %v1565_v48  ;;  %v1844_v48 = vld [vmem:[#allocation16 + $0x110] sm:$0xff] }
 0x703   : > { %1950 = vmatpush.msrb.mxu1 %v1870_v57  ;;  %v1811_v57 = vld [vmem:[#allocation16 + $0x8] sm:$0xff] }
 0x704   : > { %1662 = vmatmul.f32.vlgmr.msrb.gmra.mxu2 %v3409_v49  ;;  %1685 = vmatmul.f32.vlgmr.msra.gmra.mxu3 %v3409_v49 }
 0x705   : > { %1708 = vmatmul.f32.vlgmr.msrb.gmra.mxu0 %v3409_v49  ;;  %1731 = vmatmul.f32.vlgmr.msra.gmra.mxu1 %v3409_v49 }
 0x706   : > { %1951 = vmatpush.msrb.mxu1 %v1869_v14 }
 0x708   : > { %1952 = vmatpush.msrb.mxu1 %v1868_v16 }
 0x70a   : > { %1953 = vmatpush.msrb.mxu1 %v1867_v20 }
 0x70c   : > { %1954 = vmatpush.msrb.mxu1 %v1866_v25 }
 0x70e   : > { %1955 = vmatpush.msrb.mxu1 %v1865_v47 }
 0x710   : > { %1956 = vmatpush.msrb.mxu1 %v1864_v32 }
 0x712   : > { %1957 = vmatpush.msrb.mxu1 %v1863_v35 }
 0x713   : > { %v1535_v52 = vpop.xlane.xlu1 %1534 }
 0x714   : > { %v1537_v56 = vmul.f32 %v1535_v52, %v3389_v26  ;;  %1958 = vmatpush.msrb.mxu1 %v1862_v39  ;;  %v1813_v52 = vld [vmem:[#allocation16 + $0x18] sm:$0xff] }
 0x716   : > { %v1539_v58 = vadd.f32 1e-05, %v1537_v56  ;;  %1959 = vmatpush.msrb.mxu1 %v1861_v44  ;;  %v1812_v56 = vld [vmem:[#allocation16 + $0x10] sm:$0xff] }
 0x718   : > { %2478 = vrsqrt.f32 %v1539_v58  ;;  %vm1556_vm11 = vweird.f32 %v1539_v58  ;;  %1960 = vmatpush.msrb.mxu1 %v1860_v50 }
 0x71a   : > { %1961 = vmatpush.msrb.mxu1 %v1859_v11 }
 0x71c   : > { %1962 = vmatpush.msrb.mxu1 %v1858_v55 }
 0x71e   : > { %v2479_v59 = vpop.eup %2478 }
 0x71f   : > { %v1551_v60 = vmul.f32 %v2479_v59, %v1539_v58  ;;  %vm1557_vm10 = vweird.f32 %v2479_v59  ;;  %v3426_v58 = vld [vmem:[%s3570_s10] sm:$0xf]  ;;  %s2039_s10 = sshll.u32 %s2036_s3, 4  ;;  %s2040_s10 = int_to_ptr.hbm [resolvable:$true] %s2039_s10 }
 0x720   : > { %vm1558_vm12 = vmor %vm1556_vm11, %vm1557_vm10  ;;  %v1638_v7 = vperm.slane %v3426_v58, 0  ;;  %v1639_v8 = vperm.slane %v3426_v58, 1  ;;  %s2784_s18 = sshra.s32 %s2040_s10, 4  ;;  %s2785_s18 = int_to_ptr.hbm [resolvable:$true] %s2784_s18 }
 0x721   : > { %v1552_v61 = vmul.f32 %v2479_v59, %v1551_v60  ;;  %v1810_v60 = vld [vmem:[#allocation16] sm:$0xff]  ;;  %s2786_s0 = scalar_lea.hbm %s2785_s18, 16  ;;  %p2791_p11 = scmp.lt.s32.totalorder %s2785_s18, %s3575_s15 }
 0x722   : > { %p2787_p7 = scmp.ne.s32.totalorder %s2785_s18, %s2786_s0  ;;  %p2792_p12 = scmp.lt.s32.totalorder %s2790_s2, %s2786_s0 }
 0x723   : > { %v1553_v62 = vmul.f32 0.5, %v1552_v61  ;;  %v1826_v61 = vld [vmem:[#allocation16 + $0x80] sm:$0xff] }
 0x724   : > { %p2788_p10 = pnand %p2787_p7, %p3057_p0  ;;  %p2793_p3 = por %p2792_p12, %p2791_p11 }
 0x725   : > { %v1554_v63 = vsub.f32 1.5, %v1553_v62  ;;  %v1640_v62 = vperm.slane %v3426_v58, 2 }
 0x726   : > { %p2789_p6 = pneg %p2788_p10 }
 0x727   : > { %v1555_v0 = vmul.f32 %v2479_v59, %v1554_v63  ;;  %v1641_v63 = vperm.slane %v3426_v58, 3 }
 0x728   : > { %p2794_p8 = pnand %p2793_p3, %p2789_p6 }
 0x729   : > { %v1559_v1 = vsel %vm1558_vm12, %v2479_v59, %v1555_v0  ;;  %v1827_v59 = vld [vmem:[#allocation16 + $0x88] sm:$0xff] }
 0x72a   : > { %v1561_v4 = vmul.f32 %v1559_v1, %v3397_v37  ;;  %v1823_v37 = vld [vmem:[#allocation16 + $0x68] sm:$0xff] }
 0x72b   : > { %1880 = vmatpush.msra.mxu2 %v1823_v37 }
 0x72c   : > { %v1566_v5 = vmul.f32 %v2437_v43, %v1561_v4  ;;  %v1845_v43 = vld [vmem:[#allocation16 + $0x118] sm:$0xff] }
 0x72d   : > { %1881 = vmatpush.msra.mxu2 %v1822_v17  ;;  %1936 = vmatpush.msra.mxu0 %v1845_v43 }
 0x72e   : > { %v3417_v6 = vadd.f32 %v2438_v46, %v1566_v5  ;;  %v1831_v46 = vld [vmem:[#allocation16 + $0xa8] sm:$0xff] }
 0x72f   : > { %1882 = vmatpush.msra.mxu2 %v1821_v21  ;;  %1911 = vmatpush.msrb.mxu3 %v1831_v46 }
 0x730   : > { %1665 = vmatmul.f32.gmra.mxu2 %v3417_v6  ;;  %1688 = vmatmul.f32.gmra.mxu3 %v3417_v6 }
 0x731   : > { %1711 = vmatmul.f32.gmra.mxu0 %v3417_v6  ;;  %1734 = vmatmul.f32.gmra.mxu1 %v3417_v6 }
 0x732   : > { %1883 = vmatpush.msra.mxu2 %v1820_v27  ;;  %1937 = vmatpush.msra.mxu0 %v1844_v48 }
 0x733   : > { %1912 = vmatpush.msrb.mxu3 %v1830_v10 }
 0x734   : > { %1884 = vmatpush.msra.mxu2 %v1819_v18  ;;  %1938 = vmatpush.msra.mxu0 %v1843_v41 }
 0x735   : > { %1913 = vmatpush.msrb.mxu3 %v1829_v53 }
 0x736   : > { %1885 = vmatpush.msra.mxu2 %v1818_v33  ;;  %1939 = vmatpush.msra.mxu0 %v1842_v54 }
 0x737   : > { %1914 = vmatpush.msrb.mxu3 %v1828_v12 }
 0x738   : > { %1886 = vmatpush.msra.mxu2 %v1817_v36 }
 0x739   : > { %1915 = vmatpush.msrb.mxu3 %v1827_v59 }
 0x73a   : > { %1887 = vmatpush.msra.mxu2 %v1816_v40 }
 0x73b   : > { %1916 = vmatpush.msrb.mxu3 %v1826_v61 }
 0x73c   : > { %1888 = vmatpush.msra.mxu2 %v1815_v45 }
 0x73e   : > { %1889 = vmatpush.msra.mxu2 %v1814_v51 }
 0x740   : > { %1890 = vmatpush.msra.mxu2 %v1813_v52 }
 0x742   : > { %1891 = vmatpush.msra.mxu2 %v1812_v56 }
 0x744   : > { %1892 = vmatpush.msra.mxu2 %v1811_v57 }
 0x746   : > { %1893 = vmatpush.msra.mxu2 %v1810_v60 }
 0x782   : > { %v1709_v0 = vpop.f32.mrf.mxu0  ;;  %v1732_v1 = vpop.f32.mrf.mxu1 }
 0x783   : > { %v1710_v4 = vadd.f32 %v1709_v0, %v1640_v62  ;;  %v1733_v5 = vadd.f32 %v1732_v1, %v1641_v63 }
 0x785   : > { %v1748_v9 = vmul.f32 0.044715, %v1710_v4  ;;  %v1749_v14 = vmul.f32 0.044715, %v1733_v5  ;;  %v1740_v36 = vmul.f32 0.5, %v1710_v4  ;;  %v1741_v38 = vmul.f32 0.5, %v1733_v5 }
 0x787   : > { %v1756_v37 = vmul.f32 %v1748_v9, %v1710_v4  ;;  %v1757_v2 = vmul.f32 %v1749_v14, %v1733_v5  ;;  %v1663_v15 = vpop.f32.mrf.mxu2  ;;  %v1686_v16 = vpop.f32.mrf.mxu3 }
 0x788   : > { %v1664_v17 = vadd.f32 %v1663_v15, %v1638_v7  ;;  %v1687_v19 = vadd.f32 %v1686_v16, %v1639_v8 }
 0x789   : > { %v1764_v3 = vmul.f32 %v1756_v37, %v1710_v4  ;;  %v1765_v20 = vmul.f32 %v1757_v2, %v1733_v5 }
 0x78a   : > { %v1746_v21 = vmul.f32 0.044715, %v1664_v17  ;;  %v1747_v23 = vmul.f32 0.044715, %v1687_v19  ;;  %v1738_v45 = vmul.f32 0.5, %v1664_v17  ;;  %v1739_v48 = vmul.f32 0.5, %v1687_v19 }
 0x78b   : > { %v1772_v24 = vadd.f32 %v1764_v3, %v1710_v4  ;;  %v1773_v25 = vadd.f32 %v1765_v20, %v1733_v5 }
 0x78c   : > { %v1754_v27 = vmul.f32 %v1746_v21, %v1664_v17  ;;  %v1755_v28 = vmul.f32 %v1747_v23, %v1687_v19 }
 0x78d   : > { %v1780_v13 = vmul.f32 0.7978846, %v1772_v24  ;;  %v1781_v47 = vmul.f32 0.7978846, %v1773_v25 }
 0x78e   : > { %v1762_v18 = vmul.f32 %v1754_v27, %v1664_v17  ;;  %v1763_v30 = vmul.f32 %v1755_v28, %v1687_v19 }
 0x78f   : > { %2480 = vtanh.f32 %v1780_v13 }
 0x790   : > { %2482 = vtanh.f32 %v1781_v47  ;;  %v1770_v31 = vadd.f32 %v1762_v18, %v1664_v17  ;;  %v1771_v32 = vadd.f32 %v1763_v30, %v1687_v19 }
 0x792   : > { %v1778_v33 = vmul.f32 0.7978846, %v1770_v31  ;;  %v1779_v34 = vmul.f32 0.7978846, %v1771_v32 }
 0x794   : > { %2484 = vtanh.f32 %v1778_v33 }
 0x795   : > { %v2481_v22 = vpop.eup %2480  ;;  %2486 = vtanh.f32 %v1779_v34  ;;  %v2439_v34 = vld [vmem:[%s3571_s13] ss:$0 sm:$0xff] }
 0x796   : > { %v2483_v35 = vpop.eup %2482  ;;  %v1796_v29 = vadd.f32 1.0, %v2481_v22 }
 0x797   : > { %v1797_v39 = vadd.f32 1.0, %v2483_v35 }
 0x798   : > { %v1804_v40 = vmul.f32 %v1796_v29, %v1740_v36 }
 0x799   : > { %v1805_v42 = vmul.f32 %v1797_v39, %v1741_v38 }
 0x79a   : > { %v2485_v43 = vpop.eup %2484  ;;  %1940 = vmatmul.f32.vlgmr.msra.gmra.mxu0 %v1804_v40 }
 0x79b   : > { %v2487_v44 = vpop.eup %2486  ;;  %1963 = vmatmul.f32.vlgmr.msrb.gmra.mxu1 %v1805_v42  ;;  %v1794_v46 = vadd.f32 1.0, %v2485_v43 }
 0x79c   : > { %v1795_v50 = vadd.f32 1.0, %v2487_v44 }
 0x79d   : > { %v1802_v51 = vmul.f32 %v1794_v46, %v1738_v45 }
 0x79e   : > { %v1803_v10 = vmul.f32 %v1795_v50, %v1739_v48 }
 0x79f   : > { %1894 = vmatmul.f32.vlgmr.msra.gmra.mxu2 %v1802_v51 }
 0x7a0   : > { %1917 = vmatmul.f32.vlgmr.msrb.gmra.mxu3 %v1803_v10 }
 0x7ae   : > { %v1712_v41 = vpop.f32.mrf.mxu0  ;;  %v1735_v11 = vpop.f32.mrf.mxu1 }
 0x7af   : > { %v1713_v52 = vadd.f32 %v1712_v41, %v1640_v62  ;;  %v1736_v53 = vadd.f32 %v1735_v11, %v1641_v63 }
 0x7b1   : > { %v1752_v54 = vmul.f32 0.044715, %v1713_v52  ;;  %v1753_v55 = vmul.f32 0.044715, %v1736_v53  ;;  %v1744_v20 = vmul.f32 0.5, %v1713_v52  ;;  %v1745_v23 = vmul.f32 0.5, %v1736_v53 }
 0x7b3   : > { %v1666_v56 = vpop.f32.mrf.mxu2  ;;  %v1689_v12 = vpop.f32.mrf.mxu3  ;;  %v1760_v57 = vmul.f32 %v1752_v54, %v1713_v52  ;;  %v1761_v58 = vmul.f32 %v1753_v55, %v1736_v53 }
 0x7b4   : > { %v1667_v59 = vadd.f32 %v1666_v56, %v1638_v7  ;;  %v1690_v60 = vadd.f32 %v1689_v12, %v1639_v8 }
 0x7b5   : > { %v1768_v61 = vmul.f32 %v1760_v57, %v1713_v52  ;;  %v1769_v0 = vmul.f32 %v1761_v58, %v1736_v53 }
 0x7b6   : > { %v1750_v1 = vmul.f32 0.044715, %v1667_v59  ;;  %v1751_v4 = vmul.f32 0.044715, %v1690_v60  ;;  %v1742_v47 = vmul.f32 0.5, %v1667_v59  ;;  %v1743_v30 = vmul.f32 0.5, %v1690_v60 }
 0x7b7   : > { %v1776_v5 = vadd.f32 %v1768_v61, %v1713_v52  ;;  %v1777_v9 = vadd.f32 %v1769_v0, %v1736_v53 }
 0x7b8   : > { %v1758_v14 = vmul.f32 %v1750_v1, %v1667_v59  ;;  %v1759_v37 = vmul.f32 %v1751_v4, %v1690_v60 }
 0x7b9   : > { %v1784_v2 = vmul.f32 0.7978846, %v1776_v5  ;;  %v1785_v15 = vmul.f32 0.7978846, %v1777_v9  ;;  %v2440_v9 = vld [vmem:[%s3572_s17] ss:$0 sm:$0xff] }
 0x7ba   : > { %v1766_v62 = vmul.f32 %v1758_v14, %v1667_v59  ;;  %v1767_v63 = vmul.f32 %v1759_v37, %v1690_v60  ;;  %v2441_v37 = vld [vmem:[%s3573_s19] ss:$0 sm:$0xff] }
 0x7bb   : > { %2488 = vtanh.f32 %v1784_v2 }
 0x7bc   : > { %2490 = vtanh.f32 %v1785_v15  ;;  %v1774_v16 = vadd.f32 %v1766_v62, %v1667_v59  ;;  %v1775_v17 = vadd.f32 %v1767_v63, %v1690_v60 }
 0x7be   : > { %v1782_v19 = vmul.f32 0.7978846, %v1774_v16  ;;  %v1783_v3 = vmul.f32 0.7978846, %v1775_v17 }
 0x7c0   : > { %2492 = vtanh.f32 %v1782_v19 }
 0x7c1   : > { %v2489_v7 = vpop.eup %2488  ;;  %2494 = vtanh.f32 %v1783_v3 }
 0x7c2   : > { %v2491_v8 = vpop.eup %2490  ;;  %v1800_v21 = vadd.f32 1.0, %v2489_v7 }
 0x7c3   : > { %v1801_v24 = vadd.f32 1.0, %v2491_v8 }
 0x7c4   : > { %v1808_v25 = vmul.f32 %v1800_v21, %v1744_v20 }
 0x7c5   : > { %v1809_v27 = vmul.f32 %v1801_v24, %v1745_v23 }
 0x7c6   : > { %v2493_v28 = vpop.eup %2492  ;;  %1943 = vmatmul.f32.gmra.mxu0 %v1808_v25 }
 0x7c7   : > { %v2495_v13 = vpop.eup %2494  ;;  %1966 = vmatmul.f32.gmra.mxu1 %v1809_v27  ;;  %v1798_v18 = vadd.f32 1.0, %v2493_v28 }
 0x7c8   : > { %v1799_v31 = vadd.f32 1.0, %v2495_v13 }
 0x7c9   : > { %v1806_v32 = vmul.f32 %v1798_v18, %v1742_v47 }
 0x7ca   : > { %v1807_v33 = vmul.f32 %v1799_v31, %v1743_v30 }
 0x7cb   : > { %1897 = vmatmul.f32.gmra.mxu2 %v1806_v32 }
 0x7cc   : > { %1920 = vmatmul.f32.gmra.mxu3 %v1807_v33 }
 0x817   : > { %v1941_v38 = vpop.f32.mrf.mxu0 }
 0x818   : > { %v1964_v40 = vpop.f32.mrf.mxu1 }
 0x822   : > { %v1895_v22 = vpop.f32.mrf.mxu2 }
 0x823   : > { %v1896_v35 = vadd.f32 %v2439_v34, %v1895_v22  ;;  %v1918_v36 = vpop.f32.mrf.mxu3 }
 0x825   : > { %v1919_v29 = vadd.f32 %v1918_v36, %v1896_v35 }
 0x827   : > { %v1942_v39 = vadd.f32 %v1941_v38, %v1919_v29 }
 0x829   : > { %v1965_v42 = vadd.f32 %v1964_v40, %v1942_v39 }
 0x82b   : > { %v1970_v43 = vadd.f32 %v1965_v42, %v3409_v49 }
 0x82d   : > { %1972 = vadd.xlane.f32.xlu1 %v1970_v43 }
 0x843   : > { %v1944_v50 = vpop.f32.mrf.mxu0 }
 0x844   : > { %v1967_v10 = vpop.f32.mrf.mxu1 }
 0x84e   : > { %v1898_v44 = vpop.f32.mrf.mxu2 }
 0x84f   : > { %v1899_v45 = vadd.f32 %v2439_v34, %v1898_v44  ;;  %v1921_v46 = vpop.f32.mrf.mxu3 }
 0x851   : > { %v1922_v48 = vadd.f32 %v1921_v46, %v1899_v45 }
 0x853   : > { %v1945_v51 = vadd.f32 %v1944_v50, %v1922_v48 }
 0x855   : > { %v1968_v41 = vadd.f32 %v1967_v10, %v1945_v51 }
 0x857   : > { %v1971_v11 = vadd.f32 %v1968_v41, %v3417_v6 }
 0x859   : > { %1974 = vadd.xlane.f32.xlu1 %v1971_v11 }
 0x8a0   : > { %v1973_v52 = vpop.xlane.xlu1 %1972 }
 0x8a1   : > { %v1976_v53 = vmul.f32 %v1973_v52, %v3389_v26 }
 0x8a3   : > { %v1978_v54 = vsub.f32 %v1970_v43, %v1976_v53 }
 0x8a5   : > { %v1980_v55 = vmul.f32 %v1978_v54, %v1978_v54 }
 0x8a7   : > { %1982 = vadd.xlane.f32.xlu1 %v1980_v55 }
 0x8cc   : > { %v1975_v56 = vpop.xlane.xlu1 %1974 }
 0x8cd   : > { %v1977_v49 = vmul.f32 %v1975_v56, %v3389_v26 }
 0x8cf   : > { %v1979_v12 = vsub.f32 %v1971_v11, %v1977_v49 }
 0x8d1   : > { %v1981_v57 = vmul.f32 %v1979_v12, %v1979_v12 }
 0x8d3   : > { %1984 = vadd.xlane.f32.xlu1 %v1981_v57 }
 0x91a   : > { %v1983_v58 = vpop.xlane.xlu1 %1982 }
 0x91b   : > { %v1986_v59 = vmul.f32 %v1983_v58, %v3389_v26 }
 0x91d   : > { %v1988_v60 = vadd.f32 1e-05, %v1986_v59 }
 0x91f   : > { %2496 = vrsqrt.f32 %v1988_v60  ;;  %vm1996_vm14 = vweird.f32 %v1988_v60 }
 0x925   : > { %v2497_v6 = vpop.eup %2496 }
 0x926   : > { %v1991_v61 = vmul.f32 %v2497_v6, %v1988_v60  ;;  %vm1997_vm13 = vweird.f32 %v2497_v6 }
 0x927   : > { %vm1998_vm15 = vmor %vm1996_vm14, %vm1997_vm13 }
 0x928   : > { %v1992_v0 = vmul.f32 %v2497_v6, %v1991_v61 }
 0x92a   : > { %v1993_v1 = vmul.f32 0.5, %v1992_v0 }
 0x92c   : > { %v1994_v4 = vsub.f32 1.5, %v1993_v1 }
 0x92e   : > { %v1995_v5 = vmul.f32 %v2497_v6, %v1994_v4 }
 0x930   : > { %v1999_v14 = vsel %vm1998_vm15, %v2497_v6, %v1995_v5 }
 0x931   : > { %v2010_v2 = vmul.f32 %v1999_v14, %v1978_v54 }
 0x933   : > { %v2015_v15 = vmul.f32 %v2440_v9, %v2010_v2 }
 0x935   : > { %v2020_v62 = vadd.f32 %v2441_v37, %v2015_v15 }
 0x937   : > { %2022 = vst [vmem:[%s844_s25] sm:$0xff] %v2020_v62 }
 0x946   : > { %v1985_v63 = vpop.xlane.xlu1 %1984 }
 0x947   : > { %v1987_v16 = vmul.f32 %v1985_v63, %v3389_v26 }
 0x949   : > { %v1989_v17 = vadd.f32 1e-05, %v1987_v16 }
 0x94b   : > { %2498 = vrsqrt.f32 %v1989_v17  ;;  %vm2006_vm1 = vweird.f32 %v1989_v17 }
 0x951   : > { %v2499_v19 = vpop.eup %2498 }
 0x952   : > { %v2001_v3 = vmul.f32 %v2499_v19, %v1989_v17  ;;  %vm2007_vm0 = vweird.f32 %v2499_v19 }
 0x953   : > { %vm2008_vm2 = vmor %vm2006_vm1, %vm2007_vm0 }
 0x954   : > { %v2002_v7 = vmul.f32 %v2499_v19, %v2001_v3 }
 0x956   : > { %v2003_v8 = vmul.f32 0.5, %v2002_v7 }
 0x958   : > { %v2004_v20 = vsub.f32 1.5, %v2003_v8 }
 0x95a   : > { %v2005_v21 = vmul.f32 %v2499_v19, %v2004_v20 }
 0x95c   : > { %v2009_v23 = vsel %vm2008_vm2, %v2499_v19, %v2005_v21 }
 0x95d   : > { %v2011_v26 = vmul.f32 %v2009_v23, %v1979_v12 }
 0x95f   : > { %v2016_v24 = vmul.f32 %v2440_v9, %v2011_v26 }
 0x961   : > { %v2021_v25 = vadd.f32 %v2441_v37, %v2016_v24 }
 0x963   : > { %2023 = vst [vmem:[%s844_s25 + $0x8] sm:$0xff] %v2021_v25 }
 0x964   : > { %2797 = shalt.err (!%p2794_p8)
}
 0x965   : > { %s2868_s14 = smov 128   ;;  %s2869_s20 = smov 8  }
 0x966   : > { %2321 = dma.vmem_to_hbm [thread:$0]  (%p3057_p0), %s2038_s26, 256, %s2040_s10, %s2025_s27, %s2868_s14, %s2868_s14, %s2869_s20  }
 0x967 PF: > { %s3577_s19 = sld [smem:[#allocation24_spill]]  ;;  %p3579_p9 = scmp.ge.s32.totalorder %s2852_s24, 2 }
 0x969   : > { %p2353_p2 = pnand %p3579_p9, %p3065_p5 }
 0x96b   : > { %p2354_p4 = pneg %p2353_p2 }
 0x96d   : > { %s2054_s16 = sand.u32 1, %s3577_s19  }
 0x96e   : > { %s2055_s8 = scalar_lea.sflag [#allocation4], %s2054_s16 }
 0x96f   : > { %2835 = dma.done.wait (%p2354_p4), %s2055_s8, 256  }
 0x970   : > { %2837 = vsyncadd (%p2354_p4), %s2055_s8, 4294967040  ;;  %s3580_s24 = sld [smem:[#allocation26_spill]]  ;;  %s3583_s1 = smov %s2844_s22 }
 0x971   : > { %s3581_s30 = sld [smem:[#allocation25_spill]] }
 0x972   : > { %s3582_s23 = sld [smem:[#allocation27_spill]] }
 0x976   : > { %p39_p1 = scmp.ge.s32.totalorder %s3580_s24, 4  }
 0x977   : > { %s3584_s22 = smov %s3581_s30 }
 0x978   :  { %41 = sbr.rel (!%p39_p1) target bundleno = 27 (0x1b), region = 196 }
 0x97d   :  { %2061 = vsyncpa [#allocation3], 1 }
 0x97e   :  { %2063 = vsyncpa [#allocation3 + $0x1], 1 }
 0x97f   :  { %2064 = vsyncpa [#allocation6], 1 }
 0x980   :  { %2066 = vsyncpa [#allocation6 + $0x1], 1 }
 0x981   :  { %2067 = vsyncpa [#allocation9], 1 }
 0x982   :  { %2068 = vsyncpa [#allocation12], 1 }
 0x983   :  { %2069 = vsyncpa [#allocation15], 1 }
 0x984   :  { %2070 = vsyncpa [#allocation4], 1 }
 0x985   :  { %2072 = vsyncpa [#allocation4 + $0x1], 1 }

</bundles_post_ra>
